<compile_context>
chip_gen: v5e
topology: v5e:2x2
jax: 0.10.0
libtpu: 0.0.40
codegen_flags: <defaults>
</compile_context>

<pallas_src>
import functools

import jax
import jax.numpy as jnp
from jax.experimental import pallas as pl
from jax.experimental.pallas import tpu as pltpu

# ----------------------------- model sizes ---------------------------------
PROG_VOCAB = 50          # progVocabSize
EMBED = 32               # opts.embedDim
HIDDEN = 32              # opts.hiddenDim
BIDIRECTIONAL = True
HS = 2 * HIDDEN if BIDIRECTIONAL else HIDDEN     # LSTM hidden size = 64
NUM_LAYERS = 2           # opts.numLayers
B = 2                    # batch
TP = 8                   # program (decoder input) length
TQ = 8                   # quest length (questO time dim)


def _sigmoid(z):
    # single EUP tanh instead of exp + VPU divide (perf review)
    return 0.5 * (jnp.tanh(0.5 * z) + 1.0)


# ------------------------------ fused kernel --------------------------------
def decoder_kernel(tok_ref,                       # SMEM (B, Tp) int32 (prefetched)
                   emb_ref,                       # (V, E)
                   enc_ref,                       # (B, HS)     encOut
                   qo_ref,                        # (B, Tq, HS) questO
                   w0ih_ref, w0hh_ref, b0_ref,    # layer-0 LSTM weights (in,4H)/(HS,4H)/(1,4H)
                   w1ih_ref, w1hh_ref, b1_ref,    # layer-1 LSTM weights
                   faw_ref, fab_ref,              # fcAtt (2HS, HS), (1, HS)
                   fow_ref, fob_ref,              # fcOut (HS, V), (1, V)
                   pred_ref,                      # (B, Tp, V) log-softmax output
                   hn_ref,                        # (numLayers, B, HS)
                   cn_ref,                        # (numLayers, B, HS)
                   *, batch, tp, hs, vocab):
    Bb, T, H = batch, tp, hs

    # ---- embedding gather: tokens in SMEM, table resident in VMEM ----------
    rows = []
    for t in range(T):                 # time-major row order: row = t*B + b
        for b in range(Bb):
            tok = tok_ref[b, t]
            rows.append(emb_ref[pl.ds(tok, 1), :])          # (1, E)
    x0 = jnp.concatenate(rows, axis=0)                       # (T*B, E)

    enc = enc_ref[...]                                       # (B, HS) == h0 == c0

    # ---- load weights once (hoisted out of the unrolled recurrence) --------
    w0ih = w0ih_ref[...]; w0hh = w0hh_ref[...]; b0 = b0_ref[...]
    w1ih = w1ih_ref[...]; w1hh = w1hh_ref[...]; b1 = b1_ref[...]

    def run_layer(x_in, wih, whh, bias):
        # hoisted input projection: one matmul for the whole sequence
        gx = jnp.dot(x_in, wih, preferred_element_type=jnp.float32) + bias  # (T*B, 4H)
        h = enc
        c = enc
        outs = []
        for t in range(T):                                   # static unroll
            g = gx[t * Bb:(t + 1) * Bb, :] + jnp.dot(
                h, whh, preferred_element_type=jnp.float32)  # (B, 4H)
            i = _sigmoid(g[:, 0 * H:1 * H])                  # PyTorch gate order i,f,g,o
            f = _sigmoid(g[:, 1 * H:2 * H])
            gg = jnp.tanh(g[:, 2 * H:3 * H])
            o = _sigmoid(g[:, 3 * H:4 * H])
            c = f * c + i * gg
            h = o * jnp.tanh(c)
            outs.append(h)
        return outs, h, c

    outs0, h_l0, c_l0 = run_layer(x0, w0ih, w0hh, b0)
    x1 = jnp.concatenate(outs0, axis=0)                      # (T*B, HS) time-major
    outs1, h_l1, c_l1 = run_layer(x1, w1ih, w1hh, b1)

    hn_ref[0] = h_l0
    hn_ref[1] = h_l1
    cn_ref[0] = c_l0
    cn_ref[1] = c_l1

    # outProg batch-first (B, T, HS)
    outProg = jnp.concatenate([h[:, None, :] for h in outs1], axis=1)
    questO = qo_ref[...]                                     # (B, Tq, HS)

    # ---- attention: bmm, softmax over Tq, bmm -------------------------------
    att = jnp.einsum('bph,bqh->bpq', outProg, questO,
                     preferred_element_type=jnp.float32)     # (B, T, Tq)
    att = att - jnp.max(att, axis=-1, keepdims=True)
    e = jnp.exp(att)
    att = e / jnp.sum(e, axis=-1, keepdims=True)
    context = jnp.einsum('bpq,bqh->bph', att, questO,
                         preferred_element_type=jnp.float32)  # (B, T, HS)

    # ---- fcAtt + tanh, fcOut, log_softmax -----------------------------------
    cat = jnp.concatenate([outProg, context], axis=-1)       # (B, T, 2*HS)
    catf = cat.reshape(Bb * T, 2 * H)                         # lane-dense (16, 128)
    hid = jnp.tanh(jnp.dot(catf, faw_ref[...],
                           preferred_element_type=jnp.float32) + fab_ref[...])
    logits = jnp.dot(hid, fow_ref[...],
                     preferred_element_type=jnp.float32) + fob_ref[...]   # (B*T, V)
    m = jnp.max(logits, axis=-1, keepdims=True)
    lse = m + jnp.log(jnp.sum(jnp.exp(logits - m), axis=-1, keepdims=True))
    pred_ref[...] = (logits - lse).reshape(Bb, T, vocab)


# -------------------------------- wrapper ------------------------------------
def decoder_forward(prog_tokens, encOut, questO, params):
    Bb, T = prog_tokens.shape
    V, _ = params["embedding"].shape
    H = encOut.shape[-1]

    inputs = [params["embedding"], encOut, questO,
              params["w0_ih"], params["w0_hh"], params["b0"],
              params["w1_ih"], params["w1_hh"], params["b1"],
              params["fcAtt_w"], params["fcAtt_b"],
              params["fcOut_w"], params["fcOut_b"]]

    def full_spec(shape):
        nd = len(shape)
        # index_map gets (grid_i, tokens_prefetch_ref)
        return pl.BlockSpec(shape, lambda i, tok, _nd=nd: (0,) * _nd)

    in_specs = [full_spec(a.shape) for a in inputs]
    out_shape = (jax.ShapeDtypeStruct((Bb, T, V), jnp.float32),
                 jax.ShapeDtypeStruct((NUM_LAYERS, Bb, H), jnp.float32),
                 jax.ShapeDtypeStruct((NUM_LAYERS, Bb, H), jnp.float32))
    out_specs = [full_spec((Bb, T, V)),
                 full_spec((NUM_LAYERS, Bb, H)),
                 full_spec((NUM_LAYERS, Bb, H))]

    kernel = functools.partial(decoder_kernel, batch=Bb, tp=T, hs=H, vocab=V)
    pred, h_n, c_n = pl.pallas_call(
        kernel,
        out_shape=out_shape,
        grid_spec=pltpu.PrefetchScalarGridSpec(
            num_scalar_prefetch=1,        # prog token ids -> SMEM
            grid=(1,),
            in_specs=in_specs,
            out_specs=out_specs),
        compiler_params=pltpu.CompilerParams(
            dimension_semantics=("arbitrary",)),
    )(prog_tokens, *inputs)
    return pred, (h_n, c_n)


# ------------------------------ parameters -----------------------------------
def init_params(key):
    ks = jax.random.split(key, 11)
    H4 = 4 * HS

    def rnd(k, shape):
        return 0.1 * jax.random.normal(k, shape, jnp.float32)

    return {
        "embedding": rnd(ks[0], (PROG_VOCAB, EMBED)),
        # LSTM weights stored (in, 4H); gate order i, f, g, o; bias = b_ih + b_hh fused
        "w0_ih": rnd(ks[1], (EMBED, H4)),
        "w0_hh": rnd(ks[2], (HS, H4)),
        "b0": rnd(ks[3], (1, H4)),
        "w1_ih": rnd(ks[4], (HS, H4)),
        "w1_hh": rnd(ks[5], (HS, H4)),
        "b1": rnd(ks[6], (1, H4)),
        # fcAtt: Linear(2*HS, HS);  fcOut: Linear(HS, V)  (stored as (in, out))
        "fcAtt_w": rnd(ks[7], (2 * HS, HS)),
        "fcAtt_b": rnd(ks[8], (1, HS)),
        "fcOut_w": rnd(ks[9], (HS, PROG_VOCAB)),
        "fcOut_b": rnd(ks[10], (1, PROG_VOCAB)),
    }


# --------------------------------- main ---------------------------------------
if __name__ == "__main__":
    key = jax.random.PRNGKey(0)
    kp, kt, ke, kq = jax.random.split(key, 4)

    params = init_params(kp)
    prog = jax.random.randint(kt, (B, TP), 0, PROG_VOCAB, dtype=jnp.int32)
    encOut = 0.1 * jax.random.normal(ke, (B, HS), jnp.float32)      # encoder output
    questO = 0.1 * jax.random.normal(kq, (B, TQ, HS), jnp.float32)  # quest LSTM outputs

    pred, (h_n, c_n) = decoder_forward(prog, encOut, questO, params)
    jax.block_until_ready((pred, h_n, c_n))

    assert pred.shape == (B, TP, PROG_VOCAB)
    assert h_n.shape == (NUM_LAYERS, B, HS)
    assert c_n.shape == (NUM_LAYERS, B, HS)
    print("KERNEL_OK")
</pallas_src>

<mosaic_0001>
module attributes {stable_mosaic.version = 11 : i64} {
  func.func @decoder_kernel(%arg0: i32, %arg1: memref<2x8xi32, #tpu.memory_space<smem>>, %arg2: memref<50x32xf32, #tpu.memory_space<vmem>>, %arg3: memref<2x64xf32, #tpu.memory_space<vmem>>, %arg4: memref<2x8x64xf32, #tpu.memory_space<vmem>>, %arg5: memref<32x256xf32, #tpu.memory_space<vmem>>, %arg6: memref<64x256xf32, #tpu.memory_space<vmem>>, %arg7: memref<1x256xf32, #tpu.memory_space<vmem>>, %arg8: memref<64x256xf32, #tpu.memory_space<vmem>>, %arg9: memref<64x256xf32, #tpu.memory_space<vmem>>, %arg10: memref<1x256xf32, #tpu.memory_space<vmem>>, %arg11: memref<128x64xf32, #tpu.memory_space<vmem>>, %arg12: memref<1x64xf32, #tpu.memory_space<vmem>>, %arg13: memref<64x50xf32, #tpu.memory_space<vmem>>, %arg14: memref<1x50xf32, #tpu.memory_space<vmem>>, %arg15: memref<2x8x50xf32, #tpu.memory_space<vmem>>, %arg16: memref<2x2x64xf32, #tpu.memory_space<vmem>>, %arg17: memref<2x2x64xf32, #tpu.memory_space<vmem>>) attributes {dimension_semantics = [#tpu.dimension_semantics<arbitrary>], iteration_bounds = array<i64: 1>, scalar_prefetch = 1 : i64, scratch_operands = 0 : i64, tpu.core_type = #tpu.core_type<tc>, window_params = [{pipeline_mode = #tpu.pipeline_mode<synchronous>, transform_indices = @transform_0, window_bounds = array<i64: 50, 32>}, {pipeline_mode = #tpu.pipeline_mode<synchronous>, transform_indices = @transform_1, window_bounds = array<i64: 2, 64>}, {pipeline_mode = #tpu.pipeline_mode<synchronous>, transform_indices = @transform_2, window_bounds = array<i64: 2, 8, 64>}, {pipeline_mode = #tpu.pipeline_mode<synchronous>, transform_indices = @transform_3, window_bounds = array<i64: 32, 256>}, {pipeline_mode = #tpu.pipeline_mode<synchronous>, transform_indices = @transform_4, window_bounds = array<i64: 64, 256>}, {pipeline_mode = #tpu.pipeline_mode<synchronous>, transform_indices = @transform_5, window_bounds = array<i64: 1, 256>}, {pipeline_mode = #tpu.pipeline_mode<synchronous>, transform_indices = @transform_6, window_bounds = array<i64: 64, 256>}, {pipeline_mode = #tpu.pipeline_mode<synchronous>, transform_indices = @transform_7, window_bounds = array<i64: 64, 256>}, {pipeline_mode = #tpu.pipeline_mode<synchronous>, transform_indices = @transform_8, window_bounds = array<i64: 1, 256>}, {pipeline_mode = #tpu.pipeline_mode<synchronous>, transform_indices = @transform_9, window_bounds = array<i64: 128, 64>}, {pipeline_mode = #tpu.pipeline_mode<synchronous>, transform_indices = @transform_10, window_bounds = array<i64: 1, 64>}, {pipeline_mode = #tpu.pipeline_mode<synchronous>, transform_indices = @transform_11, window_bounds = array<i64: 64, 50>}, {pipeline_mode = #tpu.pipeline_mode<synchronous>, transform_indices = @transform_12, window_bounds = array<i64: 1, 50>}, {pipeline_mode = #tpu.pipeline_mode<synchronous>, transform_indices = @transform_13, window_bounds = array<i64: 2, 8, 50>}, {pipeline_mode = #tpu.pipeline_mode<synchronous>, transform_indices = @transform_14, window_bounds = array<i64: 2, 2, 64>}, {pipeline_mode = #tpu.pipeline_mode<synchronous>, transform_indices = @transform_15, window_bounds = array<i64: 2, 2, 64>}]} {
    %c0 = arith.constant 0 : index
    %c0_0 = arith.constant 0 : index
    %0 = memref.load %arg1[%c0, %c0_0] : memref<2x8xi32, #tpu.memory_space<smem>>
    %1 = arith.index_cast %0 : i32 to index
    %c0_1 = arith.constant 0 : index
    %2 = vector.load %arg2[%1, %c0_1] : memref<50x32xf32, #tpu.memory_space<vmem>>, vector<1x32xf32>
    %c1 = arith.constant 1 : index
    %c0_2 = arith.constant 0 : index
    %3 = memref.load %arg1[%c1, %c0_2] : memref<2x8xi32, #tpu.memory_space<smem>>
    %4 = arith.index_cast %3 : i32 to index
    %c0_3 = arith.constant 0 : index
    %5 = vector.load %arg2[%4, %c0_3] : memref<50x32xf32, #tpu.memory_space<vmem>>, vector<1x32xf32>
    %c0_4 = arith.constant 0 : index
    %c1_5 = arith.constant 1 : index
    %6 = memref.load %arg1[%c0_4, %c1_5] : memref<2x8xi32, #tpu.memory_space<smem>>
    %7 = arith.index_cast %6 : i32 to index
    %c0_6 = arith.constant 0 : index
    %8 = vector.load %arg2[%7, %c0_6] : memref<50x32xf32, #tpu.memory_space<vmem>>, vector<1x32xf32>
    %c1_7 = arith.constant 1 : index
    %c1_8 = arith.constant 1 : index
    %9 = memref.load %arg1[%c1_7, %c1_8] : memref<2x8xi32, #tpu.memory_space<smem>>
    %10 = arith.index_cast %9 : i32 to index
    %c0_9 = arith.constant 0 : index
    %11 = vector.load %arg2[%10, %c0_9] : memref<50x32xf32, #tpu.memory_space<vmem>>, vector<1x32xf32>
    %c0_10 = arith.constant 0 : index
    %c2 = arith.constant 2 : index
    %12 = memref.load %arg1[%c0_10, %c2] : memref<2x8xi32, #tpu.memory_space<smem>>
    %13 = arith.index_cast %12 : i32 to index
    %c0_11 = arith.constant 0 : index
    %14 = vector.load %arg2[%13, %c0_11] : memref<50x32xf32, #tpu.memory_space<vmem>>, vector<1x32xf32>
    %c1_12 = arith.constant 1 : index
    %c2_13 = arith.constant 2 : index
    %15 = memref.load %arg1[%c1_12, %c2_13] : memref<2x8xi32, #tpu.memory_space<smem>>
    %16 = arith.index_cast %15 : i32 to index
    %c0_14 = arith.constant 0 : index
    %17 = vector.load %arg2[%16, %c0_14] : memref<50x32xf32, #tpu.memory_space<vmem>>, vector<1x32xf32>
    %c0_15 = arith.constant 0 : index
    %c3 = arith.constant 3 : index
    %18 = memref.load %arg1[%c0_15, %c3] : memref<2x8xi32, #tpu.memory_space<smem>>
    %19 = arith.index_cast %18 : i32 to index
    %c0_16 = arith.constant 0 : index
    %20 = vector.load %arg2[%19, %c0_16] : memref<50x32xf32, #tpu.memory_space<vmem>>, vector<1x32xf32>
    %c1_17 = arith.constant 1 : index
    %c3_18 = arith.constant 3 : index
    %21 = memref.load %arg1[%c1_17, %c3_18] : memref<2x8xi32, #tpu.memory_space<smem>>
    %22 = arith.index_cast %21 : i32 to index
    %c0_19 = arith.constant 0 : index
    %23 = vector.load %arg2[%22, %c0_19] : memref<50x32xf32, #tpu.memory_space<vmem>>, vector<1x32xf32>
    %c0_20 = arith.constant 0 : index
    %c4 = arith.constant 4 : index
    %24 = memref.load %arg1[%c0_20, %c4] : memref<2x8xi32, #tpu.memory_space<smem>>
    %25 = arith.index_cast %24 : i32 to index
    %c0_21 = arith.constant 0 : index
    %26 = vector.load %arg2[%25, %c0_21] : memref<50x32xf32, #tpu.memory_space<vmem>>, vector<1x32xf32>
    %c1_22 = arith.constant 1 : index
    %c4_23 = arith.constant 4 : index
    %27 = memref.load %arg1[%c1_22, %c4_23] : memref<2x8xi32, #tpu.memory_space<smem>>
    %28 = arith.index_cast %27 : i32 to index
    %c0_24 = arith.constant 0 : index
    %29 = vector.load %arg2[%28, %c0_24] : memref<50x32xf32, #tpu.memory_space<vmem>>, vector<1x32xf32>
    %c0_25 = arith.constant 0 : index
    %c5 = arith.constant 5 : index
    %30 = memref.load %arg1[%c0_25, %c5] : memref<2x8xi32, #tpu.memory_space<smem>>
    %31 = arith.index_cast %30 : i32 to index
    %c0_26 = arith.constant 0 : index
    %32 = vector.load %arg2[%31, %c0_26] : memref<50x32xf32, #tpu.memory_space<vmem>>, vector<1x32xf32>
    %c1_27 = arith.constant 1 : index
    %c5_28 = arith.constant 5 : index
    %33 = memref.load %arg1[%c1_27, %c5_28] : memref<2x8xi32, #tpu.memory_space<smem>>
    %34 = arith.index_cast %33 : i32 to index
    %c0_29 = arith.constant 0 : index
    %35 = vector.load %arg2[%34, %c0_29] : memref<50x32xf32, #tpu.memory_space<vmem>>, vector<1x32xf32>
    %c0_30 = arith.constant 0 : index
    %c6 = arith.constant 6 : index
    %36 = memref.load %arg1[%c0_30, %c6] : memref<2x8xi32, #tpu.memory_space<smem>>
    %37 = arith.index_cast %36 : i32 to index
    %c0_31 = arith.constant 0 : index
    %38 = vector.load %arg2[%37, %c0_31] : memref<50x32xf32, #tpu.memory_space<vmem>>, vector<1x32xf32>
    %c1_32 = arith.constant 1 : index
    %c6_33 = arith.constant 6 : index
    %39 = memref.load %arg1[%c1_32, %c6_33] : memref<2x8xi32, #tpu.memory_space<smem>>
    %40 = arith.index_cast %39 : i32 to index
    %c0_34 = arith.constant 0 : index
    %41 = vector.load %arg2[%40, %c0_34] : memref<50x32xf32, #tpu.memory_space<vmem>>, vector<1x32xf32>
    %c0_35 = arith.constant 0 : index
    %c7 = arith.constant 7 : index
    %42 = memref.load %arg1[%c0_35, %c7] : memref<2x8xi32, #tpu.memory_space<smem>>
    %43 = arith.index_cast %42 : i32 to index
    %c0_36 = arith.constant 0 : index
    %44 = vector.load %arg2[%43, %c0_36] : memref<50x32xf32, #tpu.memory_space<vmem>>, vector<1x32xf32>
    %c1_37 = arith.constant 1 : index
    %c7_38 = arith.constant 7 : index
    %45 = memref.load %arg1[%c1_37, %c7_38] : memref<2x8xi32, #tpu.memory_space<smem>>
    %46 = arith.index_cast %45 : i32 to index
    %c0_39 = arith.constant 0 : index
    %47 = vector.load %arg2[%46, %c0_39] : memref<50x32xf32, #tpu.memory_space<vmem>>, vector<1x32xf32>
    %48 = tpu.concatenate %2, %5, %8, %11, %14, %17, %20, %23, %26, %29, %32, %35, %38, %41, %44, %47 in 0 : vector<1x32xf32>, vector<1x32xf32>, vector<1x32xf32>, vector<1x32xf32>, vector<1x32xf32>, vector<1x32xf32>, vector<1x32xf32>, vector<1x32xf32>, vector<1x32xf32>, vector<1x32xf32>, vector<1x32xf32>, vector<1x32xf32>, vector<1x32xf32>, vector<1x32xf32>, vector<1x32xf32>, vector<1x32xf32> -> vector<16x32xf32>
    %c0_40 = arith.constant 0 : index
    %c0_41 = arith.constant 0 : index
    %49 = vector.load %arg3[%c0_40, %c0_41] : memref<2x64xf32, #tpu.memory_space<vmem>>, vector<2x64xf32>
    %c0_42 = arith.constant 0 : index
    %c0_43 = arith.constant 0 : index
    %50 = vector.load %arg5[%c0_42, %c0_43] : memref<32x256xf32, #tpu.memory_space<vmem>>, vector<32x256xf32>
    %c0_44 = arith.constant 0 : index
    %c0_45 = arith.constant 0 : index
    %51 = vector.load %arg6[%c0_44, %c0_45] : memref<64x256xf32, #tpu.memory_space<vmem>>, vector<64x256xf32>
    %c0_46 = arith.constant 0 : index
    %c0_47 = arith.constant 0 : index
    %52 = vector.load %arg7[%c0_46, %c0_47] : memref<1x256xf32, #tpu.memory_space<vmem>>, vector<1x256xf32>
    %c0_48 = arith.constant 0 : index
    %c0_49 = arith.constant 0 : index
    %53 = vector.load %arg8[%c0_48, %c0_49] : memref<64x256xf32, #tpu.memory_space<vmem>>, vector<64x256xf32>
    %c0_50 = arith.constant 0 : index
    %c0_51 = arith.constant 0 : index
    %54 = vector.load %arg9[%c0_50, %c0_51] : memref<64x256xf32, #tpu.memory_space<vmem>>, vector<64x256xf32>
    %c0_52 = arith.constant 0 : index
    %c0_53 = arith.constant 0 : index
    %55 = vector.load %arg10[%c0_52, %c0_53] : memref<1x256xf32, #tpu.memory_space<vmem>>, vector<1x256xf32>
    %cst = arith.constant dense<0.000000e+00> : vector<16x256xf32>
    %56 = tpu.matmul %48, %50, %cst {dimension_numbers = #tpu.dot_dimension_numbers<[1], [0], [0], [1], [0, 0, 1, 1], [], []>} : vector<16x32xf32>, vector<32x256xf32>, vector<16x256xf32> -> vector<16x256xf32>
    %57 = vector.broadcast %52 : vector<1x256xf32> to vector<16x256xf32>
    %58 = arith.addf %56, %57 : vector<16x256xf32>
    %59 = vector.extract_strided_slice %58 {offsets = [0, 0], sizes = [2, 256], strides = [1, 1]} : vector<16x256xf32> to vector<2x256xf32>
    %cst_54 = arith.constant dense<0.000000e+00> : vector<2x256xf32>
    %60 = tpu.matmul %49, %51, %cst_54 {dimension_numbers = #tpu.dot_dimension_numbers<[1], [0], [0], [1], [0, 0, 1, 1], [], []>} : vector<2x64xf32>, vector<64x256xf32>, vector<2x256xf32> -> vector<2x256xf32>
    %61 = arith.addf %59, %60 : vector<2x256xf32>
    %62 = vector.extract_strided_slice %61 {offsets = [0, 0], sizes = [2, 64], strides = [1, 1]} : vector<2x256xf32> to vector<2x64xf32>
    %cst_55 = arith.constant 5.000000e-01 : f32
    %63 = vector.broadcast %cst_55 : f32 to vector<2x64xf32>
    %64 = arith.mulf %63, %62 : vector<2x64xf32>
    %65 = math.tanh %64 : vector<2x64xf32>
    %cst_56 = arith.constant 1.000000e+00 : f32
    %66 = vector.broadcast %cst_56 : f32 to vector<2x64xf32>
    %67 = arith.addf %65, %66 : vector<2x64xf32>
    %cst_57 = arith.constant 5.000000e-01 : f32
    %68 = vector.broadcast %cst_57 : f32 to vector<2x64xf32>
    %69 = arith.mulf %68, %67 : vector<2x64xf32>
    %70 = vector.extract_strided_slice %61 {offsets = [0, 64], sizes = [2, 64], strides = [1, 1]} : vector<2x256xf32> to vector<2x64xf32>
    %cst_58 = arith.constant 5.000000e-01 : f32
    %71 = vector.broadcast %cst_58 : f32 to vector<2x64xf32>
    %72 = arith.mulf %71, %70 : vector<2x64xf32>
    %73 = math.tanh %72 : vector<2x64xf32>
    %cst_59 = arith.constant 1.000000e+00 : f32
    %74 = vector.broadcast %cst_59 : f32 to vector<2x64xf32>
    %75 = arith.addf %73, %74 : vector<2x64xf32>
    %cst_60 = arith.constant 5.000000e-01 : f32
    %76 = vector.broadcast %cst_60 : f32 to vector<2x64xf32>
    %77 = arith.mulf %76, %75 : vector<2x64xf32>
    %78 = vector.extract_strided_slice %61 {offsets = [0, 128], sizes = [2, 64], strides = [1, 1]} : vector<2x256xf32> to vector<2x64xf32>
    %79 = math.tanh %78 : vector<2x64xf32>
    %80 = vector.extract_strided_slice %61 {offsets = [0, 192], sizes = [2, 64], strides = [1, 1]} : vector<2x256xf32> to vector<2x64xf32>
    %cst_61 = arith.constant 5.000000e-01 : f32
    %81 = vector.broadcast %cst_61 : f32 to vector<2x64xf32>
    %82 = arith.mulf %81, %80 : vector<2x64xf32>
    %83 = math.tanh %82 : vector<2x64xf32>
    %cst_62 = arith.constant 1.000000e+00 : f32
    %84 = vector.broadcast %cst_62 : f32 to vector<2x64xf32>
    %85 = arith.addf %83, %84 : vector<2x64xf32>
    %cst_63 = arith.constant 5.000000e-01 : f32
    %86 = vector.broadcast %cst_63 : f32 to vector<2x64xf32>
    %87 = arith.mulf %86, %85 : vector<2x64xf32>
    %88 = arith.mulf %77, %49 : vector<2x64xf32>
    %89 = arith.mulf %69, %79 : vector<2x64xf32>
    %90 = arith.addf %88, %89 : vector<2x64xf32>
    %91 = math.tanh %90 : vector<2x64xf32>
    %92 = arith.mulf %87, %91 : vector<2x64xf32>
    %93 = vector.extract_strided_slice %58 {offsets = [2, 0], sizes = [2, 256], strides = [1, 1]} : vector<16x256xf32> to vector<2x256xf32>
    %cst_64 = arith.constant dense<0.000000e+00> : vector<2x256xf32>
    %94 = tpu.matmul %92, %51, %cst_64 {dimension_numbers = #tpu.dot_dimension_numbers<[1], [0], [0], [1], [0, 0, 1, 1], [], []>} : vector<2x64xf32>, vector<64x256xf32>, vector<2x256xf32> -> vector<2x256xf32>
    %95 = arith.addf %93, %94 : vector<2x256xf32>
    %96 = vector.extract_strided_slice %95 {offsets = [0, 0], sizes = [2, 64], strides = [1, 1]} : vector<2x256xf32> to vector<2x64xf32>
    %cst_65 = arith.constant 5.000000e-01 : f32
    %97 = vector.broadcast %cst_65 : f32 to vector<2x64xf32>
    %98 = arith.mulf %97, %96 : vector<2x64xf32>
    %99 = math.tanh %98 : vector<2x64xf32>
    %cst_66 = arith.constant 1.000000e+00 : f32
    %100 = vector.broadcast %cst_66 : f32 to vector<2x64xf32>
    %101 = arith.addf %99, %100 : vector<2x64xf32>
    %cst_67 = arith.constant 5.000000e-01 : f32
    %102 = vector.broadcast %cst_67 : f32 to vector<2x64xf32>
    %103 = arith.mulf %102, %101 : vector<2x64xf32>
    %104 = vector.extract_strided_slice %95 {offsets = [0, 64], sizes = [2, 64], strides = [1, 1]} : vector<2x256xf32> to vector<2x64xf32>
    %cst_68 = arith.constant 5.000000e-01 : f32
    %105 = vector.broadcast %cst_68 : f32 to vector<2x64xf32>
    %106 = arith.mulf %105, %104 : vector<2x64xf32>
    %107 = math.tanh %106 : vector<2x64xf32>
    %cst_69 = arith.constant 1.000000e+00 : f32
    %108 = vector.broadcast %cst_69 : f32 to vector<2x64xf32>
    %109 = arith.addf %107, %108 : vector<2x64xf32>
    %cst_70 = arith.constant 5.000000e-01 : f32
    %110 = vector.broadcast %cst_70 : f32 to vector<2x64xf32>
    %111 = arith.mulf %110, %109 : vector<2x64xf32>
    %112 = vector.extract_strided_slice %95 {offsets = [0, 128], sizes = [2, 64], strides = [1, 1]} : vector<2x256xf32> to vector<2x64xf32>
    %113 = math.tanh %112 : vector<2x64xf32>
    %114 = vector.extract_strided_slice %95 {offsets = [0, 192], sizes = [2, 64], strides = [1, 1]} : vector<2x256xf32> to vector<2x64xf32>
    %cst_71 = arith.constant 5.000000e-01 : f32
    %115 = vector.broadcast %cst_71 : f32 to vector<2x64xf32>
    %116 = arith.mulf %115, %114 : vector<2x64xf32>
    %117 = math.tanh %116 : vector<2x64xf32>
    %cst_72 = arith.constant 1.000000e+00 : f32
    %118 = vector.broadcast %cst_72 : f32 to vector<2x64xf32>
    %119 = arith.addf %117, %118 : vector<2x64xf32>
    %cst_73 = arith.constant 5.000000e-01 : f32
    %120 = vector.broadcast %cst_73 : f32 to vector<2x64xf32>
    %121 = arith.mulf %120, %119 : vector<2x64xf32>
    %122 = arith.mulf %111, %90 : vector<2x64xf32>
    %123 = arith.mulf %103, %113 : vector<2x64xf32>
    %124 = arith.addf %122, %123 : vector<2x64xf32>
    %125 = math.tanh %124 : vector<2x64xf32>
    %126 = arith.mulf %121, %125 : vector<2x64xf32>
    %127 = vector.extract_strided_slice %58 {offsets = [4, 0], sizes = [2, 256], strides = [1, 1]} : vector<16x256xf32> to vector<2x256xf32>
    %cst_74 = arith.constant dense<0.000000e+00> : vector<2x256xf32>
    %128 = tpu.matmul %126, %51, %cst_74 {dimension_numbers = #tpu.dot_dimension_numbers<[1], [0], [0], [1], [0, 0, 1, 1], [], []>} : vector<2x64xf32>, vector<64x256xf32>, vector<2x256xf32> -> vector<2x256xf32>
    %129 = arith.addf %127, %128 : vector<2x256xf32>
    %130 = vector.extract_strided_slice %129 {offsets = [0, 0], sizes = [2, 64], strides = [1, 1]} : vector<2x256xf32> to vector<2x64xf32>
    %cst_75 = arith.constant 5.000000e-01 : f32
    %131 = vector.broadcast %cst_75 : f32 to vector<2x64xf32>
    %132 = arith.mulf %131, %130 : vector<2x64xf32>
    %133 = math.tanh %132 : vector<2x64xf32>
    %cst_76 = arith.constant 1.000000e+00 : f32
    %134 = vector.broadcast %cst_76 : f32 to vector<2x64xf32>
    %135 = arith.addf %133, %134 : vector<2x64xf32>
    %cst_77 = arith.constant 5.000000e-01 : f32
    %136 = vector.broadcast %cst_77 : f32 to vector<2x64xf32>
    %137 = arith.mulf %136, %135 : vector<2x64xf32>
    %138 = vector.extract_strided_slice %129 {offsets = [0, 64], sizes = [2, 64], strides = [1, 1]} : vector<2x256xf32> to vector<2x64xf32>
    %cst_78 = arith.constant 5.000000e-01 : f32
    %139 = vector.broadcast %cst_78 : f32 to vector<2x64xf32>
    %140 = arith.mulf %139, %138 : vector<2x64xf32>
    %141 = math.tanh %140 : vector<2x64xf32>
    %cst_79 = arith.constant 1.000000e+00 : f32
    %142 = vector.broadcast %cst_79 : f32 to vector<2x64xf32>
    %143 = arith.addf %141, %142 : vector<2x64xf32>
    %cst_80 = arith.constant 5.000000e-01 : f32
    %144 = vector.broadcast %cst_80 : f32 to vector<2x64xf32>
    %145 = arith.mulf %144, %143 : vector<2x64xf32>
    %146 = vector.extract_strided_slice %129 {offsets = [0, 128], sizes = [2, 64], strides = [1, 1]} : vector<2x256xf32> to vector<2x64xf32>
    %147 = math.tanh %146 : vector<2x64xf32>
    %148 = vector.extract_strided_slice %129 {offsets = [0, 192], sizes = [2, 64], strides = [1, 1]} : vector<2x256xf32> to vector<2x64xf32>
    %cst_81 = arith.constant 5.000000e-01 : f32
    %149 = vector.broadcast %cst_81 : f32 to vector<2x64xf32>
    %150 = arith.mulf %149, %148 : vector<2x64xf32>
    %151 = math.tanh %150 : vector<2x64xf32>
    %cst_82 = arith.constant 1.000000e+00 : f32
    %152 = vector.broadcast %cst_82 : f32 to vector<2x64xf32>
    %153 = arith.addf %151, %152 : vector<2x64xf32>
    %cst_83 = arith.constant 5.000000e-01 : f32
    %154 = vector.broadcast %cst_83 : f32 to vector<2x64xf32>
    %155 = arith.mulf %154, %153 : vector<2x64xf32>
    %156 = arith.mulf %145, %124 : vector<2x64xf32>
    %157 = arith.mulf %137, %147 : vector<2x64xf32>
    %158 = arith.addf %156, %157 : vector<2x64xf32>
    %159 = math.tanh %158 : vector<2x64xf32>
    %160 = arith.mulf %155, %159 : vector<2x64xf32>
    %161 = vector.extract_strided_slice %58 {offsets = [6, 0], sizes = [2, 256], strides = [1, 1]} : vector<16x256xf32> to vector<2x256xf32>
    %cst_84 = arith.constant dense<0.000000e+00> : vector<2x256xf32>
    %162 = tpu.matmul %160, %51, %cst_84 {dimension_numbers = #tpu.dot_dimension_numbers<[1], [0], [0], [1], [0, 0, 1, 1], [], []>} : vector<2x64xf32>, vector<64x256xf32>, vector<2x256xf32> -> vector<2x256xf32>
    %163 = arith.addf %161, %162 : vector<2x256xf32>
    %164 = vector.extract_strided_slice %163 {offsets = [0, 0], sizes = [2, 64], strides = [1, 1]} : vector<2x256xf32> to vector<2x64xf32>
    %cst_85 = arith.constant 5.000000e-01 : f32
    %165 = vector.broadcast %cst_85 : f32 to vector<2x64xf32>
    %166 = arith.mulf %165, %164 : vector<2x64xf32>
    %167 = math.tanh %166 : vector<2x64xf32>
    %cst_86 = arith.constant 1.000000e+00 : f32
    %168 = vector.broadcast %cst_86 : f32 to vector<2x64xf32>
    %169 = arith.addf %167, %168 : vector<2x64xf32>
    %cst_87 = arith.constant 5.000000e-01 : f32
    %170 = vector.broadcast %cst_87 : f32 to vector<2x64xf32>
    %171 = arith.mulf %170, %169 : vector<2x64xf32>
    %172 = vector.extract_strided_slice %163 {offsets = [0, 64], sizes = [2, 64], strides = [1, 1]} : vector<2x256xf32> to vector<2x64xf32>
    %cst_88 = arith.constant 5.000000e-01 : f32
    %173 = vector.broadcast %cst_88 : f32 to vector<2x64xf32>
    %174 = arith.mulf %173, %172 : vector<2x64xf32>
    %175 = math.tanh %174 : vector<2x64xf32>
    %cst_89 = arith.constant 1.000000e+00 : f32
    %176 = vector.broadcast %cst_89 : f32 to vector<2x64xf32>
    %177 = arith.addf %175, %176 : vector<2x64xf32>
    %cst_90 = arith.constant 5.000000e-01 : f32
    %178 = vector.broadcast %cst_90 : f32 to vector<2x64xf32>
    %179 = arith.mulf %178, %177 : vector<2x64xf32>
    %180 = vector.extract_strided_slice %163 {offsets = [0, 128], sizes = [2, 64], strides = [1, 1]} : vector<2x256xf32> to vector<2x64xf32>
    %181 = math.tanh %180 : vector<2x64xf32>
    %182 = vector.extract_strided_slice %163 {offsets = [0, 192], sizes = [2, 64], strides = [1, 1]} : vector<2x256xf32> to vector<2x64xf32>
    %cst_91 = arith.constant 5.000000e-01 : f32
    %183 = vector.broadcast %cst_91 : f32 to vector<2x64xf32>
    %184 = arith.mulf %183, %182 : vector<2x64xf32>
    %185 = math.tanh %184 : vector<2x64xf32>
    %cst_92 = arith.constant 1.000000e+00 : f32
    %186 = vector.broadcast %cst_92 : f32 to vector<2x64xf32>
    %187 = arith.addf %185, %186 : vector<2x64xf32>
    %cst_93 = arith.constant 5.000000e-01 : f32
    %188 = vector.broadcast %cst_93 : f32 to vector<2x64xf32>
    %189 = arith.mulf %188, %187 : vector<2x64xf32>
    %190 = arith.mulf %179, %158 : vector<2x64xf32>
    %191 = arith.mulf %171, %181 : vector<2x64xf32>
    %192 = arith.addf %190, %191 : vector<2x64xf32>
    %193 = math.tanh %192 : vector<2x64xf32>
    %194 = arith.mulf %189, %193 : vector<2x64xf32>
    %195 = vector.extract_strided_slice %58 {offsets = [8, 0], sizes = [2, 256], strides = [1, 1]} : vector<16x256xf32> to vector<2x256xf32>
    %cst_94 = arith.constant dense<0.000000e+00> : vector<2x256xf32>
    %196 = tpu.matmul %194, %51, %cst_94 {dimension_numbers = #tpu.dot_dimension_numbers<[1], [0], [0], [1], [0, 0, 1, 1], [], []>} : vector<2x64xf32>, vector<64x256xf32>, vector<2x256xf32> -> vector<2x256xf32>
    %197 = arith.addf %195, %196 : vector<2x256xf32>
    %198 = vector.extract_strided_slice %197 {offsets = [0, 0], sizes = [2, 64], strides = [1, 1]} : vector<2x256xf32> to vector<2x64xf32>
    %cst_95 = arith.constant 5.000000e-01 : f32
    %199 = vector.broadcast %cst_95 : f32 to vector<2x64xf32>
    %200 = arith.mulf %199, %198 : vector<2x64xf32>
    %201 = math.tanh %200 : vector<2x64xf32>
    %cst_96 = arith.constant 1.000000e+00 : f32
    %202 = vector.broadcast %cst_96 : f32 to vector<2x64xf32>
    %203 = arith.addf %201, %202 : vector<2x64xf32>
    %cst_97 = arith.constant 5.000000e-01 : f32
    %204 = vector.broadcast %cst_97 : f32 to vector<2x64xf32>
    %205 = arith.mulf %204, %203 : vector<2x64xf32>
    %206 = vector.extract_strided_slice %197 {offsets = [0, 64], sizes = [2, 64], strides = [1, 1]} : vector<2x256xf32> to vector<2x64xf32>
    %cst_98 = arith.constant 5.000000e-01 : f32
    %207 = vector.broadcast %cst_98 : f32 to vector<2x64xf32>
    %208 = arith.mulf %207, %206 : vector<2x64xf32>
    %209 = math.tanh %208 : vector<2x64xf32>
    %cst_99 = arith.constant 1.000000e+00 : f32
    %210 = vector.broadcast %cst_99 : f32 to vector<2x64xf32>
    %211 = arith.addf %209, %210 : vector<2x64xf32>
    %cst_100 = arith.constant 5.000000e-01 : f32
    %212 = vector.broadcast %cst_100 : f32 to vector<2x64xf32>
    %213 = arith.mulf %212, %211 : vector<2x64xf32>
    %214 = vector.extract_strided_slice %197 {offsets = [0, 128], sizes = [2, 64], strides = [1, 1]} : vector<2x256xf32> to vector<2x64xf32>
    %215 = math.tanh %214 : vector<2x64xf32>
    %216 = vector.extract_strided_slice %197 {offsets = [0, 192], sizes = [2, 64], strides = [1, 1]} : vector<2x256xf32> to vector<2x64xf32>
    %cst_101 = arith.constant 5.000000e-01 : f32
    %217 = vector.broadcast %cst_101 : f32 to vector<2x64xf32>
    %218 = arith.mulf %217, %216 : vector<2x64xf32>
    %219 = math.tanh %218 : vector<2x64xf32>
    %cst_102 = arith.constant 1.000000e+00 : f32
    %220 = vector.broadcast %cst_102 : f32 to vector<2x64xf32>
    %221 = arith.addf %219, %220 : vector<2x64xf32>
    %cst_103 = arith.constant 5.000000e-01 : f32
    %222 = vector.broadcast %cst_103 : f32 to vector<2x64xf32>
    %223 = arith.mulf %222, %221 : vector<2x64xf32>
    %224 = arith.mulf %213, %192 : vector<2x64xf32>
    %225 = arith.mulf %205, %215 : vector<2x64xf32>
    %226 = arith.addf %224, %225 : vector<2x64xf32>
    %227 = math.tanh %226 : vector<2x64xf32>
    %228 = arith.mulf %223, %227 : vector<2x64xf32>
    %229 = vector.extract_strided_slice %58 {offsets = [10, 0], sizes = [2, 256], strides = [1, 1]} : vector<16x256xf32> to vector<2x256xf32>
    %cst_104 = arith.constant dense<0.000000e+00> : vector<2x256xf32>
    %230 = tpu.matmul %228, %51, %cst_104 {dimension_numbers = #tpu.dot_dimension_numbers<[1], [0], [0], [1], [0, 0, 1, 1], [], []>} : vector<2x64xf32>, vector<64x256xf32>, vector<2x256xf32> -> vector<2x256xf32>
    %231 = arith.addf %229, %230 : vector<2x256xf32>
    %232 = vector.extract_strided_slice %231 {offsets = [0, 0], sizes = [2, 64], strides = [1, 1]} : vector<2x256xf32> to vector<2x64xf32>
    %cst_105 = arith.constant 5.000000e-01 : f32
    %233 = vector.broadcast %cst_105 : f32 to vector<2x64xf32>
    %234 = arith.mulf %233, %232 : vector<2x64xf32>
    %235 = math.tanh %234 : vector<2x64xf32>
    %cst_106 = arith.constant 1.000000e+00 : f32
    %236 = vector.broadcast %cst_106 : f32 to vector<2x64xf32>
    %237 = arith.addf %235, %236 : vector<2x64xf32>
    %cst_107 = arith.constant 5.000000e-01 : f32
    %238 = vector.broadcast %cst_107 : f32 to vector<2x64xf32>
    %239 = arith.mulf %238, %237 : vector<2x64xf32>
    %240 = vector.extract_strided_slice %231 {offsets = [0, 64], sizes = [2, 64], strides = [1, 1]} : vector<2x256xf32> to vector<2x64xf32>
    %cst_108 = arith.constant 5.000000e-01 : f32
    %241 = vector.broadcast %cst_108 : f32 to vector<2x64xf32>
    %242 = arith.mulf %241, %240 : vector<2x64xf32>
    %243 = math.tanh %242 : vector<2x64xf32>
    %cst_109 = arith.constant 1.000000e+00 : f32
    %244 = vector.broadcast %cst_109 : f32 to vector<2x64xf32>
    %245 = arith.addf %243, %244 : vector<2x64xf32>
    %cst_110 = arith.constant 5.000000e-01 : f32
    %246 = vector.broadcast %cst_110 : f32 to vector<2x64xf32>
    %247 = arith.mulf %246, %245 : vector<2x64xf32>
    %248 = vector.extract_strided_slice %231 {offsets = [0, 128], sizes = [2, 64], strides = [1, 1]} : vector<2x256xf32> to vector<2x64xf32>
    %249 = math.tanh %248 : vector<2x64xf32>
    %250 = vector.extract_strided_slice %231 {offsets = [0, 192], sizes = [2, 64], strides = [1, 1]} : vector<2x256xf32> to vector<2x64xf32>
    %cst_111 = arith.constant 5.000000e-01 : f32
    %251 = vector.broadcast %cst_111 : f32 to vector<2x64xf32>
    %252 = arith.mulf %251, %250 : vector<2x64xf32>
    %253 = math.tanh %252 : vector<2x64xf32>
    %cst_112 = arith.constant 1.000000e+00 : f32
    %254 = vector.broadcast %cst_112 : f32 to vector<2x64xf32>
    %255 = arith.addf %253, %254 : vector<2x64xf32>
    %cst_113 = arith.constant 5.000000e-01 : f32
    %256 = vector.broadcast %cst_113 : f32 to vector<2x64xf32>
    %257 = arith.mulf %256, %255 : vector<2x64xf32>
    %258 = arith.mulf %247, %226 : vector<2x64xf32>
    %259 = arith.mulf %239, %249 : vector<2x64xf32>
    %260 = arith.addf %258, %259 : vector<2x64xf32>
    %261 = math.tanh %260 : vector<2x64xf32>
    %262 = arith.mulf %257, %261 : vector<2x64xf32>
    %263 = vector.extract_strided_slice %58 {offsets = [12, 0], sizes = [2, 256], strides = [1, 1]} : vector<16x256xf32> to vector<2x256xf32>
    %cst_114 = arith.constant dense<0.000000e+00> : vector<2x256xf32>
    %264 = tpu.matmul %262, %51, %cst_114 {dimension_numbers = #tpu.dot_dimension_numbers<[1], [0], [0], [1], [0, 0, 1, 1], [], []>} : vector<2x64xf32>, vector<64x256xf32>, vector<2x256xf32> -> vector<2x256xf32>
    %265 = arith.addf %263, %264 : vector<2x256xf32>
    %266 = vector.extract_strided_slice %265 {offsets = [0, 0], sizes = [2, 64], strides = [1, 1]} : vector<2x256xf32> to vector<2x64xf32>
    %cst_115 = arith.constant 5.000000e-01 : f32
    %267 = vector.broadcast %cst_115 : f32 to vector<2x64xf32>
    %268 = arith.mulf %267, %266 : vector<2x64xf32>
    %269 = math.tanh %268 : vector<2x64xf32>
    %cst_116 = arith.constant 1.000000e+00 : f32
    %270 = vector.broadcast %cst_116 : f32 to vector<2x64xf32>
    %271 = arith.addf %269, %270 : vector<2x64xf32>
    %cst_117 = arith.constant 5.000000e-01 : f32
    %272 = vector.broadcast %cst_117 : f32 to vector<2x64xf32>
    %273 = arith.mulf %272, %271 : vector<2x64xf32>
    %274 = vector.extract_strided_slice %265 {offsets = [0, 64], sizes = [2, 64], strides = [1, 1]} : vector<2x256xf32> to vector<2x64xf32>
    %cst_118 = arith.constant 5.000000e-01 : f32
    %275 = vector.broadcast %cst_118 : f32 to vector<2x64xf32>
    %276 = arith.mulf %275, %274 : vector<2x64xf32>
    %277 = math.tanh %276 : vector<2x64xf32>
    %cst_119 = arith.constant 1.000000e+00 : f32
    %278 = vector.broadcast %cst_119 : f32 to vector<2x64xf32>
    %279 = arith.addf %277, %278 : vector<2x64xf32>
    %cst_120 = arith.constant 5.000000e-01 : f32
    %280 = vector.broadcast %cst_120 : f32 to vector<2x64xf32>
    %281 = arith.mulf %280, %279 : vector<2x64xf32>
    %282 = vector.extract_strided_slice %265 {offsets = [0, 128], sizes = [2, 64], strides = [1, 1]} : vector<2x256xf32> to vector<2x64xf32>
    %283 = math.tanh %282 : vector<2x64xf32>
    %284 = vector.extract_strided_slice %265 {offsets = [0, 192], sizes = [2, 64], strides = [1, 1]} : vector<2x256xf32> to vector<2x64xf32>
    %cst_121 = arith.constant 5.000000e-01 : f32
    %285 = vector.broadcast %cst_121 : f32 to vector<2x64xf32>
    %286 = arith.mulf %285, %284 : vector<2x64xf32>
    %287 = math.tanh %286 : vector<2x64xf32>
    %cst_122 = arith.constant 1.000000e+00 : f32
    %288 = vector.broadcast %cst_122 : f32 to vector<2x64xf32>
    %289 = arith.addf %287, %288 : vector<2x64xf32>
    %cst_123 = arith.constant 5.000000e-01 : f32
    %290 = vector.broadcast %cst_123 : f32 to vector<2x64xf32>
    %291 = arith.mulf %290, %289 : vector<2x64xf32>
    %292 = arith.mulf %281, %260 : vector<2x64xf32>
    %293 = arith.mulf %273, %283 : vector<2x64xf32>
    %294 = arith.addf %292, %293 : vector<2x64xf32>
    %295 = math.tanh %294 : vector<2x64xf32>
    %296 = arith.mulf %291, %295 : vector<2x64xf32>
    %297 = vector.extract_strided_slice %58 {offsets = [14, 0], sizes = [2, 256], strides = [1, 1]} : vector<16x256xf32> to vector<2x256xf32>
    %cst_124 = arith.constant dense<0.000000e+00> : vector<2x256xf32>
    %298 = tpu.matmul %296, %51, %cst_124 {dimension_numbers = #tpu.dot_dimension_numbers<[1], [0], [0], [1], [0, 0, 1, 1], [], []>} : vector<2x64xf32>, vector<64x256xf32>, vector<2x256xf32> -> vector<2x256xf32>
    %299 = arith.addf %297, %298 : vector<2x256xf32>
    %300 = vector.extract_strided_slice %299 {offsets = [0, 0], sizes = [2, 64], strides = [1, 1]} : vector<2x256xf32> to vector<2x64xf32>
    %cst_125 = arith.constant 5.000000e-01 : f32
    %301 = vector.broadcast %cst_125 : f32 to vector<2x64xf32>
    %302 = arith.mulf %301, %300 : vector<2x64xf32>
    %303 = math.tanh %302 : vector<2x64xf32>
    %cst_126 = arith.constant 1.000000e+00 : f32
    %304 = vector.broadcast %cst_126 : f32 to vector<2x64xf32>
    %305 = arith.addf %303, %304 : vector<2x64xf32>
    %cst_127 = arith.constant 5.000000e-01 : f32
    %306 = vector.broadcast %cst_127 : f32 to vector<2x64xf32>
    %307 = arith.mulf %306, %305 : vector<2x64xf32>
    %308 = vector.extract_strided_slice %299 {offsets = [0, 64], sizes = [2, 64], strides = [1, 1]} : vector<2x256xf32> to vector<2x64xf32>
    %cst_128 = arith.constant 5.000000e-01 : f32
    %309 = vector.broadcast %cst_128 : f32 to vector<2x64xf32>
    %310 = arith.mulf %309, %308 : vector<2x64xf32>
    %311 = math.tanh %310 : vector<2x64xf32>
    %cst_129 = arith.constant 1.000000e+00 : f32
    %312 = vector.broadcast %cst_129 : f32 to vector<2x64xf32>
    %313 = arith.addf %311, %312 : vector<2x64xf32>
    %cst_130 = arith.constant 5.000000e-01 : f32
    %314 = vector.broadcast %cst_130 : f32 to vector<2x64xf32>
    %315 = arith.mulf %314, %313 : vector<2x64xf32>
    %316 = vector.extract_strided_slice %299 {offsets = [0, 128], sizes = [2, 64], strides = [1, 1]} : vector<2x256xf32> to vector<2x64xf32>
    %317 = math.tanh %316 : vector<2x64xf32>
    %318 = vector.extract_strided_slice %299 {offsets = [0, 192], sizes = [2, 64], strides = [1, 1]} : vector<2x256xf32> to vector<2x64xf32>
    %cst_131 = arith.constant 5.000000e-01 : f32
    %319 = vector.broadcast %cst_131 : f32 to vector<2x64xf32>
    %320 = arith.mulf %319, %318 : vector<2x64xf32>
    %321 = math.tanh %320 : vector<2x64xf32>
    %cst_132 = arith.constant 1.000000e+00 : f32
    %322 = vector.broadcast %cst_132 : f32 to vector<2x64xf32>
    %323 = arith.addf %321, %322 : vector<2x64xf32>
    %cst_133 = arith.constant 5.000000e-01 : f32
    %324 = vector.broadcast %cst_133 : f32 to vector<2x64xf32>
    %325 = arith.mulf %324, %323 : vector<2x64xf32>
    %326 = arith.mulf %315, %294 : vector<2x64xf32>
    %327 = arith.mulf %307, %317 : vector<2x64xf32>
    %328 = arith.addf %326, %327 : vector<2x64xf32>
    %329 = math.tanh %328 : vector<2x64xf32>
    %330 = arith.mulf %325, %329 : vector<2x64xf32>
    %331 = tpu.concatenate %92, %126, %160, %194, %228, %262, %296, %330 in 0 : vector<2x64xf32>, vector<2x64xf32>, vector<2x64xf32>, vector<2x64xf32>, vector<2x64xf32>, vector<2x64xf32>, vector<2x64xf32>, vector<2x64xf32> -> vector<16x64xf32>
    %cst_134 = arith.constant dense<0.000000e+00> : vector<16x256xf32>
    %332 = tpu.matmul %331, %53, %cst_134 {dimension_numbers = #tpu.dot_dimension_numbers<[1], [0], [0], [1], [0, 0, 1, 1], [], []>} : vector<16x64xf32>, vector<64x256xf32>, vector<16x256xf32> -> vector<16x256xf32>
    %333 = vector.broadcast %55 : vector<1x256xf32> to vector<16x256xf32>
    %334 = arith.addf %332, %333 : vector<16x256xf32>
    %335 = vector.extract_strided_slice %334 {offsets = [0, 0], sizes = [2, 256], strides = [1, 1]} : vector<16x256xf32> to vector<2x256xf32>
    %cst_135 = arith.constant dense<0.000000e+00> : vector<2x256xf32>
    %336 = tpu.matmul %49, %54, %cst_135 {dimension_numbers = #tpu.dot_dimension_numbers<[1], [0], [0], [1], [0, 0, 1, 1], [], []>} : vector<2x64xf32>, vector<64x256xf32>, vector<2x256xf32> -> vector<2x256xf32>
    %337 = arith.addf %335, %336 : vector<2x256xf32>
    %338 = vector.extract_strided_slice %337 {offsets = [0, 0], sizes = [2, 64], strides = [1, 1]} : vector<2x256xf32> to vector<2x64xf32>
    %cst_136 = arith.constant 5.000000e-01 : f32
    %339 = vector.broadcast %cst_136 : f32 to vector<2x64xf32>
    %340 = arith.mulf %339, %338 : vector<2x64xf32>
    %341 = math.tanh %340 : vector<2x64xf32>
    %cst_137 = arith.constant 1.000000e+00 : f32
    %342 = vector.broadcast %cst_137 : f32 to vector<2x64xf32>
    %343 = arith.addf %341, %342 : vector<2x64xf32>
    %cst_138 = arith.constant 5.000000e-01 : f32
    %344 = vector.broadcast %cst_138 : f32 to vector<2x64xf32>
    %345 = arith.mulf %344, %343 : vector<2x64xf32>
    %346 = vector.extract_strided_slice %337 {offsets = [0, 64], sizes = [2, 64], strides = [1, 1]} : vector<2x256xf32> to vector<2x64xf32>
    %cst_139 = arith.constant 5.000000e-01 : f32
    %347 = vector.broadcast %cst_139 : f32 to vector<2x64xf32>
    %348 = arith.mulf %347, %346 : vector<2x64xf32>
    %349 = math.tanh %348 : vector<2x64xf32>
    %cst_140 = arith.constant 1.000000e+00 : f32
    %350 = vector.broadcast %cst_140 : f32 to vector<2x64xf32>
    %351 = arith.addf %349, %350 : vector<2x64xf32>
    %cst_141 = arith.constant 5.000000e-01 : f32
    %352 = vector.broadcast %cst_141 : f32 to vector<2x64xf32>
    %353 = arith.mulf %352, %351 : vector<2x64xf32>
    %354 = vector.extract_strided_slice %337 {offsets = [0, 128], sizes = [2, 64], strides = [1, 1]} : vector<2x256xf32> to vector<2x64xf32>
    %355 = math.tanh %354 : vector<2x64xf32>
    %356 = vector.extract_strided_slice %337 {offsets = [0, 192], sizes = [2, 64], strides = [1, 1]} : vector<2x256xf32> to vector<2x64xf32>
    %cst_142 = arith.constant 5.000000e-01 : f32
    %357 = vector.broadcast %cst_142 : f32 to vector<2x64xf32>
    %358 = arith.mulf %357, %356 : vector<2x64xf32>
    %359 = math.tanh %358 : vector<2x64xf32>
    %cst_143 = arith.constant 1.000000e+00 : f32
    %360 = vector.broadcast %cst_143 : f32 to vector<2x64xf32>
    %361 = arith.addf %359, %360 : vector<2x64xf32>
    %cst_144 = arith.constant 5.000000e-01 : f32
    %362 = vector.broadcast %cst_144 : f32 to vector<2x64xf32>
    %363 = arith.mulf %362, %361 : vector<2x64xf32>
    %364 = arith.mulf %353, %49 : vector<2x64xf32>
    %365 = arith.mulf %345, %355 : vector<2x64xf32>
    %366 = arith.addf %364, %365 : vector<2x64xf32>
    %367 = math.tanh %366 : vector<2x64xf32>
    %368 = arith.mulf %363, %367 : vector<2x64xf32>
    %369 = vector.extract_strided_slice %334 {offsets = [2, 0], sizes = [2, 256], strides = [1, 1]} : vector<16x256xf32> to vector<2x256xf32>
    %cst_145 = arith.constant dense<0.000000e+00> : vector<2x256xf32>
    %370 = tpu.matmul %368, %54, %cst_145 {dimension_numbers = #tpu.dot_dimension_numbers<[1], [0], [0], [1], [0, 0, 1, 1], [], []>} : vector<2x64xf32>, vector<64x256xf32>, vector<2x256xf32> -> vector<2x256xf32>
    %371 = arith.addf %369, %370 : vector<2x256xf32>
    %372 = vector.extract_strided_slice %371 {offsets = [0, 0], sizes = [2, 64], strides = [1, 1]} : vector<2x256xf32> to vector<2x64xf32>
    %cst_146 = arith.constant 5.000000e-01 : f32
    %373 = vector.broadcast %cst_146 : f32 to vector<2x64xf32>
    %374 = arith.mulf %373, %372 : vector<2x64xf32>
    %375 = math.tanh %374 : vector<2x64xf32>
    %cst_147 = arith.constant 1.000000e+00 : f32
    %376 = vector.broadcast %cst_147 : f32 to vector<2x64xf32>
    %377 = arith.addf %375, %376 : vector<2x64xf32>
    %cst_148 = arith.constant 5.000000e-01 : f32
    %378 = vector.broadcast %cst_148 : f32 to vector<2x64xf32>
    %379 = arith.mulf %378, %377 : vector<2x64xf32>
    %380 = vector.extract_strided_slice %371 {offsets = [0, 64], sizes = [2, 64], strides = [1, 1]} : vector<2x256xf32> to vector<2x64xf32>
    %cst_149 = arith.constant 5.000000e-01 : f32
    %381 = vector.broadcast %cst_149 : f32 to vector<2x64xf32>
    %382 = arith.mulf %381, %380 : vector<2x64xf32>
    %383 = math.tanh %382 : vector<2x64xf32>
    %cst_150 = arith.constant 1.000000e+00 : f32
    %384 = vector.broadcast %cst_150 : f32 to vector<2x64xf32>
    %385 = arith.addf %383, %384 : vector<2x64xf32>
    %cst_151 = arith.constant 5.000000e-01 : f32
    %386 = vector.broadcast %cst_151 : f32 to vector<2x64xf32>
    %387 = arith.mulf %386, %385 : vector<2x64xf32>
    %388 = vector.extract_strided_slice %371 {offsets = [0, 128], sizes = [2, 64], strides = [1, 1]} : vector<2x256xf32> to vector<2x64xf32>
    %389 = math.tanh %388 : vector<2x64xf32>
    %390 = vector.extract_strided_slice %371 {offsets = [0, 192], sizes = [2, 64], strides = [1, 1]} : vector<2x256xf32> to vector<2x64xf32>
    %cst_152 = arith.constant 5.000000e-01 : f32
    %391 = vector.broadcast %cst_152 : f32 to vector<2x64xf32>
    %392 = arith.mulf %391, %390 : vector<2x64xf32>
    %393 = math.tanh %392 : vector<2x64xf32>
    %cst_153 = arith.constant 1.000000e+00 : f32
    %394 = vector.broadcast %cst_153 : f32 to vector<2x64xf32>
    %395 = arith.addf %393, %394 : vector<2x64xf32>
    %cst_154 = arith.constant 5.000000e-01 : f32
    %396 = vector.broadcast %cst_154 : f32 to vector<2x64xf32>
    %397 = arith.mulf %396, %395 : vector<2x64xf32>
    %398 = arith.mulf %387, %366 : vector<2x64xf32>
    %399 = arith.mulf %379, %389 : vector<2x64xf32>
    %400 = arith.addf %398, %399 : vector<2x64xf32>
    %401 = math.tanh %400 : vector<2x64xf32>
    %402 = arith.mulf %397, %401 : vector<2x64xf32>
    %403 = vector.extract_strided_slice %334 {offsets = [4, 0], sizes = [2, 256], strides = [1, 1]} : vector<16x256xf32> to vector<2x256xf32>
    %cst_155 = arith.constant dense<0.000000e+00> : vector<2x256xf32>
    %404 = tpu.matmul %402, %54, %cst_155 {dimension_numbers = #tpu.dot_dimension_numbers<[1], [0], [0], [1], [0, 0, 1, 1], [], []>} : vector<2x64xf32>, vector<64x256xf32>, vector<2x256xf32> -> vector<2x256xf32>
    %405 = arith.addf %403, %404 : vector<2x256xf32>
    %406 = vector.extract_strided_slice %405 {offsets = [0, 0], sizes = [2, 64], strides = [1, 1]} : vector<2x256xf32> to vector<2x64xf32>
    %cst_156 = arith.constant 5.000000e-01 : f32
    %407 = vector.broadcast %cst_156 : f32 to vector<2x64xf32>
    %408 = arith.mulf %407, %406 : vector<2x64xf32>
    %409 = math.tanh %408 : vector<2x64xf32>
    %cst_157 = arith.constant 1.000000e+00 : f32
    %410 = vector.broadcast %cst_157 : f32 to vector<2x64xf32>
    %411 = arith.addf %409, %410 : vector<2x64xf32>
    %cst_158 = arith.constant 5.000000e-01 : f32
    %412 = vector.broadcast %cst_158 : f32 to vector<2x64xf32>
    %413 = arith.mulf %412, %411 : vector<2x64xf32>
    %414 = vector.extract_strided_slice %405 {offsets = [0, 64], sizes = [2, 64], strides = [1, 1]} : vector<2x256xf32> to vector<2x64xf32>
    %cst_159 = arith.constant 5.000000e-01 : f32
    %415 = vector.broadcast %cst_159 : f32 to vector<2x64xf32>
    %416 = arith.mulf %415, %414 : vector<2x64xf32>
    %417 = math.tanh %416 : vector<2x64xf32>
    %cst_160 = arith.constant 1.000000e+00 : f32
    %418 = vector.broadcast %cst_160 : f32 to vector<2x64xf32>
    %419 = arith.addf %417, %418 : vector<2x64xf32>
    %cst_161 = arith.constant 5.000000e-01 : f32
    %420 = vector.broadcast %cst_161 : f32 to vector<2x64xf32>
    %421 = arith.mulf %420, %419 : vector<2x64xf32>
    %422 = vector.extract_strided_slice %405 {offsets = [0, 128], sizes = [2, 64], strides = [1, 1]} : vector<2x256xf32> to vector<2x64xf32>
    %423 = math.tanh %422 : vector<2x64xf32>
    %424 = vector.extract_strided_slice %405 {offsets = [0, 192], sizes = [2, 64], strides = [1, 1]} : vector<2x256xf32> to vector<2x64xf32>
    %cst_162 = arith.constant 5.000000e-01 : f32
    %425 = vector.broadcast %cst_162 : f32 to vector<2x64xf32>
    %426 = arith.mulf %425, %424 : vector<2x64xf32>
    %427 = math.tanh %426 : vector<2x64xf32>
    %cst_163 = arith.constant 1.000000e+00 : f32
    %428 = vector.broadcast %cst_163 : f32 to vector<2x64xf32>
    %429 = arith.addf %427, %428 : vector<2x64xf32>
    %cst_164 = arith.constant 5.000000e-01 : f32
    %430 = vector.broadcast %cst_164 : f32 to vector<2x64xf32>
    %431 = arith.mulf %430, %429 : vector<2x64xf32>
    %432 = arith.mulf %421, %400 : vector<2x64xf32>
    %433 = arith.mulf %413, %423 : vector<2x64xf32>
    %434 = arith.addf %432, %433 : vector<2x64xf32>
    %435 = math.tanh %434 : vector<2x64xf32>
    %436 = arith.mulf %431, %435 : vector<2x64xf32>
    %437 = vector.extract_strided_slice %334 {offsets = [6, 0], sizes = [2, 256], strides = [1, 1]} : vector<16x256xf32> to vector<2x256xf32>
    %cst_165 = arith.constant dense<0.000000e+00> : vector<2x256xf32>
    %438 = tpu.matmul %436, %54, %cst_165 {dimension_numbers = #tpu.dot_dimension_numbers<[1], [0], [0], [1], [0, 0, 1, 1], [], []>} : vector<2x64xf32>, vector<64x256xf32>, vector<2x256xf32> -> vector<2x256xf32>
    %439 = arith.addf %437, %438 : vector<2x256xf32>
    %440 = vector.extract_strided_slice %439 {offsets = [0, 0], sizes = [2, 64], strides = [1, 1]} : vector<2x256xf32> to vector<2x64xf32>
    %cst_166 = arith.constant 5.000000e-01 : f32
    %441 = vector.broadcast %cst_166 : f32 to vector<2x64xf32>
    %442 = arith.mulf %441, %440 : vector<2x64xf32>
    %443 = math.tanh %442 : vector<2x64xf32>
    %cst_167 = arith.constant 1.000000e+00 : f32
    %444 = vector.broadcast %cst_167 : f32 to vector<2x64xf32>
    %445 = arith.addf %443, %444 : vector<2x64xf32>
    %cst_168 = arith.constant 5.000000e-01 : f32
    %446 = vector.broadcast %cst_168 : f32 to vector<2x64xf32>
    %447 = arith.mulf %446, %445 : vector<2x64xf32>
    %448 = vector.extract_strided_slice %439 {offsets = [0, 64], sizes = [2, 64], strides = [1, 1]} : vector<2x256xf32> to vector<2x64xf32>
    %cst_169 = arith.constant 5.000000e-01 : f32
    %449 = vector.broadcast %cst_169 : f32 to vector<2x64xf32>
    %450 = arith.mulf %449, %448 : vector<2x64xf32>
    %451 = math.tanh %450 : vector<2x64xf32>
    %cst_170 = arith.constant 1.000000e+00 : f32
    %452 = vector.broadcast %cst_170 : f32 to vector<2x64xf32>
    %453 = arith.addf %451, %452 : vector<2x64xf32>
    %cst_171 = arith.constant 5.000000e-01 : f32
    %454 = vector.broadcast %cst_171 : f32 to vector<2x64xf32>
    %455 = arith.mulf %454, %453 : vector<2x64xf32>
    %456 = vector.extract_strided_slice %439 {offsets = [0, 128], sizes = [2, 64], strides = [1, 1]} : vector<2x256xf32> to vector<2x64xf32>
    %457 = math.tanh %456 : vector<2x64xf32>
    %458 = vector.extract_strided_slice %439 {offsets = [0, 192], sizes = [2, 64], strides = [1, 1]} : vector<2x256xf32> to vector<2x64xf32>
    %cst_172 = arith.constant 5.000000e-01 : f32
    %459 = vector.broadcast %cst_172 : f32 to vector<2x64xf32>
    %460 = arith.mulf %459, %458 : vector<2x64xf32>
    %461 = math.tanh %460 : vector<2x64xf32>
    %cst_173 = arith.constant 1.000000e+00 : f32
    %462 = vector.broadcast %cst_173 : f32 to vector<2x64xf32>
    %463 = arith.addf %461, %462 : vector<2x64xf32>
    %cst_174 = arith.constant 5.000000e-01 : f32
    %464 = vector.broadcast %cst_174 : f32 to vector<2x64xf32>
    %465 = arith.mulf %464, %463 : vector<2x64xf32>
    %466 = arith.mulf %455, %434 : vector<2x64xf32>
    %467 = arith.mulf %447, %457 : vector<2x64xf32>
    %468 = arith.addf %466, %467 : vector<2x64xf32>
    %469 = math.tanh %468 : vector<2x64xf32>
    %470 = arith.mulf %465, %469 : vector<2x64xf32>
    %471 = vector.extract_strided_slice %334 {offsets = [8, 0], sizes = [2, 256], strides = [1, 1]} : vector<16x256xf32> to vector<2x256xf32>
    %cst_175 = arith.constant dense<0.000000e+00> : vector<2x256xf32>
    %472 = tpu.matmul %470, %54, %cst_175 {dimension_numbers = #tpu.dot_dimension_numbers<[1], [0], [0], [1], [0, 0, 1, 1], [], []>} : vector<2x64xf32>, vector<64x256xf32>, vector<2x256xf32> -> vector<2x256xf32>
    %473 = arith.addf %471, %472 : vector<2x256xf32>
    %474 = vector.extract_strided_slice %473 {offsets = [0, 0], sizes = [2, 64], strides = [1, 1]} : vector<2x256xf32> to vector<2x64xf32>
    %cst_176 = arith.constant 5.000000e-01 : f32
    %475 = vector.broadcast %cst_176 : f32 to vector<2x64xf32>
    %476 = arith.mulf %475, %474 : vector<2x64xf32>
    %477 = math.tanh %476 : vector<2x64xf32>
    %cst_177 = arith.constant 1.000000e+00 : f32
    %478 = vector.broadcast %cst_177 : f32 to vector<2x64xf32>
    %479 = arith.addf %477, %478 : vector<2x64xf32>
    %cst_178 = arith.constant 5.000000e-01 : f32
    %480 = vector.broadcast %cst_178 : f32 to vector<2x64xf32>
    %481 = arith.mulf %480, %479 : vector<2x64xf32>
    %482 = vector.extract_strided_slice %473 {offsets = [0, 64], sizes = [2, 64], strides = [1, 1]} : vector<2x256xf32> to vector<2x64xf32>
    %cst_179 = arith.constant 5.000000e-01 : f32
    %483 = vector.broadcast %cst_179 : f32 to vector<2x64xf32>
    %484 = arith.mulf %483, %482 : vector<2x64xf32>
    %485 = math.tanh %484 : vector<2x64xf32>
    %cst_180 = arith.constant 1.000000e+00 : f32
    %486 = vector.broadcast %cst_180 : f32 to vector<2x64xf32>
    %487 = arith.addf %485, %486 : vector<2x64xf32>
    %cst_181 = arith.constant 5.000000e-01 : f32
    %488 = vector.broadcast %cst_181 : f32 to vector<2x64xf32>
    %489 = arith.mulf %488, %487 : vector<2x64xf32>
    %490 = vector.extract_strided_slice %473 {offsets = [0, 128], sizes = [2, 64], strides = [1, 1]} : vector<2x256xf32> to vector<2x64xf32>
    %491 = math.tanh %490 : vector<2x64xf32>
    %492 = vector.extract_strided_slice %473 {offsets = [0, 192], sizes = [2, 64], strides = [1, 1]} : vector<2x256xf32> to vector<2x64xf32>
    %cst_182 = arith.constant 5.000000e-01 : f32
    %493 = vector.broadcast %cst_182 : f32 to vector<2x64xf32>
    %494 = arith.mulf %493, %492 : vector<2x64xf32>
    %495 = math.tanh %494 : vector<2x64xf32>
    %cst_183 = arith.constant 1.000000e+00 : f32
    %496 = vector.broadcast %cst_183 : f32 to vector<2x64xf32>
    %497 = arith.addf %495, %496 : vector<2x64xf32>
    %cst_184 = arith.constant 5.000000e-01 : f32
    %498 = vector.broadcast %cst_184 : f32 to vector<2x64xf32>
    %499 = arith.mulf %498, %497 : vector<2x64xf32>
    %500 = arith.mulf %489, %468 : vector<2x64xf32>
    %501 = arith.mulf %481, %491 : vector<2x64xf32>
    %502 = arith.addf %500, %501 : vector<2x64xf32>
    %503 = math.tanh %502 : vector<2x64xf32>
    %504 = arith.mulf %499, %503 : vector<2x64xf32>
    %505 = vector.extract_strided_slice %334 {offsets = [10, 0], sizes = [2, 256], strides = [1, 1]} : vector<16x256xf32> to vector<2x256xf32>
    %cst_185 = arith.constant dense<0.000000e+00> : vector<2x256xf32>
    %506 = tpu.matmul %504, %54, %cst_185 {dimension_numbers = #tpu.dot_dimension_numbers<[1], [0], [0], [1], [0, 0, 1, 1], [], []>} : vector<2x64xf32>, vector<64x256xf32>, vector<2x256xf32> -> vector<2x256xf32>
    %507 = arith.addf %505, %506 : vector<2x256xf32>
    %508 = vector.extract_strided_slice %507 {offsets = [0, 0], sizes = [2, 64], strides = [1, 1]} : vector<2x256xf32> to vector<2x64xf32>
    %cst_186 = arith.constant 5.000000e-01 : f32
    %509 = vector.broadcast %cst_186 : f32 to vector<2x64xf32>
    %510 = arith.mulf %509, %508 : vector<2x64xf32>
    %511 = math.tanh %510 : vector<2x64xf32>
    %cst_187 = arith.constant 1.000000e+00 : f32
    %512 = vector.broadcast %cst_187 : f32 to vector<2x64xf32>
    %513 = arith.addf %511, %512 : vector<2x64xf32>
    %cst_188 = arith.constant 5.000000e-01 : f32
    %514 = vector.broadcast %cst_188 : f32 to vector<2x64xf32>
    %515 = arith.mulf %514, %513 : vector<2x64xf32>
    %516 = vector.extract_strided_slice %507 {offsets = [0, 64], sizes = [2, 64], strides = [1, 1]} : vector<2x256xf32> to vector<2x64xf32>
    %cst_189 = arith.constant 5.000000e-01 : f32
    %517 = vector.broadcast %cst_189 : f32 to vector<2x64xf32>
    %518 = arith.mulf %517, %516 : vector<2x64xf32>
    %519 = math.tanh %518 : vector<2x64xf32>
    %cst_190 = arith.constant 1.000000e+00 : f32
    %520 = vector.broadcast %cst_190 : f32 to vector<2x64xf32>
    %521 = arith.addf %519, %520 : vector<2x64xf32>
    %cst_191 = arith.constant 5.000000e-01 : f32
    %522 = vector.broadcast %cst_191 : f32 to vector<2x64xf32>
    %523 = arith.mulf %522, %521 : vector<2x64xf32>
    %524 = vector.extract_strided_slice %507 {offsets = [0, 128], sizes = [2, 64], strides = [1, 1]} : vector<2x256xf32> to vector<2x64xf32>
    %525 = math.tanh %524 : vector<2x64xf32>
    %526 = vector.extract_strided_slice %507 {offsets = [0, 192], sizes = [2, 64], strides = [1, 1]} : vector<2x256xf32> to vector<2x64xf32>
    %cst_192 = arith.constant 5.000000e-01 : f32
    %527 = vector.broadcast %cst_192 : f32 to vector<2x64xf32>
    %528 = arith.mulf %527, %526 : vector<2x64xf32>
    %529 = math.tanh %528 : vector<2x64xf32>
    %cst_193 = arith.constant 1.000000e+00 : f32
    %530 = vector.broadcast %cst_193 : f32 to vector<2x64xf32>
    %531 = arith.addf %529, %530 : vector<2x64xf32>
    %cst_194 = arith.constant 5.000000e-01 : f32
    %532 = vector.broadcast %cst_194 : f32 to vector<2x64xf32>
    %533 = arith.mulf %532, %531 : vector<2x64xf32>
    %534 = arith.mulf %523, %502 : vector<2x64xf32>
    %535 = arith.mulf %515, %525 : vector<2x64xf32>
    %536 = arith.addf %534, %535 : vector<2x64xf32>
    %537 = math.tanh %536 : vector<2x64xf32>
    %538 = arith.mulf %533, %537 : vector<2x64xf32>
    %539 = vector.extract_strided_slice %334 {offsets = [12, 0], sizes = [2, 256], strides = [1, 1]} : vector<16x256xf32> to vector<2x256xf32>
    %cst_195 = arith.constant dense<0.000000e+00> : vector<2x256xf32>
    %540 = tpu.matmul %538, %54, %cst_195 {dimension_numbers = #tpu.dot_dimension_numbers<[1], [0], [0], [1], [0, 0, 1, 1], [], []>} : vector<2x64xf32>, vector<64x256xf32>, vector<2x256xf32> -> vector<2x256xf32>
    %541 = arith.addf %539, %540 : vector<2x256xf32>
    %542 = vector.extract_strided_slice %541 {offsets = [0, 0], sizes = [2, 64], strides = [1, 1]} : vector<2x256xf32> to vector<2x64xf32>
    %cst_196 = arith.constant 5.000000e-01 : f32
    %543 = vector.broadcast %cst_196 : f32 to vector<2x64xf32>
    %544 = arith.mulf %543, %542 : vector<2x64xf32>
    %545 = math.tanh %544 : vector<2x64xf32>
    %cst_197 = arith.constant 1.000000e+00 : f32
    %546 = vector.broadcast %cst_197 : f32 to vector<2x64xf32>
    %547 = arith.addf %545, %546 : vector<2x64xf32>
    %cst_198 = arith.constant 5.000000e-01 : f32
    %548 = vector.broadcast %cst_198 : f32 to vector<2x64xf32>
    %549 = arith.mulf %548, %547 : vector<2x64xf32>
    %550 = vector.extract_strided_slice %541 {offsets = [0, 64], sizes = [2, 64], strides = [1, 1]} : vector<2x256xf32> to vector<2x64xf32>
    %cst_199 = arith.constant 5.000000e-01 : f32
    %551 = vector.broadcast %cst_199 : f32 to vector<2x64xf32>
    %552 = arith.mulf %551, %550 : vector<2x64xf32>
    %553 = math.tanh %552 : vector<2x64xf32>
    %cst_200 = arith.constant 1.000000e+00 : f32
    %554 = vector.broadcast %cst_200 : f32 to vector<2x64xf32>
    %555 = arith.addf %553, %554 : vector<2x64xf32>
    %cst_201 = arith.constant 5.000000e-01 : f32
    %556 = vector.broadcast %cst_201 : f32 to vector<2x64xf32>
    %557 = arith.mulf %556, %555 : vector<2x64xf32>
    %558 = vector.extract_strided_slice %541 {offsets = [0, 128], sizes = [2, 64], strides = [1, 1]} : vector<2x256xf32> to vector<2x64xf32>
    %559 = math.tanh %558 : vector<2x64xf32>
    %560 = vector.extract_strided_slice %541 {offsets = [0, 192], sizes = [2, 64], strides = [1, 1]} : vector<2x256xf32> to vector<2x64xf32>
    %cst_202 = arith.constant 5.000000e-01 : f32
    %561 = vector.broadcast %cst_202 : f32 to vector<2x64xf32>
    %562 = arith.mulf %561, %560 : vector<2x64xf32>
    %563 = math.tanh %562 : vector<2x64xf32>
    %cst_203 = arith.constant 1.000000e+00 : f32
    %564 = vector.broadcast %cst_203 : f32 to vector<2x64xf32>
    %565 = arith.addf %563, %564 : vector<2x64xf32>
    %cst_204 = arith.constant 5.000000e-01 : f32
    %566 = vector.broadcast %cst_204 : f32 to vector<2x64xf32>
    %567 = arith.mulf %566, %565 : vector<2x64xf32>
    %568 = arith.mulf %557, %536 : vector<2x64xf32>
    %569 = arith.mulf %549, %559 : vector<2x64xf32>
    %570 = arith.addf %568, %569 : vector<2x64xf32>
    %571 = math.tanh %570 : vector<2x64xf32>
    %572 = arith.mulf %567, %571 : vector<2x64xf32>
    %573 = vector.extract_strided_slice %334 {offsets = [14, 0], sizes = [2, 256], strides = [1, 1]} : vector<16x256xf32> to vector<2x256xf32>
    %cst_205 = arith.constant dense<0.000000e+00> : vector<2x256xf32>
    %574 = tpu.matmul %572, %54, %cst_205 {dimension_numbers = #tpu.dot_dimension_numbers<[1], [0], [0], [1], [0, 0, 1, 1], [], []>} : vector<2x64xf32>, vector<64x256xf32>, vector<2x256xf32> -> vector<2x256xf32>
    %575 = arith.addf %573, %574 : vector<2x256xf32>
    %576 = vector.extract_strided_slice %575 {offsets = [0, 0], sizes = [2, 64], strides = [1, 1]} : vector<2x256xf32> to vector<2x64xf32>
    %cst_206 = arith.constant 5.000000e-01 : f32
    %577 = vector.broadcast %cst_206 : f32 to vector<2x64xf32>
    %578 = arith.mulf %577, %576 : vector<2x64xf32>
    %579 = math.tanh %578 : vector<2x64xf32>
    %cst_207 = arith.constant 1.000000e+00 : f32
    %580 = vector.broadcast %cst_207 : f32 to vector<2x64xf32>
    %581 = arith.addf %579, %580 : vector<2x64xf32>
    %cst_208 = arith.constant 5.000000e-01 : f32
    %582 = vector.broadcast %cst_208 : f32 to vector<2x64xf32>
    %583 = arith.mulf %582, %581 : vector<2x64xf32>
    %584 = vector.extract_strided_slice %575 {offsets = [0, 64], sizes = [2, 64], strides = [1, 1]} : vector<2x256xf32> to vector<2x64xf32>
    %cst_209 = arith.constant 5.000000e-01 : f32
    %585 = vector.broadcast %cst_209 : f32 to vector<2x64xf32>
    %586 = arith.mulf %585, %584 : vector<2x64xf32>
    %587 = math.tanh %586 : vector<2x64xf32>
    %cst_210 = arith.constant 1.000000e+00 : f32
    %588 = vector.broadcast %cst_210 : f32 to vector<2x64xf32>
    %589 = arith.addf %587, %588 : vector<2x64xf32>
    %cst_211 = arith.constant 5.000000e-01 : f32
    %590 = vector.broadcast %cst_211 : f32 to vector<2x64xf32>
    %591 = arith.mulf %590, %589 : vector<2x64xf32>
    %592 = vector.extract_strided_slice %575 {offsets = [0, 128], sizes = [2, 64], strides = [1, 1]} : vector<2x256xf32> to vector<2x64xf32>
    %593 = math.tanh %592 : vector<2x64xf32>
    %594 = vector.extract_strided_slice %575 {offsets = [0, 192], sizes = [2, 64], strides = [1, 1]} : vector<2x256xf32> to vector<2x64xf32>
    %cst_212 = arith.constant 5.000000e-01 : f32
    %595 = vector.broadcast %cst_212 : f32 to vector<2x64xf32>
    %596 = arith.mulf %595, %594 : vector<2x64xf32>
    %597 = math.tanh %596 : vector<2x64xf32>
    %cst_213 = arith.constant 1.000000e+00 : f32
    %598 = vector.broadcast %cst_213 : f32 to vector<2x64xf32>
    %599 = arith.addf %597, %598 : vector<2x64xf32>
    %cst_214 = arith.constant 5.000000e-01 : f32
    %600 = vector.broadcast %cst_214 : f32 to vector<2x64xf32>
    %601 = arith.mulf %600, %599 : vector<2x64xf32>
    %602 = arith.mulf %591, %570 : vector<2x64xf32>
    %603 = arith.mulf %583, %593 : vector<2x64xf32>
    %604 = arith.addf %602, %603 : vector<2x64xf32>
    %605 = math.tanh %604 : vector<2x64xf32>
    %606 = arith.mulf %601, %605 : vector<2x64xf32>
    %c0_215 = arith.constant 0 : index
    %c0_216 = arith.constant 0 : index
    %c0_217 = arith.constant 0 : index
    %607 = vector.load %arg16[%c0_215, %c0_216, %c0_217] : memref<2x2x64xf32, #tpu.memory_space<vmem>>, vector<1x2x64xf32>
    %608 = vector.shape_cast %607 : vector<1x2x64xf32> to vector<2x64xf32>
    %609 = vector.shape_cast %330 : vector<2x64xf32> to vector<1x2x64xf32>
    tpu.vector_store %arg16[%c0_215, %c0_216, %c0_217], %609 {strides = array<i32>} : memref<2x2x64xf32, #tpu.memory_space<vmem>>, vector<1x2x64xf32>,
    %c1_218 = arith.constant 1 : index
    %c0_219 = arith.constant 0 : index
    %c0_220 = arith.constant 0 : index
    %610 = vector.load %arg16[%c1_218, %c0_219, %c0_220] : memref<2x2x64xf32, #tpu.memory_space<vmem>>, vector<1x2x64xf32>
    %611 = vector.shape_cast %610 : vector<1x2x64xf32> to vector<2x64xf32>
    %612 = vector.shape_cast %606 : vector<2x64xf32> to vector<1x2x64xf32>
    tpu.vector_store %arg16[%c1_218, %c0_219, %c0_220], %612 {strides = array<i32>} : memref<2x2x64xf32, #tpu.memory_space<vmem>>, vector<1x2x64xf32>,
    %c0_221 = arith.constant 0 : index
    %c0_222 = arith.constant 0 : index
    %c0_223 = arith.constant 0 : index
    %613 = vector.load %arg17[%c0_221, %c0_222, %c0_223] : memref<2x2x64xf32, #tpu.memory_space<vmem>>, vector<1x2x64xf32>
    %614 = vector.shape_cast %613 : vector<1x2x64xf32> to vector<2x64xf32>
    %615 = vector.shape_cast %328 : vector<2x64xf32> to vector<1x2x64xf32>
    tpu.vector_store %arg17[%c0_221, %c0_222, %c0_223], %615 {strides = array<i32>} : memref<2x2x64xf32, #tpu.memory_space<vmem>>, vector<1x2x64xf32>,
    %c1_224 = arith.constant 1 : index
    %c0_225 = arith.constant 0 : index
    %c0_226 = arith.constant 0 : index
    %616 = vector.load %arg17[%c1_224, %c0_225, %c0_226] : memref<2x2x64xf32, #tpu.memory_space<vmem>>, vector<1x2x64xf32>
    %617 = vector.shape_cast %616 : vector<1x2x64xf32> to vector<2x64xf32>
    %618 = vector.shape_cast %604 : vector<2x64xf32> to vector<1x2x64xf32>
    tpu.vector_store %arg17[%c1_224, %c0_225, %c0_226], %618 {strides = array<i32>} : memref<2x2x64xf32, #tpu.memory_space<vmem>>, vector<1x2x64xf32>,
    %619 = vector.shape_cast %368 : vector<2x64xf32> to vector<2x1x64xf32>
    %620 = vector.shape_cast %402 : vector<2x64xf32> to vector<2x1x64xf32>
    %621 = vector.shape_cast %436 : vector<2x64xf32> to vector<2x1x64xf32>
    %622 = vector.shape_cast %470 : vector<2x64xf32> to vector<2x1x64xf32>
    %623 = vector.shape_cast %504 : vector<2x64xf32> to vector<2x1x64xf32>
    %624 = vector.shape_cast %538 : vector<2x64xf32> to vector<2x1x64xf32>
    %625 = vector.shape_cast %572 : vector<2x64xf32> to vector<2x1x64xf32>
    %626 = vector.shape_cast %606 : vector<2x64xf32> to vector<2x1x64xf32>
    %627 = tpu.concatenate %619, %620, %621, %622, %623, %624, %625, %626 in 1 : vector<2x1x64xf32>, vector<2x1x64xf32>, vector<2x1x64xf32>, vector<2x1x64xf32>, vector<2x1x64xf32>, vector<2x1x64xf32>, vector<2x1x64xf32>, vector<2x1x64xf32> -> vector<2x8x64xf32>
    %c0_227 = arith.constant 0 : index
    %c0_228 = arith.constant 0 : index
    %c0_229 = arith.constant 0 : index
    %628 = vector.load %arg4[%c0_227, %c0_228, %c0_229] : memref<2x8x64xf32, #tpu.memory_space<vmem>>, vector<2x8x64xf32>
    "tpu.trace_start"() <{level = 10 : i32, message = "bph,bqh->bpq"}> : () -> ()
    %cst_230 = arith.constant dense<0.000000e+00> : vector<2x8x8xf32>
    %629 = tpu.matmul %627, %628, %cst_230 {dimension_numbers = #tpu.dot_dimension_numbers<[2], [2], [1], [1], [0, 0, 0, 1, 1, 1], [0], [0]>} : vector<2x8x64xf32>, vector<2x8x64xf32>, vector<2x8x8xf32> -> vector<2x8x8xf32>
    "tpu.trace_stop"() : () -> ()
    %cst_231 = arith.constant dense<0xFF800000> : vector<2x8xf32>
    %630 = vector.multi_reduction <maximumf>, %629, %cst_231 [2] : vector<2x8x8xf32> to vector<2x8xf32>
    %631 = vector.shape_cast %630 : vector<2x8xf32> to vector<2x8x1xf32>
    %632 = vector.broadcast %631 : vector<2x8x1xf32> to vector<2x8x8xf32>
    %633 = arith.subf %629, %632 : vector<2x8x8xf32>
    %634 = math.exp %633 : vector<2x8x8xf32>
    %cst_232 = arith.constant dense<0.000000e+00> : vector<2x8xf32>
    %635 = vector.multi_reduction <add>, %634, %cst_232 [2] : vector<2x8x8xf32> to vector<2x8xf32>
    %636 = vector.shape_cast %635 : vector<2x8xf32> to vector<2x8x1xf32>
    %637 = vector.broadcast %636 : vector<2x8x1xf32> to vector<2x8x8xf32>
    %638 = arith.divf %634, %637 : vector<2x8x8xf32>
    "tpu.trace_start"() <{level = 10 : i32, message = "bpq,bqh->bph"}> : () -> ()
    %cst_233 = arith.constant dense<0.000000e+00> : vector<2x8x64xf32>
    %639 = tpu.matmul %638, %628, %cst_233 {dimension_numbers = #tpu.dot_dimension_numbers<[2], [1], [1], [2], [0, 0, 0, 1, 1, 2], [0], [0]>} : vector<2x8x8xf32>, vector<2x8x64xf32>, vector<2x8x64xf32> -> vector<2x8x64xf32>
    "tpu.trace_stop"() : () -> ()
    %640 = tpu.concatenate %627, %639 in 2 : vector<2x8x64xf32>, vector<2x8x64xf32> -> vector<2x8x128xf32>
    %641 = vector.shape_cast %640 : vector<2x8x128xf32> to vector<16x128xf32>
    %c0_234 = arith.constant 0 : index
    %c0_235 = arith.constant 0 : index
    %642 = vector.load %arg11[%c0_234, %c0_235] : memref<128x64xf32, #tpu.memory_space<vmem>>, vector<128x64xf32>
    %cst_236 = arith.constant dense<0.000000e+00> : vector<16x64xf32>
    %643 = tpu.matmul %641, %642, %cst_236 {dimension_numbers = #tpu.dot_dimension_numbers<[1], [0], [0], [1], [0, 0, 1, 1], [], []>} : vector<16x128xf32>, vector<128x64xf32>, vector<16x64xf32> -> vector<16x64xf32>
    %c0_237 = arith.constant 0 : index
    %c0_238 = arith.constant 0 : index
    %644 = vector.load %arg12[%c0_237, %c0_238] : memref<1x64xf32, #tpu.memory_space<vmem>>, vector<1x64xf32>
    %645 = vector.broadcast %644 : vector<1x64xf32> to vector<16x64xf32>
    %646 = arith.addf %643, %645 : vector<16x64xf32>
    %647 = math.tanh %646 : vector<16x64xf32>
    %c0_239 = arith.constant 0 : index
    %c0_240 = arith.constant 0 : index
    %648 = vector.load %arg13[%c0_239, %c0_240] : memref<64x50xf32, #tpu.memory_space<vmem>>, vector<64x50xf32>
    %cst_241 = arith.constant dense<0.000000e+00> : vector<16x50xf32>
    %649 = tpu.matmul %647, %648, %cst_241 {dimension_numbers = #tpu.dot_dimension_numbers<[1], [0], [0], [1], [0, 0, 1, 1], [], []>} : vector<16x64xf32>, vector<64x50xf32>, vector<16x50xf32> -> vector<16x50xf32>
    %c0_242 = arith.constant 0 : index
    %c0_243 = arith.constant 0 : index
    %650 = vector.load %arg14[%c0_242, %c0_243] : memref<1x50xf32, #tpu.memory_space<vmem>>, vector<1x50xf32>
    %651 = vector.broadcast %650 : vector<1x50xf32> to vector<16x50xf32>
    %652 = arith.addf %649, %651 : vector<16x50xf32>
    %cst_244 = arith.constant dense<0xFF800000> : vector<16xf32>
    %653 = vector.multi_reduction <maximumf>, %652, %cst_244 [1] : vector<16x50xf32> to vector<16xf32>
    %654 = vector.shape_cast %653 : vector<16xf32> to vector<16x1xf32>
    %655 = vector.broadcast %654 : vector<16x1xf32> to vector<16x50xf32>
    %656 = arith.subf %652, %655 : vector<16x50xf32>
    %657 = math.exp %656 : vector<16x50xf32>
    %cst_245 = arith.constant dense<0.000000e+00> : vector<16xf32>
    %658 = vector.multi_reduction <add>, %657, %cst_245 [1] : vector<16x50xf32> to vector<16xf32>
    %659 = vector.shape_cast %658 : vector<16xf32> to vector<16x1xf32>
    %660 = math.log %659 : vector<16x1xf32>
    %661 = arith.addf %654, %660 : vector<16x1xf32>
    %662 = vector.broadcast %661 : vector<16x1xf32> to vector<16x50xf32>
    %663 = arith.subf %652, %662 : vector<16x50xf32>
    %664 = vector.shape_cast %663 : vector<16x50xf32> to vector<2x8x50xf32>
    %c0_246 = arith.constant 0 : index
    %c0_247 = arith.constant 0 : index
    %c0_248 = arith.constant 0 : index
    %665 = vector.load %arg15[%c0_246, %c0_247, %c0_248] : memref<2x8x50xf32, #tpu.memory_space<vmem>>, vector<2x8x50xf32>
    tpu.vector_store %arg15[%c0_246, %c0_247, %c0_248], %664 {strides = array<i32>} : memref<2x8x50xf32, #tpu.memory_space<vmem>>, vector<2x8x50xf32>,
    return
  }
  func.func @transform_0(%arg0: i32, %arg1: memref<2x8xi32, #tpu.memory_space<smem>>) -> (i32, i32) {
    %c0_i32 = arith.constant 0 : i32
    %c0_i32_0 = arith.constant 0 : i32
    %c0_i32_1 = arith.constant 0 : i32
    return %c0_i32, %c0_i32_0 : i32, i32
  }
  func.func @transform_1(%arg0: i32, %arg1: memref<2x8xi32, #tpu.memory_space<smem>>) -> (i32, i32) {
    %c0_i32 = arith.constant 0 : i32
    %c0_i32_0 = arith.constant 0 : i32
    %c0_i32_1 = arith.constant 0 : i32
    return %c0_i32, %c0_i32_0 : i32, i32
  }
  func.func @transform_2(%arg0: i32, %arg1: memref<2x8xi32, #tpu.memory_space<smem>>) -> (i32, i32, i32) {
    %c0_i32 = arith.constant 0 : i32
    %c0_i32_0 = arith.constant 0 : i32
    %c0_i32_1 = arith.constant 0 : i32
    %c0_i32_2 = arith.constant 0 : i32
    return %c0_i32, %c0_i32_0, %c0_i32_1 : i32, i32, i32
  }
  func.func @transform_3(%arg0: i32, %arg1: memref<2x8xi32, #tpu.memory_space<smem>>) -> (i32, i32) {
    %c0_i32 = arith.constant 0 : i32
    %c0_i32_0 = arith.constant 0 : i32
    %c0_i32_1 = arith.constant 0 : i32
    return %c0_i32, %c0_i32_0 : i32, i32
  }
  func.func @transform_4(%arg0: i32, %arg1: memref<2x8xi32, #tpu.memory_space<smem>>) -> (i32, i32) {
    %c0_i32 = arith.constant 0 : i32
    %c0_i32_0 = arith.constant 0 : i32
    %c0_i32_1 = arith.constant 0 : i32
    return %c0_i32, %c0_i32_0 : i32, i32
  }
  func.func @transform_5(%arg0: i32, %arg1: memref<2x8xi32, #tpu.memory_space<smem>>) -> (i32, i32) {
    %c0_i32 = arith.constant 0 : i32
    %c0_i32_0 = arith.constant 0 : i32
    %c0_i32_1 = arith.constant 0 : i32
    return %c0_i32, %c0_i32_0 : i32, i32
  }
  func.func @transform_6(%arg0: i32, %arg1: memref<2x8xi32, #tpu.memory_space<smem>>) -> (i32, i32) {
    %c0_i32 = arith.constant 0 : i32
    %c0_i32_0 = arith.constant 0 : i32
    %c0_i32_1 = arith.constant 0 : i32
    return %c0_i32, %c0_i32_0 : i32, i32
  }
  func.func @transform_7(%arg0: i32, %arg1: memref<2x8xi32, #tpu.memory_space<smem>>) -> (i32, i32) {
    %c0_i32 = arith.constant 0 : i32
    %c0_i32_0 = arith.constant 0 : i32
    %c0_i32_1 = arith.constant 0 : i32
    return %c0_i32, %c0_i32_0 : i32, i32
  }
  func.func @transform_8(%arg0: i32, %arg1: memref<2x8xi32, #tpu.memory_space<smem>>) -> (i32, i32) {
    %c0_i32 = arith.constant 0 : i32
    %c0_i32_0 = arith.constant 0 : i32
    %c0_i32_1 = arith.constant 0 : i32
    return %c0_i32, %c0_i32_0 : i32, i32
  }
  func.func @transform_9(%arg0: i32, %arg1: memref<2x8xi32, #tpu.memory_space<smem>>) -> (i32, i32) {
    %c0_i32 = arith.constant 0 : i32
    %c0_i32_0 = arith.constant 0 : i32
    %c0_i32_1 = arith.constant 0 : i32
    return %c0_i32, %c0_i32_0 : i32, i32
  }
  func.func @transform_10(%arg0: i32, %arg1: memref<2x8xi32, #tpu.memory_space<smem>>) -> (i32, i32) {
    %c0_i32 = arith.constant 0 : i32
    %c0_i32_0 = arith.constant 0 : i32
    %c0_i32_1 = arith.constant 0 : i32
    return %c0_i32, %c0_i32_0 : i32, i32
  }
  func.func @transform_11(%arg0: i32, %arg1: memref<2x8xi32, #tpu.memory_space<smem>>) -> (i32, i32) {
    %c0_i32 = arith.constant 0 : i32
    %c0_i32_0 = arith.constant 0 : i32
    %c0_i32_1 = arith.constant 0 : i32
    return %c0_i32, %c0_i32_0 : i32, i32
  }
  func.func @transform_12(%arg0: i32, %arg1: memref<2x8xi32, #tpu.memory_space<smem>>) -> (i32, i32) {
    %c0_i32 = arith.constant 0 : i32
    %c0_i32_0 = arith.constant 0 : i32
    %c0_i32_1 = arith.constant 0 : i32
    return %c0_i32, %c0_i32_0 : i32, i32
  }
  func.func @transform_13(%arg0: i32, %arg1: memref<2x8xi32, #tpu.memory_space<smem>>) -> (i32, i32, i32) {
    %c0_i32 = arith.constant 0 : i32
    %c0_i32_0 = arith.constant 0 : i32
    %c0_i32_1 = arith.constant 0 : i32
    %c0_i32_2 = arith.constant 0 : i32
    return %c0_i32, %c0_i32_0, %c0_i32_1 : i32, i32, i32
  }
  func.func @transform_14(%arg0: i32, %arg1: memref<2x8xi32, #tpu.memory_space<smem>>) -> (i32, i32, i32) {
    %c0_i32 = arith.constant 0 : i32
    %c0_i32_0 = arith.constant 0 : i32
    %c0_i32_1 = arith.constant 0 : i32
    %c0_i32_2 = arith.constant 0 : i32
    return %c0_i32, %c0_i32_0, %c0_i32_1 : i32, i32, i32
  }
  func.func @transform_15(%arg0: i32, %arg1: memref<2x8xi32, #tpu.memory_space<smem>>) -> (i32, i32, i32) {
    %c0_i32 = arith.constant 0 : i32
    %c0_i32_0 = arith.constant 0 : i32
    %c0_i32_1 = arith.constant 0 : i32
    %c0_i32_2 = arith.constant 0 : i32
    return %c0_i32, %c0_i32_0, %c0_i32_1 : i32, i32, i32
  }
}

</mosaic_0001>

<bundles_post_ra>
// kernel: tpu_custom_call.1
= control target key start
LH: loop header
LB: loop body
LE: loop exit
PB: predicated region body
PF: predicated region fallthrough
CT: control target
= control target key end

     0   :  { %s2363_s24 = smov [#allocation3]   ;;  %s3358_s0 = inlined_call_operand.vmem [shape: s32[2,8], index: 0, kind: input, shape index: {}]   ;;  %s3359_s1 = inlined_call_operand.vmem [shape: f32[50,32], index: 1, kind: input, shape index: {}]   ;;  %s3360_s2 = inlined_call_operand.vmem [shape: f32[2,64], index: 2, kind: input, shape index: {}]   ;;  %s3361_s3 = inlined_call_operand.vmem [shape: f32[2,8,64], index: 3, kind: input, shape index: {}]   ;;  %s3362_s4 = inlined_call_operand.vmem [shape: f32[32,256], index: 4, kind: input, shape index: {}]   ;;  %s3363_s5 = inlined_call_operand.vmem [shape: f32[64,256], index: 5, kind: input, shape index: {}]   ;;  %s3364_s6 = inlined_call_operand.vmem [shape: f32[1,256], index: 6, kind: input, shape index: {}]   ;;  %s3365_s7 = inlined_call_operand.hbm [shape: f32[64,256], index: 7, kind: input, shape index: {}]   ;;  %s3366_s8 = inlined_call_operand.hbm [shape: f32[64,256], index: 8, kind: input, shape index: {}]   ;;  %s3367_s9 = inlined_call_operand.vmem [shape: f32[1,256], index: 9, kind: input, shape index: {}]   ;;  %s3368_s10 = inlined_call_operand.vmem [shape: f32[128,64], index: 10, kind: input, shape index: {}]   ;;  %s3369_s11 = inlined_call_operand.vmem [shape: f32[1,64], index: 11, kind: input, shape index: {}]   ;;  %s3370_s12 = inlined_call_operand.vmem [shape: f32[64,50], index: 12, kind: input, shape index: {}]   ;;  %s3371_s13 = inlined_call_operand.vmem [shape: f32[1,50], index: 13, kind: input, shape index: {}]   ;;  %s3372_s14 = inlined_call_operand.hbm [shape: f32[2,8,50], index: 14, kind: output, shape index: {0}]   ;;  %s3373_s15 = inlined_call_operand.hbm [shape: f32[2,2,64], index: 15, kind: output, shape index: {1}]   ;;  %s3374_s16 = inlined_call_operand.hbm [shape: f32[2,2,64], index: 16, kind: output, shape index: {2}]  }
   0x1   :  { %3376 = sst [smem:[#allocation18_spill]] %s3358_s0 }
   0x2   :  { %3377 = sst [smem:[#allocation19_spill]] %s3368_s10 }
   0x3   :  { %s3378_s23 = sld [smem:[#allocation18_spill]] }
   0x9   :  { %s23_s10 = sshll.u32 %s3378_s23, 4  ;;  %s24_s10 = int_to_ptr.vmem [resolvable:$true] %s23_s10 }
   0xa   :  { %26 = dma.vmem_to_smem %s24_s10, 32, %s2363_s24, [#allocation2] }
   0xb   :  { %2353 = dma.done.wait [#allocation2], 32 }
   0xc   :  { %2354 = vsyncadd [#allocation2], 4294967264 }
   0xd   :  { %29 = sfence }
   0xe   :  { %30 = vsyncpa [#allocation5], 0 }
   0xf   :  { %31 = vsyncpa [#allocation8], 0 }
  0x10   :  { %32 = vsyncpa [#allocation6], 0 }
  0x11   :  { %33 = vsyncpa [#allocation11], 0  ;;  %s50_s27 = sshll.u32 %s3365_s7, 4  ;;  %s2364_s28 = smov [#allocation4]   ;;  %s51_s27 = int_to_ptr.hbm [resolvable:$true] %s50_s27 }
  0x12   :  { %s52_s29 = sshll.u32 %s2364_s28, 4  ;;  %s63_s17 = sshll.u32 %s3366_s8, 4  ;;  %s53_s29 = int_to_ptr.vmem [resolvable:$true] %s52_s29  ;;  %s64_s17 = int_to_ptr.hbm [resolvable:$true] %s63_s17 }
  0x13   :  { %s2365_s10 = smov 256   ;;  %s2366_s18 = smov 16  }
  0x14   :  { %58 = dma.hbm_to_vmem [thread:$0]  %s51_s27, 2048, %s53_s29, [#allocation5], %s2365_s10, %s2365_s10, %s2366_s18  }
  0x15   :  { %s2367_s19 = smov [#allocation7]  }
  0x16   :  { %s65_s20 = sshll.u32 %s2367_s19, 4  ;;  %s66_s20 = int_to_ptr.vmem [resolvable:$true] %s65_s20 }
  0x17   :  { %71 = dma.hbm_to_vmem [thread:$0]  %s64_s17, 2048, %s66_s20, [#allocation8], %s2365_s10, %s2365_s10, %s2366_s18  }
  0x18   :  { %2355 = dma.done.wait [#allocation5], 2048  }
  0x19   :  { %2356 = vsyncadd [#allocation5], 4294965248 }
  0x1a   :  { %2357 = dma.done.wait [#allocation8], 2048  }
  0x1b   :  { %2358 = vsyncadd [#allocation8], 4294965248  ;;  %s90_s7 = sld [smem:[#allocation3]]  ;;  %vm180_vm0 = vcmask 1040384   ;;  %vm182_vm1 = vcmask 1041408   ;;  %v208_v0 = vld [vmem:[%s3362_s4 + $0x30] sm:$0xff] }
  0x1c   :  { %s1995_s21 = sld [smem:[#allocation3 + $0x80]]  ;;  %v206_v1 = vld [vmem:[%s3362_s4 + $0x20] sm:$0xff]  ;;  %vm184_vm2 = vcmask 1042432   ;;  %vm186_vm3 = vcmask 1043456   ;;  %284 = vmatpush.msra.mxu0 %v208_v0  ;;  %vm188_vm4 = vcmask 1044480   ;;  %v2495_v3 = vld [vmem:[%s3363_s5 + $0x70] sm:$0xff] }
  0x1d   :  { %s1996_s22 = sld [smem:[#allocation3 + $0x1]]  ;;  %v204_v4 = vld [vmem:[%s3362_s4 + $0x10] sm:$0xff]  ;;  %v2506_v6 = vld [vmem:[%s3363_s5 + $0x78] sm:$0xff]  ;;  %473 = vmatpush.msra.mxu2 %v2495_v3  ;;  %vm190_vm5 = vcmask 1045504   ;;  %v2519_v9 = vld [vmem:[%s3363_s5 + $0x60] sm:$0xff]  ;;  %vm192_vm6 = vcmask 1046528  }
  0x1e   :  { %s2470_s23 = sld [smem:[#allocation3 + $0x81]]  ;;  %285 = vmatpush.msra.mxu0 %v206_v1  ;;  %350 = vmatpush.msra.mxu3 %v2506_v6  ;;  %v2524_v10 = vld [vmem:[%s3363_s5 + $0x68] sm:$0xff]  ;;  %v202_v11 = vld [vmem:[%s3362_s4] sm:$0xff]  ;;  %v2536_v14 = vld [vmem:[%s3363_s5 + $0x58] sm:$0xff]  ;;  %vm265_vm7 = vcmask 261120   ;;  %vm318_vm8 = vcmask 523264  }
  0x1f   :  { %s2472_s24 = sld [smem:[#allocation3 + $0x2]]  ;;  %474 = vmatpush.msra.mxu2 %v2519_v9  ;;  %v2548_v18 = vld [vmem:[%s3363_s5 + $0x50] sm:$0xff]  ;;  %v2560_v22 = vld [vmem:[%s3363_s5 + $0x48] sm:$0xff]  ;;  %v2574_v26 = vld [vmem:[%s3363_s5 + $0x40] sm:$0xff]  ;;  %vm1702_vm9 = vcmask 64512  }
  0x20   :  { %s2474_s8 = sld [smem:[#allocation3 + $0x82]]  ;;  %286 = vmatpush.msra.mxu0 %v204_v4  ;;  %351 = vmatpush.msra.mxu3 %v2524_v10  ;;  %v2585_v30 = vld [vmem:[%s3363_s5 + $0x38] sm:$0xff]  ;;  %v2599_v33 = vld [vmem:[%s3363_s5 + $0x30] sm:$0xff]  ;;  %v2608_v35 = vld [vmem:[%s3363_s5 + $0x28] sm:$0xff] }
  0x21   :  { %s91_s0 = scalar_lea.vmem %s3359_s1, %s90_s7  ;;  %s2485_s17 = sld [smem:[#allocation3 + $0x3]]  ;;  %475 = vmatpush.msra.mxu2 %v2548_v18  ;;  %v209_v36 = vld [vmem:[%s3362_s4 + $0x38] sm:$0xff]  ;;  %v2625_v38 = vld [vmem:[%s3363_s5 + $0x20] sm:$0xff]  ;;  %v207_v39 = vld [vmem:[%s3362_s4 + $0x28] sm:$0xff] }
  0x22   :  { %v92_v2 = vld [vmem:[%s91_s0] sm:$0x1]  ;;  %s94_s19 = scalar_lea.vmem %s3359_s1, %s1995_s21  ;;  %s2490_s20 = sld [smem:[#allocation3 + $0x83]]  ;;  %287 = vmatpush.msra.mxu0 %v202_v11  ;;  %352 = vmatpush.msra.mxu3 %v2536_v14  ;;  %v2638_v42 = vld [vmem:[%s3363_s5 + $0x18] sm:$0xff]  ;;  %v2650_v45 = vld [vmem:[%s3363_s5 + $0x10] sm:$0xff] }
  0x23   :  { %v95_v5 = vld [vmem:[%s94_s19] sm:$0x1]  ;;  %s97_s30 = scalar_lea.vmem %s3359_s1, %s1996_s22  ;;  %s2508_s10 = sld [smem:[#allocation3 + $0x4]]  ;;  %476 = vmatpush.msra.mxu2 %v2574_v26  ;;  %307 = vmatpush.msra.mxu1 %v209_v36  ;;  %v205_v47 = vld [vmem:[%s3362_s4 + $0x18] sm:$0xff]  ;;  %v2667_v50 = vld [vmem:[%s3363_s5 + $0x8] sm:$0xff] }
  0x24   :  { %v98_v7 = vld [vmem:[%s97_s30] sm:$0x1]  ;;  %s100_s19 = scalar_lea.vmem %s3359_s1, %s2470_s23  ;;  %v139_v8 = vrot.slane %v95_v5, 7  ;;  %s2550_s7 = sld [smem:[#allocation3 + $0x84]]  ;;  %330 = vmatpush.msrb.mxu0 %v2495_v3  ;;  %353 = vmatpush.msra.mxu3 %v2560_v22  ;;  %v203_v54 = vld [vmem:[%s3362_s4 + $0x8] sm:$0xff] }
  0x25   :  { %v101_v12 = vld [vmem:[%s100_s19] sm:$0x1]  ;;  %s103_s0 = scalar_lea.vmem %s3359_s1, %s2472_s24  ;;  %v142_v13 = vrot.slane %v98_v7, 6  ;;  %s2562_s30 = sld [smem:[#allocation3 + $0x5]]  ;;  %477 = vmatpush.msra.mxu2 %v2599_v33  ;;  %308 = vmatpush.msra.mxu1 %v207_v39 }
  0x26   :  { %v104_v15 = vld [vmem:[%s103_s0] sm:$0x1]  ;;  %s106_s19 = scalar_lea.vmem %s3359_s1, %s2474_s8  ;;  %v145_v16 = vrot.slane %v101_v12, 5  ;;  %v181_v17 = vsel %vm180_vm0, %v92_v2, %v139_v8  ;;  %s2576_s22 = sld [smem:[#allocation3 + $0x85]]  ;;  %331 = vmatpush.msrb.mxu0 %v2519_v9  ;;  %354 = vmatpush.msra.mxu3 %v2585_v30 }
  0x27   :  { %v107_v19 = vld [vmem:[%s106_s19] sm:$0x1]  ;;  %s109_s29 = scalar_lea.vmem %s3359_s1, %s2485_s17  ;;  %v148_v20 = vrot.slane %v104_v15, 4  ;;  %v183_v21 = vsel %vm182_vm1, %v181_v17, %v142_v13  ;;  %s2603_s0 = sld [smem:[#allocation3 + $0x7]]  ;;  %478 = vmatpush.msra.mxu2 %v2625_v38  ;;  %309 = vmatpush.msra.mxu1 %v205_v47 }
  0x28   :  { %v110_v23 = vld [vmem:[%s109_s29] sm:$0x1]  ;;  %s112_s18 = scalar_lea.vmem %s3359_s1, %s2490_s20  ;;  %v151_v24 = vrot.slane %v107_v19, 3  ;;  %v185_v25 = vsel %vm184_vm2, %v183_v21, %v145_v16  ;;  %s2580_s20 = sld [smem:[#allocation3 + $0x6]]  ;;  %332 = vmatpush.msrb.mxu0 %v2548_v18  ;;  %355 = vmatpush.msra.mxu3 %v2608_v35 }
  0x29   :  { %v113_v27 = vld [vmem:[%s112_s18] sm:$0x1]  ;;  %v154_v28 = vrot.slane %v110_v23, 2  ;;  %v187_v29 = vsel %vm186_vm3, %v185_v25, %v148_v20  ;;  %s115_s28 = scalar_lea.vmem %s3359_s1, %s2508_s10  ;;  %s2594_s29 = sld [smem:[#allocation3 + $0x86]]  ;;  %479 = vmatpush.msra.mxu2 %v2650_v45  ;;  %310 = vmatpush.msra.mxu1 %v203_v54 }
  0x2a   :  { %v157_v31 = vrot.slane %v113_v27, 1  ;;  %v189_v32 = vsel %vm188_vm4, %v187_v29, %v151_v24  ;;  %s118_s24 = scalar_lea.vmem %s3359_s1, %s2550_s7  ;;  %s2619_s26 = sld [smem:[#allocation3 + $0x87]]  ;;  %v116_v40 = vld [vmem:[%s115_s28] sm:$0x1]  ;;  %333 = vmatpush.msrb.mxu0 %v2574_v26  ;;  %356 = vmatpush.msra.mxu3 %v2638_v42 }
  0x2b   :  { %v191_v34 = vsel %vm190_vm5, %v189_v32, %v154_v28  ;;  %v119_v41 = vld [vmem:[%s118_s24] sm:$0x1]  ;;  %s121_s10 = scalar_lea.vmem %s3359_s1, %s2562_s30  ;;  %s2368_s19 = smov 64   ;;  %418 = vmatpush.msrb.mxu1 %v2506_v6 }
  0x2c   :  { %v193_v37 = vsel %vm192_vm6, %v191_v34, %v157_v31  ;;  %v122_v43 = vld [vmem:[%s121_s10] sm:$0x1]  ;;  %s124_s28 = scalar_lea.vmem %s3359_s1, %s2576_s22  ;;  %v160_v44 = vrot.slane %v119_v41, 7  ;;  %334 = vmatpush.msrb.mxu0 %v2599_v33  ;;  %357 = vmatpush.msra.mxu3 %v2667_v50  ;;  %s3379_s25 = sld [smem:[#allocation19_spill]] }
  0x2d   :  { %2010 = vmatmul.msk.f32.vlgmr.msra.gmra.mxu0 %vm265_vm7, %v193_v37  ;;  %v2655_v46 = vld [vmem:[%s3360_s2] sm:$0x3]  ;;  %v163_v49 = vrot.slane %v122_v43, 6  ;;  %s133_s23 = scalar_lea.vmem %s3359_s1, %s2603_s0  ;;  %2012 = vmatmul.msk.f32.vlgmr.msra.gmra.mxu1 %vm265_vm7, %v193_v37  ;;  %s1943_s30 = sshll.u32 %s3373_s15, 4  ;;  %s1944_s30 = int_to_ptr.hbm [resolvable:$true] %s1943_s30 }
  0x2e   :  { %v125_v48 = vld [vmem:[%s124_s28] sm:$0x1]  ;;  %s127_s10 = scalar_lea.vmem %s3359_s1, %s2580_s20  ;;  %373 = vrot.lane.b32.xlu0 %v2655_v46, %s2368_s19  ;;  %v194_v53 = vsel %vm180_vm0, %v116_v40, %v160_v44  ;;  %2015 = vmatmul.msk.f32.vlgmr.msra.gmra.mxu3 %vm318_vm8, %v2655_v46  ;;  %s2370_s24 = smov [#allocation12]  }
  0x2f   :  { %v128_v51 = vld [vmem:[%s127_s10] sm:$0x1]  ;;  %s130_s28 = scalar_lea.vmem %s3359_s1, %s2594_s29  ;;  %v166_v52 = vrot.slane %v125_v48, 5  ;;  %v195_v57 = vsel %vm182_vm1, %v194_v53, %v163_v49  ;;  %335 = vmatpush.msrb.mxu0 %v2625_v38  ;;  %493 = vmatpush.msrb.mxu3 %v2506_v6  ;;  %s1956_s29 = sshll.u32 %s3374_s16, 4  ;;  %s1957_s29 = int_to_ptr.hbm [resolvable:$true] %s1956_s29 }
  0x30   :  { %v131_v55 = vld [vmem:[%s130_s28] sm:$0x1]  ;;  %v169_v56 = vrot.slane %v128_v51, 4  ;;  %s136_s7 = scalar_lea.vmem %s3359_s1, %s2619_s26  ;;  %419 = vmatpush.msrb.mxu1 %v2524_v10  ;;  %s2371_s21 = smov 32  }
  0x31   :  { %v134_v58 = vld [vmem:[%s133_s23] sm:$0x1]  ;;  %v172_v59 = vrot.slane %v131_v55, 3  ;;  %v196_v60 = vsel %vm184_vm2, %v195_v57, %v166_v52  ;;  %336 = vmatpush.msrb.mxu0 %v2650_v45  ;;  %494 = vmatpush.msrb.mxu3 %v2524_v10  ;;  %s2373_s15 = smov [#allocation9]   ;;  %s1930_s16 = sshll.u32 %s3372_s14, 4  ;;  %s1931_s16 = int_to_ptr.hbm [resolvable:$true] %s1930_s16 }
  0x32   :  { %v137_v61 = vld [vmem:[%s136_s7] sm:$0x1]  ;;  %v175_v62 = vrot.slane %v134_v58, 2  ;;  %v197_v63 = vsel %vm186_vm3, %v196_v60, %v169_v56  ;;  %420 = vmatpush.msrb.mxu1 %v2536_v14  ;;  %s2372_s7 = smov 2   ;;  %s1928_s1 = sshll.u32 %s2373_s15, 4  ;;  %s1929_s1 = int_to_ptr.vmem [resolvable:$true] %s1928_s1 }
  0x33   :  { %v178_v0 = vrot.slane %v137_v61, 1  ;;  %v198_v1 = vsel %vm188_vm4, %v197_v63, %v172_v59  ;;  %v2704_v4 = vld [vmem:[%s3363_s5] sm:$0xff]  ;;  %495 = vmatpush.msrb.mxu3 %v2536_v14  ;;  %s2374_s5 = smov 128   ;;  %s2375_s0 = smov 8  }
  0x34   :  { %v199_v2 = vsel %vm190_vm5, %v198_v1, %v175_v62  ;;  %480 = vmatpush.msra.mxu2 %v2704_v4  ;;  %337 = vmatpush.msrb.mxu0 %v2704_v4  ;;  %v2773_v8 = vld [vmem:[%s3364_s6] sm:$0x3] }
  0x35   :  { %v200_v5 = vsel %vm192_vm6, %v199_v2, %v178_v0  ;;  %421 = vmatpush.msrb.mxu1 %v2560_v22  ;;  %496 = vmatpush.msrb.mxu3 %v2560_v22  ;;  %v261_v11 = vperm.slane %v2773_v8, 0  ;;  %v262_v15 = vperm.slane %v2773_v8, 1 }
  0x36   :  { %2011 = vmatmul.msk.f32.gmra.mxu0 %vm265_vm7, %v200_v5  ;;  %623 = vmatpush.msrb.mxu2 %v2495_v3 }
  0x37   :  { %398 = vmatpush.msra.mxu0 %v2495_v3  ;;  %2013 = vmatmul.msk.f32.gmra.mxu1 %vm265_vm7, %v200_v5 }
  0x38   :  { %422 = vmatpush.msrb.mxu1 %v2585_v30  ;;  %497 = vmatpush.msrb.mxu3 %v2585_v30 }
  0x39   :  { %399 = vmatpush.msra.mxu0 %v2519_v9  ;;  %624 = vmatpush.msrb.mxu2 %v2519_v9 }
  0x3a   :  { %423 = vmatpush.msrb.mxu1 %v2608_v35  ;;  %498 = vmatpush.msrb.mxu3 %v2608_v35 }
  0x3b   :  { %400 = vmatpush.msra.mxu0 %v2548_v18  ;;  %625 = vmatpush.msrb.mxu2 %v2548_v18 }
  0x3c   :  { %424 = vmatpush.msrb.mxu1 %v2638_v42  ;;  %499 = vmatpush.msrb.mxu3 %v2638_v42 }
  0x3d   :  { %401 = vmatpush.msra.mxu0 %v2574_v26  ;;  %626 = vmatpush.msrb.mxu2 %v2574_v26 }
  0x3e   :  { %2014 = vmatmul.msk.f32.vlgmr.msrb.gmra.mxu0 %vm318_vm8, %v2655_v46  ;;  %425 = vmatpush.msrb.mxu1 %v2667_v50 }
  0x3f   :  { %402 = vmatpush.msra.mxu0 %v2599_v33  ;;  %500 = vmatpush.msrb.mxu3 %v2667_v50 }
  0x40   :  { %568 = vmatpush.msra.mxu1 %v2506_v6  ;;  %627 = vmatpush.msrb.mxu2 %v2599_v33 }
  0x41   :  { %403 = vmatpush.msra.mxu0 %v2625_v38  ;;  %643 = vmatpush.msra.mxu3 %v2506_v6 }
  0x42   :  { %569 = vmatpush.msra.mxu1 %v2524_v10  ;;  %628 = vmatpush.msrb.mxu2 %v2625_v38 }
  0x43   :  { %404 = vmatpush.msra.mxu0 %v2650_v45  ;;  %644 = vmatpush.msra.mxu3 %v2524_v10 }
  0x44   :  { %570 = vmatpush.msra.mxu1 %v2536_v14  ;;  %629 = vmatpush.msrb.mxu2 %v2650_v45 }
  0x45   :  { %405 = vmatpush.msra.mxu0 %v2704_v4  ;;  %645 = vmatpush.msra.mxu3 %v2536_v14 }
  0x46   :  { %571 = vmatpush.msra.mxu1 %v2560_v22  ;;  %630 = vmatpush.msrb.mxu2 %v2704_v4 }
  0x47   :  { %548 = vmatpush.msrb.mxu0 %v2495_v3  ;;  %646 = vmatpush.msra.mxu3 %v2560_v22 }
  0x48   :  { %572 = vmatpush.msra.mxu1 %v2585_v30 }
  0x49   :  { %549 = vmatpush.msrb.mxu0 %v2519_v9  ;;  %647 = vmatpush.msra.mxu3 %v2585_v30 }
  0x4a   :  { %573 = vmatpush.msra.mxu1 %v2608_v35 }
  0x4b   :  { %550 = vmatpush.msrb.mxu0 %v2548_v18  ;;  %648 = vmatpush.msra.mxu3 %v2608_v35 }
  0x4c   :  { %574 = vmatpush.msra.mxu1 %v2638_v42 }
  0x4d   :  { %551 = vmatpush.msrb.mxu0 %v2574_v26  ;;  %649 = vmatpush.msra.mxu3 %v2638_v42 }
  0x4e   :  { %575 = vmatpush.msra.mxu1 %v2667_v50 }
  0x4f   :  { %552 = vmatpush.msrb.mxu0 %v2599_v33  ;;  %650 = vmatpush.msra.mxu3 %v2667_v50 }
  0x51   :  { %553 = vmatpush.msrb.mxu0 %v2625_v38 }
  0x53   :  { %554 = vmatpush.msrb.mxu0 %v2650_v45 }
  0x55   :  { %555 = vmatpush.msrb.mxu0 %v2704_v4 }
  0xa0   :  { %v2788_v36 = vpop.permute.xlu0 %373 }
  0xaa   :  { %v289_v7 = vpop.f32.mrf.mxu0  ;;  %v312_v16 = vpop.f32.mrf.mxu1 }
  0xab   :  { %v2779_v17 = vadd.f32 %v289_v7, %v261_v11  ;;  %v2783_v19 = vadd.f32 %v312_v16, %v262_v15 }
  0xb1   :  { %v359_v21 = vpop.f32.mrf.mxu3 }
  0xb2   :  { %v363_v25 = vadd.f32 %v359_v21, %v2783_v19 }
  0xb3   :  { %v292_v12 = vpop.f32.mrf.mxu0 }
  0xb4   :  { %v2776_v13 = vadd.f32 %v292_v12, %v261_v11  ;;  %v369_v34 = vmul.f32 0.5, %v363_v25  ;;  %v2813_v51 = vpop.f32.mrf.mxu1 }
  0xbb   :  { %v339_v20 = vpop.f32.mrf.mxu0 }
  0xbc   :  { %v362_v23 = vadd.f32 %v339_v20, %v2779_v17 }
  0xbe   :  { %v364_v24 = vmul.f32 0.5, %v362_v23 }
  0xc0   :  { %2073 = vtanh.f32 %v364_v24 }
  0xc1   :  { %2075 = vtanh.f32 %v363_v25 }
  0xc2   :  { %2077 = vtanh.f32 %v369_v34 }
  0xc6   :  { %v2074_v27 = vpop.eup %2073 }
  0xc7   :  { %v366_v28 = vadd.f32 1.0, %v2074_v27  ;;  %v2076_v29 = vpop.eup %2075 }
  0xc8   :  { %v2078_v40 = vpop.eup %2077 }
  0xc9   :  { %v367_v31 = vmul.f32 0.5, %v366_v28  ;;  %v371_v43 = vadd.f32 1.0, %v2078_v40 }
  0xcb   :  { %v377_v32 = vmul.f32 %v2076_v29, %v367_v31  ;;  %v376_v37 = vmul.f32 %v2788_v36, %v367_v31  ;;  %v372_v44 = vmul.f32 0.5, %v371_v43 }
  0xcd   :  { %379 = vrot.lane.b32.xlu0 %v377_v32, %s2368_s19 }
 0x13f   :  { %v380_v39 = vpop.permute.xlu0 %379 }
 0x140   :  { %v382_v41 = vadd.f32 %v380_v39, %v376_v37 }
 0x142   :  { %2079 = vtanh.f32 %v382_v41  ;;  %v448_v61 = vrot.slane %v382_v41, 6 }
 0x148   :  { %v2080_v47 = vpop.eup %2079 }
 0x149   :  { %v2791_v48 = vmul.f32 %v2080_v47, %v372_v44 }
 0x14b   :  { %386 = vrot.lane.b32.xlu1 %v2791_v48, %s2368_s19 }
 0x1bd   :  { %v387_v49 = vpop.permute.xlu1 %386 }
 0x1be   :  { %2016 = vmatmul.msk.f32.vlgmr.msra.gmra.mxu0 %vm318_vm8, %v387_v49  ;;  %2017 = vmatmul.msk.f32.vlgmr.msrb.gmra.mxu1 %vm318_vm8, %v387_v49 }
 0x1bf   :  { %691 = vmatpush.msra.mxu0 %v2495_v3  ;;  %711 = vmatpush.msrb.mxu1 %v2506_v6 }
 0x1c1   :  { %692 = vmatpush.msra.mxu0 %v2519_v9  ;;  %712 = vmatpush.msrb.mxu1 %v2524_v10 }
 0x1c3   :  { %693 = vmatpush.msra.mxu0 %v2548_v18  ;;  %713 = vmatpush.msrb.mxu1 %v2536_v14 }
 0x1c5   :  { %694 = vmatpush.msra.mxu0 %v2574_v26  ;;  %714 = vmatpush.msrb.mxu1 %v2560_v22 }
 0x1c7   :  { %695 = vmatpush.msra.mxu0 %v2599_v33  ;;  %715 = vmatpush.msrb.mxu1 %v2585_v30 }
 0x1c9   :  { %696 = vmatpush.msra.mxu0 %v2625_v38  ;;  %716 = vmatpush.msrb.mxu1 %v2608_v35 }
 0x1cb   :  { %697 = vmatpush.msra.mxu0 %v2650_v45  ;;  %717 = vmatpush.msrb.mxu1 %v2638_v42 }
 0x1cd   :  { %698 = vmatpush.msra.mxu0 %v2704_v4  ;;  %718 = vmatpush.msrb.mxu1 %v2667_v50 }
 0x23b   :  { %v407_v52 = vpop.f32.mrf.mxu0  ;;  %v427_v53 = vpop.f32.mrf.mxu1 }
 0x23c   :  { %v432_v54 = vrot.slane %v407_v52, 6  ;;  %v433_v56 = vrot.slane %v427_v53, 6 }
 0x23e   :  { %v436_v55 = vadd.f32 %v432_v54, %v2779_v17  ;;  %v437_v58 = vadd.f32 %v433_v56, %v2783_v19 }
 0x240   :  { %v438_v57 = vmul.f32 0.5, %v436_v55  ;;  %v443_v2 = vmul.f32 0.5, %v437_v58 }
 0x242   :  { %2081 = vtanh.f32 %v438_v57 }
 0x243   :  { %2083 = vtanh.f32 %v437_v58 }
 0x244   :  { %2085 = vtanh.f32 %v443_v2 }
 0x248   :  { %v2082_v59 = vpop.eup %2081 }
 0x249   :  { %v440_v60 = vadd.f32 1.0, %v2082_v59  ;;  %v2084_v63 = vpop.eup %2083 }
 0x24a   :  { %v2086_v7 = vpop.eup %2085 }
 0x24b   :  { %v441_v62 = vmul.f32 0.5, %v440_v60  ;;  %v445_v12 = vadd.f32 1.0, %v2086_v7 }
 0x24d   :  { %v451_v0 = vmul.f32 %v2084_v63, %v441_v62  ;;  %v450_v1 = vmul.f32 %v448_v61, %v441_v62  ;;  %v446_v16 = vmul.f32 0.5, %v445_v12 }
 0x24f   :  { %453 = vrot.lane.b32.xlu1 %v451_v0, %s2368_s19 }
 0x2c1   :  { %v454_v5 = vpop.permute.xlu1 %453 }
 0x2c2   :  { %v456_v11 = vadd.f32 %v454_v5, %v450_v1 }
 0x2c4   :  { %2087 = vtanh.f32 %v456_v11  ;;  %v523_v40 = vrot.slane %v456_v11, 6 }
 0x2ca   :  { %v2088_v20 = vpop.eup %2087 }
 0x2cb   :  { %v458_v21 = vmul.f32 %v2088_v20, %v446_v16  ;;  %v2875_v20 = vadd.f32 %v2813_v51, %v262_v15 }
 0x2cd   :  { %v460_v23 = vrot.slane %v458_v21, 2  ;;  %v902_v59 = vsel %vm182_vm1, %v2791_v48, %v458_v21 }
 0x2cf   :  { %461 = vrot.lane.b32.xlu2 %v460_v23, %s2368_s19 }
 0x329   :  { %v462_v24 = vpop.permute.xlu2 %461 }
 0x32a   :  { %2018 = vmatmul.msk.f32.vlgmr.msra.gmra.mxu2 %vm318_vm8, %v462_v24  ;;  %2019 = vmatmul.msk.f32.vlgmr.msrb.gmra.mxu3 %vm318_vm8, %v462_v24 }
 0x32b   :  { %766 = vmatpush.msra.mxu2 %v2495_v3  ;;  %786 = vmatpush.msrb.mxu3 %v2506_v6 }
 0x32d   :  { %767 = vmatpush.msra.mxu2 %v2519_v9  ;;  %787 = vmatpush.msrb.mxu3 %v2524_v10 }
 0x32f   :  { %768 = vmatpush.msra.mxu2 %v2548_v18  ;;  %788 = vmatpush.msrb.mxu3 %v2536_v14 }
 0x331   :  { %769 = vmatpush.msra.mxu2 %v2574_v26  ;;  %789 = vmatpush.msrb.mxu3 %v2560_v22 }
 0x333   :  { %770 = vmatpush.msra.mxu2 %v2599_v33  ;;  %790 = vmatpush.msrb.mxu3 %v2585_v30 }
 0x335   :  { %771 = vmatpush.msra.mxu2 %v2625_v38  ;;  %791 = vmatpush.msrb.mxu3 %v2608_v35 }
 0x337   :  { %772 = vmatpush.msra.mxu2 %v2650_v45  ;;  %792 = vmatpush.msrb.mxu3 %v2638_v42 }
 0x339   :  { %773 = vmatpush.msra.mxu2 %v2704_v4  ;;  %793 = vmatpush.msrb.mxu3 %v2667_v50 }
 0x3ad   :  { %v482_v25 = vpop.f32.mrf.mxu2  ;;  %v502_v27 = vpop.f32.mrf.mxu3 }
 0x3ae   :  { %v507_v28 = vrot.slane %v482_v25, 4  ;;  %v508_v31 = vrot.slane %v502_v27, 4 }
 0x3b0   :  { %v511_v29 = vadd.f32 %v507_v28, %v2779_v17  ;;  %v512_v34 = vadd.f32 %v508_v31, %v2783_v19 }
 0x3b2   :  { %v513_v32 = vmul.f32 0.5, %v511_v29  ;;  %v518_v49 = vmul.f32 0.5, %v512_v34 }
 0x3b4   :  { %2089 = vtanh.f32 %v513_v32 }
 0x3b5   :  { %2091 = vtanh.f32 %v512_v34 }
 0x3b6   :  { %2093 = vtanh.f32 %v518_v49 }
 0x3ba   :  { %v2090_v37 = vpop.eup %2089 }
 0x3bb   :  { %v515_v39 = vadd.f32 1.0, %v2090_v37  ;;  %v2092_v43 = vpop.eup %2091 }
 0x3bc   :  { %v2094_v53 = vpop.eup %2093 }
 0x3bd   :  { %v516_v41 = vmul.f32 0.5, %v515_v39  ;;  %v520_v55 = vadd.f32 1.0, %v2094_v53 }
 0x3bf   :  { %v526_v44 = vmul.f32 %v2092_v43, %v516_v41  ;;  %v525_v47 = vmul.f32 %v523_v40, %v516_v41  ;;  %v521_v56 = vmul.f32 0.5, %v520_v55 }
 0x3c1   :  { %528 = vrot.lane.b32.xlu2 %v526_v44, %s2368_s19 }
 0x41b   :  { %v529_v52 = vpop.permute.xlu2 %528 }
 0x41c   :  { %v531_v54 = vadd.f32 %v529_v52, %v525_v47 }
 0x41e   :  { %2095 = vtanh.f32 %v531_v54 }
 0x424   :  { %v2096_v57 = vpop.eup %2095 }
 0x425   :  { %v533_v58 = vmul.f32 %v2096_v57, %v521_v56 }
 0x427   :  { %v535_v60 = vrot.slane %v533_v58, 4  ;;  %v903_v61 = vsel %vm186_vm3, %v902_v59, %v533_v58 }
 0x429   :  { %536 = vrot.lane.b32.xlu0 %v535_v60, %s2368_s19 }
 0x49b   :  { %v537_v62 = vpop.permute.xlu0 %536 }
 0x49c   :  { %2020 = vmatmul.msk.f32.vlgmr.msrb.gmra.mxu0 %vm318_vm8, %v537_v62  ;;  %2021 = vmatmul.msk.f32.vlgmr.msra.gmra.mxu1 %vm318_vm8, %v537_v62 }
 0x49d   :  { %841 = vmatpush.msrb.mxu0 %v2495_v3  ;;  %861 = vmatpush.msra.mxu1 %v2506_v6 }
 0x49f   :  { %842 = vmatpush.msrb.mxu0 %v2519_v9  ;;  %862 = vmatpush.msra.mxu1 %v2524_v10 }
 0x4a1   :  { %843 = vmatpush.msrb.mxu0 %v2548_v18  ;;  %863 = vmatpush.msra.mxu1 %v2536_v14 }
 0x4a3   :  { %844 = vmatpush.msrb.mxu0 %v2574_v26  ;;  %864 = vmatpush.msra.mxu1 %v2560_v22 }
 0x4a5   :  { %845 = vmatpush.msrb.mxu0 %v2599_v33  ;;  %865 = vmatpush.msra.mxu1 %v2585_v30  ;;  %v598_v33 = vrot.slane %v531_v54, 6 }
 0x4a7   :  { %846 = vmatpush.msrb.mxu0 %v2625_v38  ;;  %866 = vmatpush.msra.mxu1 %v2608_v35 }
 0x4a9   :  { %847 = vmatpush.msrb.mxu0 %v2650_v45  ;;  %867 = vmatpush.msra.mxu1 %v2638_v42 }
 0x4ab   :  { %848 = vmatpush.msrb.mxu0 %v2704_v4  ;;  %868 = vmatpush.msra.mxu1 %v2667_v50 }
 0x519   :  { %v557_v3 = vpop.f32.mrf.mxu0  ;;  %v577_v6 = vpop.f32.mrf.mxu1 }
 0x51a   :  { %v582_v9 = vrot.slane %v557_v3, 2  ;;  %v583_v14 = vrot.slane %v577_v6, 2  ;;  %v241_v3 = vld [vmem:[#allocation4 + $0x70] sm:$0xff]  ;;  %v242_v6 = vld [vmem:[#allocation4 + $0x78] sm:$0xff] }
 0x51c   :  { %v586_v10 = vadd.f32 %v582_v9, %v2779_v17  ;;  %v587_v22 = vadd.f32 %v583_v14, %v2783_v19  ;;  %v239_v9 = vld [vmem:[#allocation4 + $0x60] sm:$0xff]  ;;  %v240_v14 = vld [vmem:[#allocation4 + $0x68] sm:$0xff] }
 0x51e   :  { %v588_v18 = vmul.f32 0.5, %v586_v10  ;;  %v593_v50 = vmul.f32 0.5, %v587_v22 }
 0x520   :  { %2097 = vtanh.f32 %v588_v18  ;;  %v237_v18 = vld [vmem:[#allocation4 + $0x50] sm:$0xff] }
 0x521   :  { %2099 = vtanh.f32 %v587_v22  ;;  %v238_v22 = vld [vmem:[#allocation4 + $0x58] sm:$0xff] }
 0x522   :  { %2101 = vtanh.f32 %v593_v50 }
 0x526   :  { %v2098_v26 = vpop.eup %2097 }
 0x527   :  { %v590_v30 = vadd.f32 1.0, %v2098_v26  ;;  %v2100_v38 = vpop.eup %2099  ;;  %v235_v26 = vld [vmem:[#allocation4 + $0x40] sm:$0xff] }
 0x528   :  { %v2102_v48 = vpop.eup %2101 }
 0x529   :  { %v591_v35 = vmul.f32 0.5, %v590_v30  ;;  %v595_v63 = vadd.f32 1.0, %v2102_v48  ;;  %v236_v30 = vld [vmem:[#allocation4 + $0x48] sm:$0xff] }
 0x52b   :  { %v601_v42 = vmul.f32 %v2100_v38, %v591_v35  ;;  %v600_v45 = vmul.f32 %v598_v33, %v591_v35  ;;  %v596_v0 = vmul.f32 0.5, %v595_v63  ;;  %v234_v63 = vld [vmem:[#allocation4 + $0x38] sm:$0xff] }
 0x52d   :  { %603 = vrot.lane.b32.xlu1 %v601_v42, %s2368_s19 }
 0x59f   :  { %v604_v4 = vpop.permute.xlu1 %603 }
 0x5a0   :  { %v606_v17 = vadd.f32 %v604_v4, %v600_v45 }
 0x5a2   :  { %2103 = vtanh.f32 %v606_v17  ;;  %v667_v27 = vrot.slane %v606_v17, 6  ;;  %v233_v17 = vld [vmem:[#allocation4 + $0x30] sm:$0xff] }
 0x5a8   :  { %v2104_v1 = vpop.eup %2103 }
 0x5a9   :  { %v608_v19 = vmul.f32 %v2104_v1, %v596_v0  ;;  %v231_v0 = vld [vmem:[#allocation4 + $0x20] sm:$0xff]  ;;  %v232_v1 = vld [vmem:[#allocation4 + $0x28] sm:$0xff] }
 0x5ab   :  { %v610_v2 = vrot.slane %v608_v19, 6  ;;  %v2866_v5 = vsel %vm190_vm5, %v903_v61, %v608_v19  ;;  %v229_v19 = vld [vmem:[#allocation4 + $0x10] sm:$0xff] }
 0x5ad   :  { %611 = vrot.lane.b32.xlu2 %v610_v2, %s2368_s19  ;;  %v230_v2 = vld [vmem:[#allocation4 + $0x18] sm:$0xff] }
 0x607   :  { %v612_v7 = vpop.permute.xlu2 %611 }
 0x608   :  { %2022 = vmatmul.msk.f32.vlgmr.msrb.gmra.mxu2 %vm318_vm8, %v612_v7  ;;  %2023 = vmatmul.msk.f32.vlgmr.msra.gmra.mxu3 %vm318_vm8, %v612_v7  ;;  %v227_v7 = vld [vmem:[#allocation4] sm:$0xff] }
 0x609   :  { %931 = vmatpush.msrb.mxu2 %v241_v3  ;;  %954 = vmatpush.msra.mxu3 %v242_v6  ;;  %v2943_v6 = vld [vmem:[#allocation7 + $0x30] sm:$0xff] }
 0x60b   :  { %932 = vmatpush.msrb.mxu2 %v239_v9  ;;  %955 = vmatpush.msra.mxu3 %v240_v14  ;;  %v2945_v9 = vld [vmem:[#allocation7 + $0x38] sm:$0xff]  ;;  %v2951_v14 = vld [vmem:[#allocation7 + $0x28] sm:$0xff] }
 0x60d   :  { %933 = vmatpush.msrb.mxu2 %v237_v18  ;;  %956 = vmatpush.msra.mxu3 %v238_v22  ;;  %v2953_v18 = vld [vmem:[#allocation7 + $0x10] sm:$0xff]  ;;  %v2961_v22 = vld [vmem:[#allocation7] sm:$0xff] }
 0x60f   :  { %934 = vmatpush.msrb.mxu2 %v235_v26  ;;  %957 = vmatpush.msra.mxu3 %v236_v30  ;;  %v2963_v26 = vld [vmem:[#allocation7 + $0x8] sm:$0xff] }
 0x611   :  { %935 = vmatpush.msrb.mxu2 %v233_v17  ;;  %958 = vmatpush.msra.mxu3 %v234_v63 }
 0x613   :  { %936 = vmatpush.msrb.mxu2 %v231_v0  ;;  %959 = vmatpush.msra.mxu3 %v232_v1 }
 0x615   :  { %937 = vmatpush.msrb.mxu2 %v229_v19  ;;  %960 = vmatpush.msra.mxu3 %v230_v2 }
 0x617   :  { %938 = vmatpush.msrb.mxu2 %v227_v7 }
 0x68b   :  { %v632_v11 = vpop.f32.mrf.mxu2  ;;  %v652_v16 = vpop.f32.mrf.mxu3 }
 0x68c   :  { %v655_v12 = vadd.f32 %v632_v11, %v2776_v13  ;;  %v656_v23 = vadd.f32 %v652_v16, %v2875_v20  ;;  %v228_v11 = vld [vmem:[#allocation4 + $0x8] sm:$0xff] }
 0x68d   :  { %961 = vmatpush.msra.mxu3 %v228_v11 }
 0x68e   :  { %v657_v21 = vmul.f32 0.5, %v655_v12  ;;  %v662_v34 = vmul.f32 0.5, %v656_v23 }
 0x690   :  { %2105 = vtanh.f32 %v657_v21 }
 0x691   :  { %2107 = vtanh.f32 %v656_v23 }
 0x692   :  { %2109 = vtanh.f32 %v662_v34 }
 0x696   :  { %v2106_v24 = vpop.eup %2105 }
 0x697   :  { %v659_v25 = vadd.f32 1.0, %v2106_v24  ;;  %v2108_v29 = vpop.eup %2107 }
 0x698   :  { %v2110_v37 = vpop.eup %2109 }
 0x699   :  { %v660_v28 = vmul.f32 0.5, %v659_v25  ;;  %v664_v51 = vadd.f32 1.0, %v2110_v37 }
 0x69b   :  { %v670_v31 = vmul.f32 %v2108_v29, %v660_v28  ;;  %v669_v32 = vmul.f32 %v667_v27, %v660_v28  ;;  %v665_v39 = vmul.f32 0.5, %v664_v51  ;;  %v2901_v51 = vld [vmem:[#allocation7 + $0x70] sm:$0xff] }
 0x69d   :  { %672 = vrot.lane.b32.xlu0 %v670_v31, %s2368_s19 }
 0x70f   :  { %v673_v8 = vpop.permute.xlu0 %672 }
 0x710   :  { %v675_v15 = vadd.f32 %v673_v8, %v669_v32 }
 0x712   :  { %2111 = vtanh.f32 %v675_v15  ;;  %v741_v58 = vrot.slane %v675_v15, 6 }
 0x718   :  { %v2112_v40 = vpop.eup %2111 }
 0x719   :  { %v2879_v41 = vmul.f32 %v2112_v40, %v665_v39  ;;  %v2903_v39 = vld [vmem:[#allocation7 + $0x78] sm:$0xff]  ;;  %v2905_v40 = vld [vmem:[#allocation7 + $0x60] sm:$0xff] }
 0x71b   :  { %679 = vrot.lane.b32.xlu1 %v2879_v41, %s2368_s19 }
 0x78d   :  { %v680_v43 = vpop.permute.xlu1 %679 }
 0x78e   :  { %2024 = vmatmul.msk.f32.vlgmr.msra.gmra.mxu0 %vm318_vm8, %v680_v43  ;;  %2025 = vmatmul.msk.f32.vlgmr.msrb.gmra.mxu1 %vm318_vm8, %v680_v43  ;;  %v2909_v43 = vld [vmem:[#allocation7 + $0x68] sm:$0xff] }
 0x78f   :  { %977 = vmatpush.msra.mxu0 %v2901_v51  ;;  %997 = vmatpush.msrb.mxu1 %v2903_v39 }
 0x791   :  { %978 = vmatpush.msra.mxu0 %v2905_v40  ;;  %998 = vmatpush.msrb.mxu1 %v2909_v43 }
 0x80b   :  { %v700_v44 = vpop.f32.mrf.mxu0  ;;  %v720_v47 = vpop.f32.mrf.mxu1 }
 0x80c   :  { %v725_v49 = vrot.slane %v700_v44, 6  ;;  %v726_v53 = vrot.slane %v720_v47, 6  ;;  %v2911_v44 = vld [vmem:[#allocation7 + $0x50] sm:$0xff]  ;;  %v2913_v47 = vld [vmem:[#allocation7 + $0x58] sm:$0xff] }
 0x80d   :  { %979 = vmatpush.msra.mxu0 %v2911_v44  ;;  %999 = vmatpush.msrb.mxu1 %v2913_v47 }
 0x80e   :  { %v729_v52 = vadd.f32 %v725_v49, %v2776_v13  ;;  %v730_v55 = vadd.f32 %v726_v53, %v2875_v20  ;;  %v2919_v49 = vld [vmem:[#allocation7 + $0x40] sm:$0xff] }
 0x80f   :  { %980 = vmatpush.msra.mxu0 %v2919_v49 }
 0x810   :  { %v731_v54 = vmul.f32 0.5, %v729_v52  ;;  %v736_v10 = vmul.f32 0.5, %v730_v55  ;;  %v2921_v52 = vld [vmem:[#allocation7 + $0x48] sm:$0xff] }
 0x811   :  { %1000 = vmatpush.msrb.mxu1 %v2921_v52  ;;  %981 = vmatpush.msra.mxu0 %v2943_v6 }
 0x812   :  { %2113 = vtanh.f32 %v731_v54 }
 0x813   :  { %2115 = vtanh.f32 %v730_v55  ;;  %1001 = vmatpush.msrb.mxu1 %v2945_v9 }
 0x814   :  { %2117 = vtanh.f32 %v736_v10  ;;  %v2947_v10 = vld [vmem:[#allocation7 + $0x20] sm:$0xff] }
 0x815   :  { %982 = vmatpush.msra.mxu0 %v2947_v10  ;;  %1002 = vmatpush.msrb.mxu1 %v2951_v14 }
 0x817   :  { %983 = vmatpush.msra.mxu0 %v2953_v18 }
 0x818   :  { %v2114_v56 = vpop.eup %2113 }
 0x819   :  { %v733_v57 = vadd.f32 1.0, %v2114_v56  ;;  %v2116_v60 = vpop.eup %2115  ;;  %984 = vmatpush.msra.mxu0 %v2961_v22 }
 0x81a   :  { %v2118_v35 = vpop.eup %2117 }
 0x81b   :  { %v734_v59 = vmul.f32 0.5, %v733_v57  ;;  %v738_v42 = vadd.f32 1.0, %v2118_v35 }
 0x81d   :  { %v744_v61 = vmul.f32 %v2116_v60, %v734_v59  ;;  %v743_v62 = vmul.f32 %v741_v58, %v734_v59  ;;  %v739_v45 = vmul.f32 0.5, %v738_v42 }
 0x81f   :  { %746 = vrot.lane.b32.xlu2 %v744_v61, %s2368_s19 }
 0x879   :  { %v747_v33 = vpop.permute.xlu2 %746 }
 0x87a   :  { %v749_v38 = vadd.f32 %v747_v33, %v743_v62 }
 0x87c   :  { %2119 = vtanh.f32 %v749_v38  ;;  %v816_v32 = vrot.slane %v749_v38, 6 }
 0x882   :  { %v2120_v50 = vpop.eup %2119 }
 0x883   :  { %v2888_v4 = vmul.f32 %v2120_v50, %v739_v45 }
 0x885   :  { %v753_v48 = vrot.slane %v2888_v4, 2  ;;  %v905_v61 = vsel %vm182_vm1, %v2879_v41, %v2888_v4  ;;  %v2955_v41 = vld [vmem:[#allocation7 + $0x18] sm:$0xff] }
 0x886   :  { %1003 = vmatpush.msrb.mxu1 %v2955_v41 }
 0x887   :  { %754 = vrot.lane.b32.xlu0 %v753_v48, %s2368_s19 }
 0x888   :  { %1004 = vmatpush.msrb.mxu1 %v2963_v26 }
 0x88f   :  { %915 = vrot.lane.b32.xlu0 %v2866_v5, %s2368_s19 }
 0x8f9   :  { %v755_v12 = vpop.permute.xlu0 %754 }
 0x8fa   :  { %2026 = vmatmul.msk.f32.vlgmr.msra.gmra.mxu2 %vm318_vm8, %v755_v12  ;;  %2027 = vmatmul.msk.f32.vlgmr.msrb.gmra.mxu3 %vm318_vm8, %v755_v12 }
 0x8fb   :  { %1042 = vmatpush.msra.mxu2 %v2901_v51  ;;  %1062 = vmatpush.msrb.mxu3 %v2903_v39 }
 0x8fd   :  { %1043 = vmatpush.msra.mxu2 %v2905_v40  ;;  %1063 = vmatpush.msrb.mxu3 %v2909_v43 }
 0x8ff   :  { %1044 = vmatpush.msra.mxu2 %v2911_v44  ;;  %1064 = vmatpush.msrb.mxu3 %v2913_v47 }
 0x901   :  { %v916_v5 = vpop.permute.xlu0 %915  ;;  %1045 = vmatpush.msra.mxu2 %v2919_v49  ;;  %1065 = vmatpush.msrb.mxu3 %v2921_v52 }
 0x902   :  { %2030 = vmatmul.msk.f32.vlgmr.msrb.gmra.mxu2 %vm318_vm8, %v916_v5  ;;  %2032 = vmatmul.msk.f32.vlgmr.msra.gmra.mxu3 %vm318_vm8, %v916_v5 }
 0x903   :  { %1046 = vmatpush.msra.mxu2 %v2943_v6  ;;  %1066 = vmatpush.msrb.mxu3 %v2945_v9 }
 0x905   :  { %1047 = vmatpush.msra.mxu2 %v2947_v10  ;;  %1067 = vmatpush.msrb.mxu3 %v2951_v14 }
 0x907   :  { %1048 = vmatpush.msra.mxu2 %v2953_v18  ;;  %1068 = vmatpush.msrb.mxu3 %v2955_v41 }
 0x909   :  { %1049 = vmatpush.msra.mxu2 %v2961_v22  ;;  %1069 = vmatpush.msrb.mxu3 %v2963_v26 }
 0x90b   :  { %1192 = vmatpush.msrb.mxu2 %v2901_v51  ;;  %1212 = vmatpush.msra.mxu3 %v2903_v39 }
 0x90d   :  { %1193 = vmatpush.msrb.mxu2 %v2905_v40  ;;  %1213 = vmatpush.msra.mxu3 %v2909_v43 }
 0x90f   :  { %1194 = vmatpush.msrb.mxu2 %v2911_v44  ;;  %1214 = vmatpush.msra.mxu3 %v2913_v47 }
 0x911   :  { %1195 = vmatpush.msrb.mxu2 %v2919_v49  ;;  %1215 = vmatpush.msra.mxu3 %v2921_v52 }
 0x913   :  { %1196 = vmatpush.msrb.mxu2 %v2943_v6  ;;  %1216 = vmatpush.msra.mxu3 %v2945_v9 }
 0x915   :  { %1197 = vmatpush.msrb.mxu2 %v2947_v10  ;;  %1217 = vmatpush.msra.mxu3 %v2951_v14 }
 0x917   :  { %1198 = vmatpush.msrb.mxu2 %v2953_v18  ;;  %1218 = vmatpush.msra.mxu3 %v2955_v41 }
 0x919   :  { %1199 = vmatpush.msrb.mxu2 %v2961_v22  ;;  %1219 = vmatpush.msra.mxu3 %v2963_v26 }
 0x97d   :  { %v775_v16 = vpop.f32.mrf.mxu2  ;;  %v795_v21 = vpop.f32.mrf.mxu3 }
 0x97e   :  { %v800_v23 = vrot.slane %v775_v16, 4  ;;  %v801_v25 = vrot.slane %v795_v21, 4 }
 0x980   :  { %v804_v24 = vadd.f32 %v800_v23, %v2776_v13  ;;  %v805_v28 = vadd.f32 %v801_v25, %v2875_v20 }
 0x982   :  { %v806_v27 = vmul.f32 0.5, %v804_v24  ;;  %v811_v53 = vmul.f32 0.5, %v805_v28 }
 0x984   :  { %2121 = vtanh.f32 %v806_v27 }
 0x985   :  { %2123 = vtanh.f32 %v805_v28  ;;  %v940_v4 = vpop.f32.mrf.mxu2  ;;  %v963_v1 = vpop.f32.mrf.mxu3 }
 0x986   :  { %2125 = vtanh.f32 %v811_v53 }
 0x98a   :  { %v2122_v29 = vpop.eup %2121 }
 0x98b   :  { %v808_v31 = vadd.f32 1.0, %v2122_v29  ;;  %v2124_v8 = vpop.eup %2123 }
 0x98c   :  { %v2126_v55 = vpop.eup %2125 }
 0x98d   :  { %v809_v34 = vmul.f32 0.5, %v808_v31  ;;  %v813_v57 = vadd.f32 1.0, %v2126_v55 }
 0x98f   :  { %v819_v37 = vmul.f32 %v2124_v8, %v809_v34  ;;  %v818_v15 = vmul.f32 %v816_v32, %v809_v34  ;;  %v814_v58 = vmul.f32 0.5, %v813_v57 }
 0x991   :  { %821 = vrot.lane.b32.xlu1 %v819_v37, %s2368_s19 }
 0xa03   :  { %v822_v54 = vpop.permute.xlu1 %821 }
 0xa04   :  { %v2933_v56 = vadd.f32 %v822_v54, %v818_v15 }
 0xa06   :  { %2127 = vtanh.f32 %v2933_v56  ;;  %v891_v21 = vrot.slane %v2933_v56, 6 }
 0xa0c   :  { %v2128_v59 = vpop.eup %2127 }
 0xa0d   :  { %v826_v60 = vmul.f32 %v2128_v59, %v814_v58 }
 0xa0f   :  { %v828_v62 = vrot.slane %v826_v60, 4  ;;  %v2940_v3 = vsel %vm186_vm3, %v905_v61, %v826_v60 }
 0xa11   :  { %829 = vrot.lane.b32.xlu2 %v828_v62, %s2368_s19 }
 0xa6b   :  { %v830_v30 = vpop.permute.xlu2 %829 }
 0xa6c   :  { %2028 = vmatmul.msk.f32.vlgmr.msrb.gmra.mxu0 %vm318_vm8, %v830_v30  ;;  %2029 = vmatmul.msk.f32.vlgmr.msra.gmra.mxu1 %vm318_vm8, %v830_v30 }
 0xa6d   :  { %1117 = vmatpush.msrb.mxu0 %v2901_v51  ;;  %1137 = vmatpush.msra.mxu1 %v2903_v39 }
 0xa6f   :  { %1118 = vmatpush.msrb.mxu0 %v2905_v40  ;;  %1138 = vmatpush.msra.mxu1 %v2909_v43 }
 0xa71   :  { %1119 = vmatpush.msrb.mxu0 %v2911_v44  ;;  %1139 = vmatpush.msra.mxu1 %v2913_v47 }
 0xa73   :  { %1120 = vmatpush.msrb.mxu0 %v2919_v49  ;;  %1140 = vmatpush.msra.mxu1 %v2921_v52 }
 0xa74   :  { %2034 = vmatmul.msk.f32.vlgmr.msra.gmra.mxu0 %vm318_vm8, %v2655_v46  ;;  %2035 = vmatmul.msk.f32.vlgmr.msrb.gmra.mxu1 %vm318_vm8, %v2655_v46  ;;  %v3032_v46 = vld [vmem:[%s3367_s9] sm:$0x3] }
 0xa75   :  { %1121 = vmatpush.msrb.mxu0 %v2943_v6  ;;  %1141 = vmatpush.msra.mxu1 %v2945_v9  ;;  %v909_v42 = vperm.slane %v3032_v46, 0  ;;  %v910_v63 = vperm.slane %v3032_v46, 1 }
 0xa77   :  { %1122 = vmatpush.msrb.mxu0 %v2947_v10  ;;  %1142 = vmatpush.msra.mxu1 %v2951_v14  ;;  %v3038_v17 = vadd.f32 %v940_v4, %v909_v42 }
 0xa79   :  { %1123 = vmatpush.msrb.mxu0 %v2953_v18  ;;  %1143 = vmatpush.msra.mxu1 %v2955_v41 }
 0xa7b   :  { %1124 = vmatpush.msrb.mxu0 %v2961_v22  ;;  %1144 = vmatpush.msra.mxu1 %v2963_v26 }
 0xa7d   :  { %1267 = vmatpush.msra.mxu0 %v2901_v51  ;;  %1287 = vmatpush.msrb.mxu1 %v2903_v39 }
 0xa7f   :  { %1268 = vmatpush.msra.mxu0 %v2905_v40  ;;  %1288 = vmatpush.msrb.mxu1 %v2909_v43 }
 0xa81   :  { %1269 = vmatpush.msra.mxu0 %v2911_v44  ;;  %1289 = vmatpush.msrb.mxu1 %v2913_v47 }
 0xa83   :  { %1270 = vmatpush.msra.mxu0 %v2919_v49  ;;  %1290 = vmatpush.msrb.mxu1 %v2921_v52 }
 0xa85   :  { %1271 = vmatpush.msra.mxu0 %v2943_v6  ;;  %1291 = vmatpush.msrb.mxu1 %v2945_v9 }
 0xa87   :  { %1272 = vmatpush.msra.mxu0 %v2947_v10  ;;  %1292 = vmatpush.msrb.mxu1 %v2951_v14 }
 0xa89   :  { %1273 = vmatpush.msra.mxu0 %v2953_v18  ;;  %1293 = vmatpush.msrb.mxu1 %v2955_v41 }
 0xa8b   :  { %1274 = vmatpush.msra.mxu0 %v2961_v22  ;;  %1294 = vmatpush.msrb.mxu1 %v2963_v26 }
 0xae9   :  { %v850_v33 = vpop.f32.mrf.mxu0  ;;  %v870_v35 = vpop.f32.mrf.mxu1 }
 0xaea   :  { %v875_v38 = vrot.slane %v850_v33, 2  ;;  %v876_v50 = vrot.slane %v870_v35, 2 }
 0xaec   :  { %v879_v45 = vadd.f32 %v875_v38, %v2776_v13  ;;  %v880_v0 = vadd.f32 %v876_v50, %v2875_v20  ;;  %v3045_v13 = vadd.f32 %v963_v1, %v910_v63 }
 0xaee   :  { %v881_v48 = vmul.f32 0.5, %v879_v45  ;;  %v886_v57 = vmul.f32 0.5, %v880_v0 }
 0xaf0   :  { %2129 = vtanh.f32 %v881_v48 }
 0xaf1   :  { %v986_v19 = vpop.f32.mrf.mxu0  ;;  %v1006_v7 = vpop.f32.mrf.mxu1  ;;  %2131 = vtanh.f32 %v880_v0 }
 0xaf2   :  { %v1009_v2 = vadd.f32 %v986_v19, %v3038_v17  ;;  %v1010_v5 = vadd.f32 %v1006_v7, %v3045_v13 }
 0xaf4   :  { %v1011_v11 = vmul.f32 0.5, %v1009_v2  ;;  %v1016_v34 = vmul.f32 0.5, %v1010_v5 }
 0xaf6   :  { %v2130_v12 = vpop.eup %2129  ;;  %2133 = vtanh.f32 %v1011_v11 }
 0xaf7   :  { %v883_v16 = vadd.f32 1.0, %v2130_v12  ;;  %v2132_v20 = vpop.eup %2131  ;;  %2135 = vtanh.f32 %v1010_v5 }
 0xaf8   :  { %2137 = vtanh.f32 %v1016_v34 }
 0xaf9   :  { %v884_v23 = vmul.f32 0.5, %v883_v16 }
 0xafb   :  { %v894_v24 = vmul.f32 %v2132_v20, %v884_v23  ;;  %v893_v25 = vmul.f32 %v891_v21, %v884_v23 }
 0xafc   :  { %v2134_v27 = vpop.eup %2133 }
 0xafd   :  { %v1013_v28 = vadd.f32 1.0, %v2134_v27  ;;  %896 = vrot.lane.b32.xlu1 %v894_v24, %s2368_s19  ;;  %v2136_v31 = vpop.eup %2135 }
 0xafe   :  { %v2138_v15 = vpop.eup %2137 }
 0xaff   :  { %v1014_v29 = vmul.f32 0.5, %v1013_v28  ;;  %v1018_v54 = vadd.f32 1.0, %v2138_v15 }
 0xb01   :  { %v1021_v32 = vmul.f32 %v2136_v31, %v1014_v29  ;;  %v1020_v8 = vmul.f32 %v1014_v29, %v2788_v36  ;;  %v1019_v55 = vmul.f32 0.5, %v1018_v54 }
 0xb03   :  { %1023 = vrot.lane.b32.xlu2 %v1021_v32, %s2368_s19 }
 0xb5d   :  { %v1024_v37 = vpop.permute.xlu2 %1023 }
 0xb5e   :  { %v1026_v53 = vadd.f32 %v1024_v37, %v1020_v8 }
 0xb60   :  { %2139 = vtanh.f32 %v1026_v53  ;;  %v1092_v5 = vrot.slane %v1026_v53, 6 }
 0xb61   :  { %2141 = vtanh.f32 %v886_v57 }
 0xb66   :  { %v2140_v56 = vpop.eup %2139 }
 0xb67   :  { %v3052_v58 = vmul.f32 %v2140_v56, %v1019_v55  ;;  %v2142_v60 = vpop.eup %2141 }
 0xb68   :  { %v888_v36 = vadd.f32 1.0, %v2142_v60 }
 0xb69   :  { %1030 = vrot.lane.b32.xlu1 %v3052_v58, %s2368_s19 }
 0xb6a   :  { %v889_v62 = vmul.f32 0.5, %v888_v36 }
 0xb6f   :  { %v897_v59 = vpop.permute.xlu1 %896 }
 0xb70   :  { %v3056_v61 = vadd.f32 %v897_v59, %v893_v25 }
 0xb72   :  { %2143 = vtanh.f32 %v3056_v61 }
 0xb78   :  { %v2144_v30 = vpop.eup %2143 }
 0xb79   :  { %v3059_v33 = vmul.f32 %v2144_v30, %v889_v62 }
 0xb7b   :  { %v907_v35 = vsel %vm190_vm5, %v2940_v3, %v3059_v33 }
 0xb7c   :  { %917 = vrot.lane.b32.xlu0 %v907_v35, %s2368_s19 }
 0xbdb   :  { %v1031_v45 = vpop.permute.xlu1 %1030 }
 0xbee   :  { %v918_v38 = vpop.permute.xlu0 %917 }
 0xbef   :  { %2031 = vmatmul.msk.f32.gmra.mxu2 %vm318_vm8, %v918_v38  ;;  %2033 = vmatmul.msk.f32.gmra.mxu3 %vm318_vm8, %v918_v38 }
 0xbf7   :  { %2036 = vmatmul.msk.f32.vlgmr.msra.gmra.mxu2 %vm318_vm8, %v1031_v45  ;;  %2037 = vmatmul.msk.f32.vlgmr.msrb.gmra.mxu3 %vm318_vm8, %v1031_v45 }
 0xbf8   :  { %1335 = vmatpush.msra.mxu2 %v2901_v51  ;;  %1355 = vmatpush.msrb.mxu3 %v2903_v39 }
 0xbfa   :  { %1336 = vmatpush.msra.mxu2 %v2905_v40  ;;  %1356 = vmatpush.msrb.mxu3 %v2909_v43 }
 0xbfc   :  { %1337 = vmatpush.msra.mxu2 %v2911_v44  ;;  %1357 = vmatpush.msrb.mxu3 %v2913_v47 }
 0xbfe   :  { %1338 = vmatpush.msra.mxu2 %v2919_v49  ;;  %1358 = vmatpush.msrb.mxu3 %v2921_v52 }
 0xc00   :  { %1339 = vmatpush.msra.mxu2 %v2943_v6  ;;  %1359 = vmatpush.msrb.mxu3 %v2945_v9 }
 0xc02   :  { %1340 = vmatpush.msra.mxu2 %v2947_v10  ;;  %1360 = vmatpush.msrb.mxu3 %v2951_v14 }
 0xc04   :  { %1341 = vmatpush.msra.mxu2 %v2953_v18  ;;  %1361 = vmatpush.msrb.mxu3 %v2955_v41 }
 0xc06   :  { %1342 = vmatpush.msra.mxu2 %v2961_v22  ;;  %1362 = vmatpush.msrb.mxu3 %v2963_v26 }
 0xc72   :  { %v3085_v3 = vpop.f32.mrf.mxu2  ;;  %v3087_v50 = vpop.f32.mrf.mxu3 }
 0xc7a   :  { %v1051_v4 = vpop.f32.mrf.mxu2  ;;  %v1071_v48 = vpop.f32.mrf.mxu3 }
 0xc7b   :  { %v1076_v0 = vrot.slane %v1051_v4, 6  ;;  %v1077_v19 = vrot.slane %v1071_v48, 6 }
 0xc7d   :  { %v1080_v1 = vadd.f32 %v1076_v0, %v3038_v17  ;;  %v1081_v7 = vadd.f32 %v1077_v19, %v3045_v13 }
 0xc7f   :  { %v1082_v2 = vmul.f32 0.5, %v1080_v1  ;;  %v1087_v24 = vmul.f32 0.5, %v1081_v7 }
 0xc81   :  { %2145 = vtanh.f32 %v1082_v2 }
 0xc82   :  { %2147 = vtanh.f32 %v1081_v7 }
 0xc83   :  { %2149 = vtanh.f32 %v1087_v24 }
 0xc87   :  { %v2146_v11 = vpop.eup %2145 }
 0xc88   :  { %v1084_v12 = vadd.f32 1.0, %v2146_v11  ;;  %v2148_v21 = vpop.eup %2147 }
 0xc89   :  { %v2150_v27 = vpop.eup %2149 }
 0xc8a   :  { %v1085_v16 = vmul.f32 0.5, %v1084_v12  ;;  %v1089_v29 = vadd.f32 1.0, %v2150_v27 }
 0xc8c   :  { %v1095_v23 = vmul.f32 %v2148_v21, %v1085_v16  ;;  %v1094_v20 = vmul.f32 %v1092_v5, %v1085_v16  ;;  %v1090_v31 = vmul.f32 0.5, %v1089_v29 }
 0xc8e   :  { %1097 = vrot.lane.b32.xlu2 %v1095_v23, %s2368_s19 }
 0xce8   :  { %v1098_v25 = vpop.permute.xlu2 %1097 }
 0xce9   :  { %v1100_v28 = vadd.f32 %v1098_v25, %v1094_v20 }
 0xceb   :  { %2151 = vtanh.f32 %v1100_v28  ;;  %v1167_v62 = vrot.slane %v1100_v28, 6 }
 0xcf1   :  { %v2152_v32 = vpop.eup %2151 }
 0xcf2   :  { %v1102_v34 = vmul.f32 %v2152_v32, %v1090_v31  ;;  %v3150_v32 = vadd.f32 %v3085_v3, %v909_v42 }
 0xcf4   :  { %v1104_v8 = vrot.slane %v1102_v34, 2  ;;  %1571 = vst [vmem:[#allocation1] sm:$0xff] %v1102_v34 }
 0xcf6   :  { %1105 = vrot.lane.b32.xlu0 %v1104_v8, %s2368_s19 }
 0xcfb   :  { %v3114_v12 = vld [vmem:[#allocation1 + $0x2] ss:$9 sm:$0xff] }
 0xcfc   :  { %v3116_v5 = vld [vmem:[#allocation1 + $0x3] ss:$9 sm:$0xff] }
 0xd68   :  { %v1106_v37 = vpop.permute.xlu0 %1105 }
 0xd69   :  { %2038 = vmatmul.msk.f32.vlgmr.msrb.gmra.mxu0 %vm318_vm8, %v1106_v37  ;;  %2039 = vmatmul.msk.f32.vlgmr.msra.gmra.mxu1 %vm318_vm8, %v1106_v37 }
 0xd6a   :  { %1410 = vmatpush.msrb.mxu0 %v2901_v51  ;;  %1430 = vmatpush.msra.mxu1 %v2903_v39 }
 0xd6c   :  { %1411 = vmatpush.msrb.mxu0 %v2905_v40  ;;  %1431 = vmatpush.msra.mxu1 %v2909_v43 }
 0xd6e   :  { %1412 = vmatpush.msrb.mxu0 %v2911_v44  ;;  %1432 = vmatpush.msra.mxu1 %v2913_v47 }
 0xd70   :  { %1413 = vmatpush.msrb.mxu0 %v2919_v49  ;;  %1433 = vmatpush.msra.mxu1 %v2921_v52 }
 0xd72   :  { %1414 = vmatpush.msrb.mxu0 %v2943_v6  ;;  %1434 = vmatpush.msra.mxu1 %v2945_v9 }
 0xd74   :  { %1415 = vmatpush.msrb.mxu0 %v2947_v10  ;;  %1435 = vmatpush.msra.mxu1 %v2951_v14 }
 0xd76   :  { %1416 = vmatpush.msrb.mxu0 %v2953_v18  ;;  %1436 = vmatpush.msra.mxu1 %v2955_v41 }
 0xd78   :  { %1417 = vmatpush.msrb.mxu0 %v2961_v22  ;;  %1437 = vmatpush.msra.mxu1 %v2963_v26 }
 0xde6   :  { %v1126_v15 = vpop.f32.mrf.mxu0  ;;  %v1146_v53 = vpop.f32.mrf.mxu1 }
 0xde7   :  { %v1151_v54 = vrot.slane %v1126_v15, 4  ;;  %v1152_v56 = vrot.slane %v1146_v53, 4  ;;  %v3156_v15 = vadd.f32 %v3087_v50, %v910_v63 }
 0xde9   :  { %v1155_v55 = vadd.f32 %v1151_v54, %v3038_v17  ;;  %v1156_v59 = vadd.f32 %v1152_v56, %v3045_v13 }
 0xdeb   :  { %v1157_v57 = vmul.f32 0.5, %v1155_v55  ;;  %v1162_v4 = vmul.f32 0.5, %v1156_v59 }
 0xded   :  { %2153 = vtanh.f32 %v1157_v57 }
 0xdee   :  { %2155 = vtanh.f32 %v1156_v59 }
 0xdef   :  { %2157 = vtanh.f32 %v1162_v4 }
 0xdf3   :  { %v2154_v60 = vpop.eup %2153 }
 0xdf4   :  { %v1159_v36 = vadd.f32 1.0, %v2154_v60  ;;  %v2156_v35 = vpop.eup %2155 }
 0xdf5   :  { %v2158_v0 = vpop.eup %2157 }
 0xdf6   :  { %v1160_v30 = vmul.f32 0.5, %v1159_v36  ;;  %v1164_v19 = vadd.f32 1.0, %v2158_v0 }
 0xdf8   :  { %v1170_v38 = vmul.f32 %v2156_v35, %v1160_v30  ;;  %v1169_v45 = vmul.f32 %v1167_v62, %v1160_v30  ;;  %v1165_v2 = vmul.f32 0.5, %v1164_v19 }
 0xdfa   :  { %1172 = vrot.lane.b32.xlu1 %v1170_v38, %s2368_s19 }
 0xe6c   :  { %v1173_v48 = vpop.permute.xlu1 %1172 }
 0xe6d   :  { %v1175_v1 = vadd.f32 %v1173_v48, %v1169_v45 }
 0xe6f   :  { %2159 = vtanh.f32 %v1175_v1 }
 0xe75   :  { %v2160_v7 = vpop.eup %2159 }
 0xe76   :  { %v1177_v11 = vmul.f32 %v2160_v7, %v1165_v2 }
 0xe78   :  { %v1179_v16 = vrot.slane %v1177_v11, 4  ;;  %1576 = vst [vmem:[#allocation1] sm:$0xff] %v1177_v11 }
 0xe7a   :  { %1180 = vrot.lane.b32.xlu2 %v1179_v16, %s2368_s19 }
 0xe7f   :  { %v3140_v27 = vld [vmem:[#allocation1 + $0x4] ss:$9 sm:$0xff] }
 0xe80   :  { %v3142_v28 = vld [vmem:[#allocation1 + $0x5] ss:$9 sm:$0xff] }
 0xed4   :  { %v1181_v21 = vpop.permute.xlu2 %1180 }
 0xed5   :  { %2040 = vmatmul.msk.f32.vlgmr.msrb.gmra.mxu2 %vm318_vm8, %v1181_v21  ;;  %2041 = vmatmul.msk.f32.vlgmr.msra.gmra.mxu3 %vm318_vm8, %v1181_v21 }
 0xed6   :  { %1485 = vmatpush.msrb.mxu2 %v2901_v51  ;;  %1505 = vmatpush.msra.mxu3 %v2903_v39 }
 0xed8   :  { %1486 = vmatpush.msrb.mxu2 %v2905_v40  ;;  %1506 = vmatpush.msra.mxu3 %v2909_v43 }
 0xeda   :  { %1487 = vmatpush.msrb.mxu2 %v2911_v44  ;;  %1507 = vmatpush.msra.mxu3 %v2913_v47 }
 0xedc   :  { %1488 = vmatpush.msrb.mxu2 %v2919_v49  ;;  %1508 = vmatpush.msra.mxu3 %v2921_v52 }
 0xede   :  { %1489 = vmatpush.msrb.mxu2 %v2943_v6  ;;  %1509 = vmatpush.msra.mxu3 %v2945_v9  ;;  %v1242_v9 = vrot.slane %v1175_v1, 6 }
 0xee0   :  { %1490 = vmatpush.msrb.mxu2 %v2947_v10  ;;  %1510 = vmatpush.msra.mxu3 %v2951_v14 }
 0xee2   :  { %1491 = vmatpush.msrb.mxu2 %v2953_v18  ;;  %1511 = vmatpush.msra.mxu3 %v2955_v41 }
 0xee4   :  { %1492 = vmatpush.msrb.mxu2 %v2961_v22  ;;  %1512 = vmatpush.msra.mxu3 %v2963_v26 }
 0xf58   :  { %v1201_v51 = vpop.f32.mrf.mxu2  ;;  %v1221_v39 = vpop.f32.mrf.mxu3 }
 0xf59   :  { %v1226_v40 = vrot.slane %v1201_v51, 2  ;;  %v1227_v44 = vrot.slane %v1221_v39, 2 }
 0xf5b   :  { %v1230_v43 = vadd.f32 %v1226_v40, %v3038_v17  ;;  %v1231_v49 = vadd.f32 %v1227_v44, %v3045_v13 }
 0xf5d   :  { %v1232_v47 = vmul.f32 0.5, %v1230_v43  ;;  %v1237_v22 = vmul.f32 0.5, %v1231_v49 }
 0xf5f   :  { %2161 = vtanh.f32 %v1232_v47 }
 0xf60   :  { %2163 = vtanh.f32 %v1231_v49 }
 0xf61   :  { %2165 = vtanh.f32 %v1237_v22 }
 0xf65   :  { %v2162_v52 = vpop.eup %2161 }
 0xf66   :  { %v1234_v6 = vadd.f32 1.0, %v2162_v52  ;;  %v2164_v14 = vpop.eup %2163 }
 0xf67   :  { %v2166_v23 = vpop.eup %2165 }
 0xf68   :  { %v1235_v10 = vmul.f32 0.5, %v1234_v6  ;;  %v1239_v20 = vadd.f32 1.0, %v2166_v23 }
 0xf6a   :  { %v1245_v18 = vmul.f32 %v2164_v14, %v1235_v10  ;;  %v1244_v41 = vmul.f32 %v1242_v9, %v1235_v10  ;;  %v1240_v24 = vmul.f32 0.5, %v1239_v20 }
 0xf6c   :  { %1247 = vrot.lane.b32.xlu0 %v1245_v18, %s2368_s19 }
 0xfde   :  { %v1248_v26 = vpop.permute.xlu0 %1247 }
 0xfdf   :  { %v1250_v17 = vadd.f32 %v1248_v26, %v1244_v41 }
 0xfe1   :  { %2167 = vtanh.f32 %v1250_v17  ;;  %v1311_v57 = vrot.slane %v1250_v17, 6 }
 0xfe7   :  { %v2168_v25 = vpop.eup %2167 }
 0xfe8   :  { %v1252_v13 = vmul.f32 %v2168_v25, %v1240_v24 }
 0xfea   :  { %v1254_v29 = vrot.slane %v1252_v13, 6  ;;  %1581 = vst [vmem:[#allocation1] sm:$0xff] %v1252_v13 }
 0xfec   :  { %1255 = vrot.lane.b32.xlu1 %v1254_v29, %s2368_s19 }
 0xff1   :  { %v3169_v18 = vld [vmem:[#allocation1 + $0x6] ss:$9 sm:$0xff] }
 0xff2   :  { %v3171_v41 = vld [vmem:[#allocation1 + $0x7] ss:$9 sm:$0xff] }
0x105e   :  { %v1256_v31 = vpop.permute.xlu1 %1255 }
0x105f   :  { %2042 = vmatmul.msk.f32.vlgmr.msra.gmra.mxu0 %vm318_vm8, %v1256_v31  ;;  %2043 = vmatmul.msk.f32.vlgmr.msrb.gmra.mxu1 %vm318_vm8, %v1256_v31 }
0x10dc   :  { %v1276_v34 = vpop.f32.mrf.mxu0  ;;  %v1296_v37 = vpop.f32.mrf.mxu1 }
0x10dd   :  { %v1299_v8 = vadd.f32 %v1276_v34, %v3150_v32  ;;  %v1300_v54 = vadd.f32 %v1296_v37, %v3156_v15 }
0x10df   :  { %v1301_v53 = vmul.f32 0.5, %v1299_v8  ;;  %v1306_v36 = vmul.f32 0.5, %v1300_v54 }
0x10e1   :  { %2169 = vtanh.f32 %v1301_v53 }
0x10e2   :  { %2171 = vtanh.f32 %v1300_v54 }
0x10e3   :  { %2173 = vtanh.f32 %v1306_v36 }
0x10e7   :  { %v2170_v55 = vpop.eup %2169 }
0x10e8   :  { %v1303_v56 = vadd.f32 1.0, %v2170_v55  ;;  %v2172_v42 = vpop.eup %2171 }
0x10e9   :  { %v2174_v62 = vpop.eup %2173 }
0x10ea   :  { %v1304_v59 = vmul.f32 0.5, %v1303_v56  ;;  %v1308_v50 = vadd.f32 1.0, %v2174_v62 }
0x10ec   :  { %v1314_v3 = vmul.f32 %v2172_v42, %v1304_v59  ;;  %v1313_v60 = vmul.f32 %v1311_v57, %v1304_v59  ;;  %v1309_v30 = vmul.f32 0.5, %v1308_v50 }
0x10ee   :  { %1316 = vrot.lane.b32.xlu2 %v1314_v3, %s2368_s19 }
0x1148   :  { %v1317_v46 = vpop.permute.xlu2 %1316 }
0x1149   :  { %v1319_v63 = vadd.f32 %v1317_v46, %v1313_v60 }
0x114b   :  { %2175 = vtanh.f32 %v1319_v63  ;;  %v1385_v21 = vrot.slane %v1319_v63, 6 }
0x1151   :  { %v2176_v35 = vpop.eup %2175 }
0x1152   :  { %v3160_v38 = vmul.f32 %v2176_v35, %v1309_v30 }
0x1154   :  { %1323 = vrot.lane.b32.xlu0 %v3160_v38, %s2368_s19 }
0x11c6   :  { %v1324_v45 = vpop.permute.xlu0 %1323 }
0x11c7   :  { %2044 = vmatmul.msk.f32.vlgmr.msra.gmra.mxu2 %vm318_vm8, %v1324_v45  ;;  %2045 = vmatmul.msk.f32.vlgmr.msrb.gmra.mxu3 %vm318_vm8, %v1324_v45 }
0x124a   :  { %v1344_v4 = vpop.f32.mrf.mxu2  ;;  %v1364_v48 = vpop.f32.mrf.mxu3 }
0x124b   :  { %v1369_v0 = vrot.slane %v1344_v4, 6  ;;  %v1370_v19 = vrot.slane %v1364_v48, 6 }
0x124d   :  { %v1373_v1 = vadd.f32 %v1369_v0, %v3150_v32  ;;  %v1374_v7 = vadd.f32 %v1370_v19, %v3156_v15 }
0x124f   :  { %v1375_v2 = vmul.f32 0.5, %v1373_v1  ;;  %v1380_v44 = vmul.f32 0.5, %v1374_v7 }
0x1251   :  { %2177 = vtanh.f32 %v1375_v2 }
0x1252   :  { %2179 = vtanh.f32 %v1374_v7 }
0x1253   :  { %2181 = vtanh.f32 %v1380_v44 }
0x1257   :  { %v2178_v11 = vpop.eup %2177 }
0x1258   :  { %v1377_v16 = vadd.f32 1.0, %v2178_v11  ;;  %v2180_v39 = vpop.eup %2179 }
0x1259   :  { %v2182_v49 = vpop.eup %2181 }
0x125a   :  { %v1378_v51 = vmul.f32 0.5, %v1377_v16  ;;  %v1382_v6 = vadd.f32 1.0, %v2182_v49 }
0x125c   :  { %v1388_v40 = vmul.f32 %v2180_v39, %v1378_v51  ;;  %v1387_v43 = vmul.f32 %v1385_v21, %v1378_v51  ;;  %v1383_v9 = vmul.f32 0.5, %v1382_v6 }
0x125e   :  { %1390 = vrot.lane.b32.xlu1 %v1388_v40, %s2368_s19 }
0x12d0   :  { %v1391_v47 = vpop.permute.xlu1 %1390 }
0x12d1   :  { %v1393_v52 = vadd.f32 %v1391_v47, %v1387_v43 }
0x12d3   :  { %2183 = vtanh.f32 %v1393_v52  ;;  %v1460_v8 = vrot.slane %v1393_v52, 6 }
0x12d9   :  { %v2184_v10 = vpop.eup %2183 }
0x12da   :  { %v1395_v14 = vmul.f32 %v2184_v10, %v1383_v9  ;;  %v1586_v9 = vrot.slane %v3160_v38, 1 }
0x12dc   :  { %v1397_v22 = vrot.slane %v1395_v14, 2  ;;  %1587 = vst [vmem:[#allocation1] sm:$0xff] %v1395_v14 }
0x12de   :  { %1398 = vrot.lane.b32.xlu2 %v1397_v22, %s2368_s19  ;;  %v1602_v22 = vperm.slane %v3114_v12, 0 }
0x12e0   :  { %v1630_v12 = vsel %vm180_vm0, %v3052_v58, %v1602_v22 }
0x12e3   :  { %v3179_v62 = vld [vmem:[#allocation1 + $0x2] ss:$9 sm:$0xff] }
0x12e4   :  { %v3181_v63 = vld [vmem:[#allocation1 + $0x3] ss:$9 sm:$0xff] }
0x1338   :  { %v1399_v26 = vpop.permute.xlu2 %1398 }
0x1339   :  { %2046 = vmatmul.msk.f32.vlgmr.msrb.gmra.mxu0 %vm318_vm8, %v1399_v26  ;;  %2047 = vmatmul.msk.f32.vlgmr.msra.gmra.mxu1 %vm318_vm8, %v1399_v26  ;;  %v1603_v26 = vperm.slane %v3116_v5, 0  ;;  %v1619_v5 = vperm.slane %v3181_v63, 0 }
0x13b6   :  { %v1419_v23 = vpop.f32.mrf.mxu0  ;;  %v1439_v17 = vpop.f32.mrf.mxu1 }
0x13b7   :  { %v1444_v20 = vrot.slane %v1419_v23, 4  ;;  %v1445_v25 = vrot.slane %v1439_v17, 4  ;;  %v1606_v23 = vperm.slane %v3140_v27, 0  ;;  %v1607_v17 = vperm.slane %v3142_v28, 0 }
0x13b9   :  { %v1448_v24 = vadd.f32 %v1444_v20, %v3150_v32  ;;  %v1449_v29 = vadd.f32 %v1445_v25, %v3156_v15  ;;  %v1569_v20 = vrot.slane %v3052_v58, 1  ;;  %v1611_v25 = vperm.slane %v3171_v41, 0 }
0x13ba   :  { %v1632_v28 = vsel %vm182_vm1, %v1630_v12, %v1606_v23 }
0x13bb   :  { %v1450_v13 = vmul.f32 0.5, %v1448_v24  ;;  %v1455_v56 = vmul.f32 0.5, %v1449_v29  ;;  %v1610_v24 = vperm.slane %v3169_v18, 0  ;;  %v1631_v27 = vsel %vm180_vm0, %v1569_v20, %v1603_v26 }
0x13bc   :  { %v1633_v18 = vsel %vm182_vm1, %v1631_v27, %v1607_v17  ;;  %v1824_v27 = vld [vmem:[%s3379_s25 + $0x78] sm:$0xff] }
0x13bd   :  { %2185 = vtanh.f32 %v1450_v13  ;;  %v1614_v13 = vperm.slane %v3160_v38, 0  ;;  %v1634_v41 = vsel %vm184_vm2, %v1632_v28, %v1610_v24  ;;  %v1635_v38 = vsel %vm184_vm2, %v1633_v18, %v1611_v25  ;;  %1829 = vmatpush.msra.mxu2 %v1824_v27  ;;  %v1822_v28 = vld [vmem:[%s3379_s25 + $0x68] sm:$0xff]  ;;  %v1820_v18 = vld [vmem:[%s3379_s25 + $0x58] sm:$0xff] }
0x13be   :  { %2187 = vtanh.f32 %v1449_v29  ;;  %v1615_v29 = vperm.slane %v1586_v9, 0  ;;  %vm1550_vm2 = vcmask 523270  }
0x13bf   :  { %2189 = vtanh.f32 %v1455_v56 }
0x13c0   :  { %v1637_v58 = vsel %vm186_vm3, %v1635_v38, %v1615_v29  ;;  %v1819_v38 = vld [vmem:[%s3379_s25 + $0x50] sm:$0xff] }
0x13c3   :  { %v2186_v31 = vpop.eup %2185 }
0x13c4   :  { %v1452_v34 = vadd.f32 1.0, %v2186_v31  ;;  %v2188_v53 = vpop.eup %2187  ;;  %v1618_v31 = vperm.slane %v3179_v62, 0 }
0x13c5   :  { %v2190_v59 = vpop.eup %2189 }
0x13c6   :  { %v1453_v37 = vmul.f32 0.5, %v1452_v34  ;;  %v1457_v3 = vadd.f32 1.0, %v2190_v59  ;;  %v1639_v59 = vsel %vm188_vm4, %v1637_v58, %v1619_v5 }
0x13c8   :  { %v1463_v54 = vmul.f32 %v2188_v53, %v1453_v37  ;;  %v1462_v55 = vmul.f32 %v1460_v8, %v1453_v37  ;;  %v1458_v60 = vmul.f32 0.5, %v1457_v3  ;;  %v1636_v53 = vsel %vm186_vm3, %v1634_v41, %v1614_v13 }
0x13c9   :  { %v1638_v56 = vsel %vm188_vm4, %v1636_v53, %v1618_v31  ;;  %v1817_v53 = vld [vmem:[%s3379_s25 + $0x40] sm:$0xff]  ;;  %vm1895_vm3 = vcmask 408576  }
0x13ca   :  { %1465 = vrot.lane.b32.xlu0 %v1463_v54, %s2368_s19 }
0x143c   :  { %v1466_v57 = vpop.permute.xlu0 %1465 }
0x143d   :  { %v1468_v42 = vadd.f32 %v1466_v57, %v1462_v55 }
0x143f   :  { %2191 = vtanh.f32 %v1468_v42  ;;  %v1535_v11 = vrot.slane %v1468_v42, 6 }
0x1445   :  { %v2192_v36 = vpop.eup %2191 }
0x1446   :  { %v1470_v46 = vmul.f32 %v2192_v36, %v1458_v60 }
0x1448   :  { %v1472_v50 = vrot.slane %v1470_v46, 4  ;;  %1592 = vst [vmem:[#allocation1] sm:$0xff] %v1470_v46  ;;  %v1645_v46 = vld [vmem:[%s3361_s3 + $0x8] sm:$0xff] }
0x144a   :  { %1473 = vrot.lane.b32.xlu1 %v1472_v50, %s2368_s19 }
0x144f   :  { %v1594_v10 = vld [vmem:[#allocation1 + $0x4] ss:$9 sm:$0xff] }
0x1450   :  { %v1596_v14 = vld [vmem:[#allocation1 + $0x5] ss:$9 sm:$0xff]  ;;  %v1622_v34 = vperm.slane %v1594_v10, 0 }
0x1451   :  { %v1623_v8 = vperm.slane %v1596_v14, 0 }
0x1452   :  { %v1640_v42 = vsel %vm190_vm5, %v1638_v56, %v1622_v34  ;;  %v1823_v34 = vld [vmem:[%s3379_s25 + $0x70] sm:$0xff]  ;;  %v1814_v56 = vld [vmem:[%s3379_s25 + $0x28] sm:$0xff] }
0x1453   :  { %v1641_v3 = vsel %vm190_vm5, %v1639_v59, %v1623_v8  ;;  %1830 = vmatpush.msra.mxu2 %v1823_v34  ;;  %v1821_v8 = vld [vmem:[%s3379_s25 + $0x60] sm:$0xff]  ;;  %v1812_v59 = vld [vmem:[%s3379_s25 + $0x18] sm:$0xff] }
0x1455   :  { %1831 = vmatpush.msra.mxu2 %v1822_v28 }
0x1457   :  { %1832 = vmatpush.msra.mxu2 %v1821_v8 }
0x1459   :  { %1833 = vmatpush.msra.mxu2 %v1820_v18 }
0x145b   :  { %1834 = vmatpush.msra.mxu2 %v1819_v38 }
0x14bc   :  { %v1474_v30 = vpop.permute.xlu1 %1473 }
0x14bd   :  { %2048 = vmatmul.msk.f32.vlgmr.msrb.gmra.mxu2 %vm318_vm8, %v1474_v30  ;;  %2049 = vmatmul.msk.f32.vlgmr.msra.gmra.mxu3 %vm318_vm8, %v1474_v30 }
0x1540   :  { %v1494_v35 = vpop.f32.mrf.mxu2  ;;  %v1514_v45 = vpop.f32.mrf.mxu3 }
0x1541   :  { %v1519_v4 = vrot.slane %v1494_v35, 2  ;;  %v1520_v0 = vrot.slane %v1514_v45, 2 }
0x1543   :  { %v1523_v48 = vadd.f32 %v1519_v4, %v3150_v32  ;;  %v1524_v19 = vadd.f32 %v1520_v0, %v3156_v15  ;;  %v1644_v32 = vld [vmem:[%s3361_s3] sm:$0xff] }
0x1544   :  { %2050 = vmatpush.xpose.msk.msrb.mxu1 %vm318_vm8, %v1644_v32  ;;  %1769 = vmatpush.msra.mxu0 %v1644_v32 }
0x1545   :  { %v1525_v1 = vmul.f32 0.5, %v1523_v48  ;;  %v1530_v40 = vmul.f32 0.5, %v1524_v19 }
0x1547   :  { %2193 = vtanh.f32 %v1525_v1 }
0x1548   :  { %2195 = vtanh.f32 %v1524_v19  ;;  %2052 = vmatpush.xpose.msk.msra.mxu1 %vm318_vm8, %v1645_v46 }
0x1549   :  { %2197 = vtanh.f32 %v1530_v40 }
0x154d   :  { %v2194_v2 = vpop.eup %2193 }
0x154e   :  { %v1527_v7 = vadd.f32 1.0, %v2194_v2  ;;  %v2196_v21 = vpop.eup %2195 }
0x154f   :  { %v2198_v43 = vpop.eup %2197 }
0x1550   :  { %v1528_v16 = vmul.f32 0.5, %v1527_v7  ;;  %v1532_v47 = vadd.f32 1.0, %v2198_v43 }
0x1552   :  { %v1538_v51 = vmul.f32 %v2196_v21, %v1528_v16  ;;  %v1537_v39 = vmul.f32 %v1535_v11, %v1528_v16  ;;  %v1533_v49 = vmul.f32 0.5, %v1532_v47 }
0x1554   :  { %1540 = vrot.lane.b32.xlu2 %v1538_v51, %s2368_s19 }
0x15ae   :  { %v1541_v15 = vpop.permute.xlu2 %1540 }
0x15af   :  { %v3193_v44 = vadd.f32 %v1541_v15, %v1537_v39 }
0x15b1   :  { %2199 = vtanh.f32 %v3193_v44 }
0x15b7   :  { %v2200_v52 = vpop.eup %2199 }
0x15b8   :  { %v3196_v6 = vmul.f32 %v2200_v52, %v1533_v49 }
0x15ba   :  { %1597 = vst [vmem:[#allocation1] sm:$0xff] %v3196_v6 }
0x15c1   :  { %v1599_v37 = vld [vmem:[#allocation1 + $0x6] ss:$9 sm:$0xff] }
0x15c2   :  { %v1601_v54 = vld [vmem:[#allocation1 + $0x7] ss:$9 sm:$0xff]  ;;  %v1626_v55 = vperm.slane %v1599_v37, 0 }
0x15c3   :  { %v1627_v57 = vperm.slane %v1601_v54, 0  ;;  %v1818_v37 = vld [vmem:[%s3379_s25 + $0x48] sm:$0xff]  ;;  %v1816_v54 = vld [vmem:[%s3379_s25 + $0x38] sm:$0xff] }
0x15c4   :  { %v1642_v60 = vsel %vm192_vm6, %v1640_v42, %v1626_v55  ;;  %1835 = vmatpush.msra.mxu2 %v1818_v37  ;;  %v1815_v55 = vld [vmem:[%s3379_s25 + $0x30] sm:$0xff]  ;;  %v1810_v42 = vld [vmem:[%s3379_s25 + $0x8] sm:$0xff] }
0x15c5   :  { %v1643_v36 = vsel %vm192_vm6, %v1641_v3, %v1627_v57  ;;  %1647 = vrot.lane.b32.xlu0 %v1642_v60, %s2368_s19  ;;  %v1813_v57 = vld [vmem:[%s3379_s25 + $0x20] sm:$0xff] }
0x15c6   :  { %1675 = vrot.lane.b32.xlu1 %v1643_v36, %s2368_s19  ;;  %1836 = vmatpush.msra.mxu2 %v1817_v53  ;;  %v1809_v3 = vld [vmem:[%s3379_s25] sm:$0xff]  ;;  %v1861_v36 = vld [vmem:[%s3370_s12 + $0x38] sm:$0xff] }
0x15c7   :  { %1880 = vmatpush.msrb.mxu3 %v1861_v36 }
0x15c8   :  { %1837 = vmatpush.msra.mxu2 %v1816_v54 }
0x15ca   :  { %1838 = vmatpush.msra.mxu2 %v1815_v55 }
0x15cc   :  { %1839 = vmatpush.msra.mxu2 %v1814_v56 }
0x15ce   :  { %1840 = vmatpush.msra.mxu2 %v1813_v57 }
0x15d0   :  { %1841 = vmatpush.msra.mxu2 %v1812_v59 }
0x1637   :  { %v3231_v62 = vpop.permute.xlu0 %1647 }
0x1638   :  { %2051 = vmatmul.msk.f32.vlgmr.msrb.gmra.mxu1 %vm318_vm8, %v3231_v62  ;;  %v3235_v63 = vpop.permute.xlu1 %1675 }
0x1639   :  { %1792 = vmatpush.msrb.mxu1 %v1645_v46  ;;  %v1860_v46 = vld [vmem:[%s3370_s12 + $0x30] sm:$0xff] }
0x163a   :  { %1881 = vmatpush.msrb.mxu3 %v1860_v46 }
0x1640   :  { %2053 = vmatmul.msk.f32.vlgmr.msra.gmra.mxu1 %vm318_vm8, %v3235_v63 }
0x16b5   :  { %v1671_v50 = vpop.f32.mrf.mxu1 }
0x16b6   :  { %v1703_v30 = vsel %vm1702_vm9, %v1671_v50, -inf }
0x16b7   :  { %1704 = vmax.xlane.f32.xlu2 %v1703_v30 }
0x16bd   :  { %v1699_v35 = vpop.f32.mrf.mxu1 }
0x16be   :  { %v1706_v45 = vsel %vm1702_vm9, %v1699_v35, -inf }
0x16bf   :  { %1707 = vmax.xlane.f32.xlu0 %v1706_v45 }
0x172a   :  { %v1705_v4 = vpop.xlane.xlu2 %1704 }
0x172b   :  { %v1709_v48 = vsub.f32 %v1671_v50, %v1705_v4  ;;  %v1858_v4 = vld [vmem:[%s3370_s12 + $0x20] sm:$0xff] }
0x172d   :  { %v1711_v0 = vmul.f32 1.442695, %v1709_v48  ;;  %v1857_v48 = vld [vmem:[%s3370_s12 + $0x18] sm:$0xff] }
0x172f   :  { %2201 = vpow2.f32 %v1711_v0  ;;  %v1856_v0 = vld [vmem:[%s3370_s12 + $0x10] sm:$0xff] }
0x1732   :  { %v1708_v1 = vpop.xlane.xlu0 %1707 }
0x1733   :  { %v1710_v19 = vsub.f32 %v1699_v35, %v1708_v1  ;;  %v1855_v1 = vld [vmem:[%s3370_s12 + $0x8] sm:$0xff] }
0x1735   :  { %v2202_v2 = vpop.eup %2201  ;;  %v1713_v7 = vmul.f32 1.442695, %v1710_v19  ;;  %v2071_v19 = vld [vmem:[%s3369_s11] ss:$0 sm:$0xff]  ;;  %s2369_s11 = smov [#allocation10]  }
0x1736   :  { %v1715_v11 = vsel %vm1702_vm9, %v2202_v2, 0.0 }
0x1737   :  { %2203 = vpow2.f32 %v1713_v7  ;;  %1716 = vadd.xlane.f32.xlu1 %v1715_v11 }
0x173d   :  { %v2204_v16 = vpop.eup %2203 }
0x173e   :  { %v1718_v21 = vsel %vm1702_vm9, %v2204_v16, 0.0 }
0x173f   :  { %1719 = vadd.xlane.f32.xlu2 %v1718_v21 }
0x17aa   :  { %v1717_v51 = vpop.xlane.xlu1 %1716 }
0x17ab   :  { %2205 = vrcp.f32 %v1717_v51  ;;  %v1732_v43 = vand.u32 2147483648, %v1717_v51  ;;  %v1730_v49 = vand.u32 2147483647, %v1717_v51  ;;  %vm1726_vm11 = vweird.f32 %v1717_v51 }
0x17ad   :  { %v1733_v10 = vor.u32 1.1754944e-38, %v1732_v43  ;;  %vm1731_vm13 = vcmp.eq.f32.partialorder %v1730_v49, 8.507059e+37 }
0x17b1   :  { %v2206_v39 = vpop.eup %2205 }
0x17b2   :  { %v1722_v40 = vmul.f32 %v2206_v39, %v1717_v51  ;;  %v1720_v32 = vpop.xlane.xlu2 %1719  ;;  %vm1727_vm10 = vweird.f32 %v2206_v39 }
0x17b3   :  { %2207 = vrcp.f32 %v1720_v32  ;;  %vm1728_vm12 = vmor %vm1726_vm11, %vm1727_vm10  ;;  %v1747_v20 = vand.u32 2147483648, %v1720_v32  ;;  %v1745_v25 = vand.u32 2147483647, %v1720_v32  ;;  %vm1741_vm15 = vweird.f32 %v1720_v32 }
0x17b4   :  { %v1723_v15 = vsub.f32 1.0, %v1722_v40 }
0x17b5   :  { %v1748_v29 = vor.u32 1.1754944e-38, %v1747_v20  ;;  %vm1746_vm1 = vcmp.eq.f32.partialorder %v1745_v25, 8.507059e+37 }
0x17b6   :  { %v1724_v47 = vmul.f32 %v2206_v39, %v1723_v15 }
0x17b8   :  { %v1725_v52 = vadd.f32 %v2206_v39, %v1724_v47 }
0x17b9   :  { %v2208_v9 = vpop.eup %2207 }
0x17ba   :  { %v1729_v14 = vsel %vm1728_vm12, %v2206_v39, %v1725_v52  ;;  %v1737_v22 = vmul.f32 %v2208_v9, %v1720_v32  ;;  %vm1742_vm14 = vweird.f32 %v2208_v9  ;;  %v2072_v39 = vld [vmem:[%s3371_s13] ss:$0 sm:$0xff]  ;;  %s1941_s13 = sshll.u32 %s2369_s11, 4  ;;  %s1942_s13 = int_to_ptr.vmem [resolvable:$true] %s1941_s13 }
0x17bb   :  { %v1734_v26 = vsel %vm1731_vm13, %v1733_v10, %v1729_v14  ;;  %vm1743_vm0 = vmor %vm1741_vm15, %vm1742_vm14 }
0x17bc   :  { %v1738_v23 = vsub.f32 1.0, %v1737_v22  ;;  %v1735_v17 = vmul.f32 %v2202_v2, %v1734_v26 }
0x17be   :  { %v1739_v24 = vmul.f32 %v2208_v9, %v1738_v23  ;;  %2054 = vmatmul.msk.f32.vlgmr.msra.gmra.mxu0 %vm1702_vm9, %v1735_v17 }
0x17c0   :  { %v1740_v13 = vadd.f32 %v2208_v9, %v1739_v24 }
0x17c2   :  { %v1744_v31 = vsel %vm1743_vm0, %v2208_v9, %v1740_v13 }
0x17c3   :  { %v1749_v12 = vsel %vm1746_vm1, %v1748_v29, %v1744_v31 }
0x17c4   :  { %v1750_v5 = vmul.f32 %v2204_v16, %v1749_v12 }
0x17c6   :  { %2055 = vmatmul.msk.f32.vlgmr.msrb.gmra.mxu1 %vm1702_vm9, %v1750_v5 }
0x183b   :  { %v1771_v41 = vpop.f32.mrf.mxu0 }
0x183c   :  { %1801 = vrot.lane.b32.xlu2 %v1771_v41, %s2368_s19 }
0x1843   :  { %v1794_v58 = vpop.f32.mrf.mxu1 }
0x1844   :  { %1803 = vrot.lane.b32.xlu0 %v1794_v58, %s2368_s19  ;;  %1547 = vrot.lane.b32.xlu2 %v3059_v33, %s2368_s19  ;;  %v1811_v33 = vld [vmem:[%s3379_s25 + $0x10] sm:$0xff] }
0x1845   :  { %1842 = vmatpush.msra.mxu2 %v1811_v33 }
0x1847   :  { %1843 = vmatpush.msra.mxu2 %v1810_v42 }
0x1849   :  { %1844 = vmatpush.msra.mxu2 %v1809_v3 }
0x184c   :  { %1559 = vrot.lane.b32.xlu2 %v3056_v61, %s2368_s19 }
0x1854   :  { %1564 = vrot.lane.b32.xlu2 %v3193_v44, %s2368_s19  ;;  %v1859_v44 = vld [vmem:[%s3370_s12 + $0x28] sm:$0xff] }
0x1855   :  { %1882 = vmatpush.msrb.mxu3 %v1859_v44 }
0x1857   :  { %1883 = vmatpush.msrb.mxu3 %v1858_v4 }
0x1859   :  { %1884 = vmatpush.msrb.mxu3 %v1857_v48 }
0x185b   :  { %1885 = vmatpush.msrb.mxu3 %v1856_v0 }
0x185d   :  { %1886 = vmatpush.msrb.mxu3 %v1855_v1 }
0x1896   :  { %v1802_v61 = vpop.permute.xlu2 %1801 }
0x1897   :  { %v1807_v60 = vsel %vm318_vm8, %v3231_v62, %v1802_v61 }
0x1898   :  { %1845 = vmatmul.f32.vlgmr.msra.gmra.mxu2 %v1807_v60 }
0x189e   :  { %v1548_v50 = vpop.permute.xlu2 %1547 }
0x189f   :  { %1551 = vst.msk [vmem:[#allocation10 - $0x6] sm:$0xc0] %vm1550_vm2, %v1548_v50 }
0x18a6   :  { %v1560_v62 = vpop.permute.xlu2 %1559 }
0x18a7   :  { %1562 = vst.msk [vmem:[#allocation12 - $0x6] sm:$0xc0] %vm1550_vm2, %v1560_v62 }
0x18ae   :  { %v1565_v30 = vpop.permute.xlu2 %1564 }
0x18af   :  { %1568 = vst.msk [vmem:[#allocation12 - $0x4] sm:$0xc0] %vm1550_vm2, %v1565_v30 }
0x18b6   :  { %v1804_v35 = vpop.permute.xlu0 %1803 }
0x18b7   :  { %v1808_v45 = vsel %vm318_vm8, %v3235_v63, %v1804_v35  ;;  %v1854_v63 = vld [vmem:[%s3370_s12] sm:$0xff] }
0x18b8   :  { %1848 = vmatmul.f32.gmra.mxu2 %v1808_v45  ;;  %1887 = vmatpush.msrb.mxu3 %v1854_v63 }
0x191b   :  { %v1846_v2 = vpop.f32.mrf.mxu2 }
0x191c   :  { %v1847_v7 = vadd.f32 %v2071_v19, %v1846_v2 }
0x191e   :  { %2209 = vtanh.f32 %v1847_v7 }
0x1924   :  { %v2210_v11 = vpop.eup %2209 }
0x1925   :  { %2056 = vmatmul.msk.f32.vlgmr.msrb.gmra.mxu3 %vm318_vm8, %v2210_v11 }
0x193b   :  { %v1849_v16 = vpop.f32.mrf.mxu2 }
0x193c   :  { %v1850_v21 = vadd.f32 %v2071_v19, %v1849_v16 }
0x193e   :  { %2211 = vtanh.f32 %v1850_v21 }
0x1944   :  { %v2212_v51 = vpop.eup %2211 }
0x1945   :  { %2057 = vmatmul.msk.f32.gmra.mxu3 %vm318_vm8, %v2212_v51 }
0x19a8   :  { %v1889_v40 = vpop.f32.mrf.mxu3 }
0x19a9   :  { %v1890_v32 = vadd.f32 %v2072_v39, %v1889_v40 }
0x19ab   :  { %v1896_v15 = vsel %vm1895_vm3, %v1890_v32, -inf }
0x19ac   :  { %1897 = vmax.xlane.f32.xlu1 %v1896_v15 }
0x19c8   :  { %v1892_v43 = vpop.f32.mrf.mxu3 }
0x19c9   :  { %v1893_v47 = vadd.f32 %v2072_v39, %v1892_v43 }
0x19cb   :  { %v1899_v49 = vsel %vm1895_vm3, %v1893_v47, -inf }
0x19cc   :  { %1900 = vmax.xlane.f32.xlu1 %v1899_v49 }
0x1a1f   :  { %v1898_v52 = vpop.xlane.xlu1 %1897 }
0x1a20   :  { %v1902_v9 = vsub.f32 %v1890_v32, %v1898_v52 }
0x1a22   :  { %v1904_v10 = vmul.f32 1.442695, %v1902_v9 }
0x1a24   :  { %2213 = vpow2.f32 %v1904_v10 }
0x1a2a   :  { %v2214_v14 = vpop.eup %2213 }
0x1a2b   :  { %v1908_v22 = vsel %vm1895_vm3, %v2214_v14, 0.0 }
0x1a2c   :  { %1909 = vadd.xlane.f32.xlu1 %v1908_v22 }
0x1a3f   :  { %v1901_v26 = vpop.xlane.xlu1 %1900 }
0x1a40   :  { %v1903_v23 = vsub.f32 %v1893_v47, %v1901_v26 }
0x1a42   :  { %v1906_v17 = vmul.f32 1.442695, %v1903_v23 }
0x1a44   :  { %2215 = vpow2.f32 %v1906_v17 }
0x1a45   :  { %1553 = vrot.lane.b32.xlu1 %v3196_v6, %s2368_s19  ;;  %s1954_s19 = sshll.u32 %s2370_s24, 4  ;;  %s1955_s19 = int_to_ptr.vmem [resolvable:$true] %s1954_s19 }
0x1a4a   :  { %v2216_v20 = vpop.eup %2215 }
0x1a4b   :  { %v1911_v24 = vsel %vm1895_vm3, %v2216_v20, 0.0 }
0x1a4c   :  { %1912 = vadd.xlane.f32.xlu0 %v1911_v24 }
0x1a9f   :  { %v1910_v25 = vpop.xlane.xlu1 %1909 }
0x1aa0   :  { %2217 = vlog2.f32 %v1910_v25 }
0x1aa6   :  { %v2218_v13 = vpop.eup %2217 }
0x1aa7   :  { %v1915_v29 = vmul.f32 0.6931472, %v2218_v13 }
0x1aa9   :  { %v1918_v31 = vadd.f32 %v1915_v29, %v1898_v52 }
0x1aab   :  { %v1920_v12 = vsub.f32 %v1890_v32, %v1918_v31 }
0x1aad   :  { %1922 = vst.msk [vmem:[#allocation9] sm:$0xff] %vm1895_vm3, %v1920_v12 }
0x1ab7   :  { %v1554_v6 = vpop.permute.xlu1 %1553 }
0x1ab8   :  { %1557 = vst.msk [vmem:[#allocation10 - $0x4] sm:$0xc0] %vm1550_vm2, %v1554_v6 }
0x1ab9   :  { %1949 = dma.vmem_to_hbm [thread:$0]  %s1942_s13, 64, %s1944_s30, [#allocation11], %s2371_s21, %s2371_s21, %s2372_s7  }
0x1aba   :  { %1962 = dma.vmem_to_hbm [thread:$0]  %s1955_s19, 64, %s1957_s29, [#allocation11], %s2371_s21, %s2371_s21, %s2372_s7  }
0x1abf   :  { %v1913_v5 = vpop.xlane.xlu0 %1912 }
0x1ac0   :  { %2219 = vlog2.f32 %v1913_v5 }
0x1ac6   :  { %v2220_v27 = vpop.eup %2219 }
0x1ac7   :  { %v1917_v34 = vmul.f32 0.6931472, %v2220_v27 }
0x1ac9   :  { %v1919_v28 = vadd.f32 %v1917_v34, %v1901_v26 }
0x1acb   :  { %v1921_v8 = vsub.f32 %v1893_v47, %v1919_v28 }
0x1acd   :  { %1923 = vst.msk [vmem:[#allocation9 + $0x8] sm:$0xff] %vm1895_vm3, %v1921_v8 }
0x1ace   :  { %1936 = dma.vmem_to_hbm [thread:$0]  %s1929_s1, 256, %s1931_s16, [#allocation6], %s2374_s5, %s2374_s5, %s2375_s0  }
0x1acf   :  { %2359 = dma.done.wait [#allocation6], 256  }
0x1ad0   :  { %2360 = vsyncadd [#allocation6], 4294967040 }
0x1ad1   :  { %2361 = dma.done.wait [#allocation11], 128  }
0x1ad2   :  { %2362 = vsyncadd [#allocation11], 4294967168 }
0x1ad3   :  { %1975 = vsyncpa [#allocation5], 1 }
0x1ad4   :  { %1976 = vsyncpa [#allocation8], 1 }
0x1ad5   :  { %1977 = vsyncpa [#allocation6], 1 }
0x1ad6   :  { %1978 = vsyncpa [#allocation11], 1 }

</bundles_post_ra>
